<compile_context>
chip_gen: v7x
topology: tpu7x:2x2x1
jax: 0.10.0
libtpu: 0.0.40
codegen_flags: <defaults>
</compile_context>

<pallas_src>
import jax
import jax.numpy as jnp
from jax import lax
from jax.experimental import pallas as pl
from jax.experimental.pallas import tpu as pltpu


K = 5      # conv kernel size
WP = 32    # flat row stride == input image width (32x32 input implied by fc1)

# Per-sample flat slab lengths (lane extents) per stage.
L_X = 1536   # input pixels (1024 real)
L_Y1 = 1280  # conv1 output slab (valid outputs end at 27*32+27 = 891)
L_P1 = 1152  # pool1 slab        (valid end 858)
L_Y2 = 768   # conv2 output slab (valid end 594)
L_P2 = 640   # pool2 slab        (valid end 528)

# Maximum lane shift each stage applies when reading its source slab.
_SH_C1 = 4 * WP + 4        # 132
_SH_P1 = WP + 1            # 33
_SH_C2 = 2 * (4 * WP + 4)  # 264
_SH_P2 = 2 * WP + 2        # 66
_SH_FC = 4 * (4 * WP + 4)  # 528

# No in-kernel read may run off the end of its source slab (ref OOB on TPU is
# unchecked), and x must hold the real 32x32 image.
assert L_X >= 32 * 32
assert L_X >= L_Y1 + _SH_C1
assert L_Y1 >= L_P1 + _SH_P1
assert L_P1 >= L_Y2 + _SH_C2
assert L_Y2 >= L_P2 + _SH_P2
assert L_P2 > _SH_FC
# Lane offsets of per-sample segments must stay 128-aligned for dense stores.
assert all(v % 128 == 0 for v in (L_X, L_Y1, L_P1, L_Y2, L_P2))


# ---------------------------------------------------------------------------
# Fused kernel: whole LeNet1 forward for Bs batch samples per grid step
# ---------------------------------------------------------------------------
def _lenet1_kernel(x_ref, w1_ref, b1_ref, w2_ref, b2_ref,
                   wf1_ref, bf1_ref, wf2_ref, bf2_ref, o_ref,
                   im1_ref, y1_ref, p1_ref, im2_ref, y2_ref, p2_ref, fcs_ref):
    """x_ref:(Bs,Cp,L_X) bf16   w*: packed bf16   b*: f32 (OC,1)
       o_ref:(num_class,Bs) f32
       scratch: im1 (Cp*25, Bs*L_Y1) bf16, y1 (OC1, Bs*L_Y1) f32,
                p1 (OC1, Bs*L_P1) bf16, im2 (OC1*25, Bs*L_Y2) bf16,
                y2 (OC2P, Bs*L_Y2) f32, p2 (OC2P, Bs*L_P2) bf16,
                fcs (OC2P*25, Bs) bf16."""
    f32 = jnp.float32
    bf16 = jnp.bfloat16
    bs = x_ref.shape[0]
    cp = x_ref.shape[1]
    oc1 = w1_ref.shape[0]
    oc2p = w2_ref.shape[0]

    # ---- im2col for conv1: 25 lane-shifted x slices stacked on sublanes ----
    for t in range(K * K):
        kh, kw = divmod(t, K)
        off = kh * WP + kw                                  # <= 132
        for b in range(bs):
            im1_ref[t * cp:(t + 1) * cp, b * L_Y1:(b + 1) * L_Y1] = \
                x_ref[b, :, off:off + L_Y1]

    # ---- conv1 + bias + ReLU: one packed matmul per sample (K = cp*25) ----
    for b in range(bs):
        y = jnp.dot(w1_ref[...], im1_ref[:, b * L_Y1:(b + 1) * L_Y1],
                    preferred_element_type=f32)
        y1_ref[:, b * L_Y1:(b + 1) * L_Y1] = jnp.maximum(y + b1_ref[...], 0.0)

    # ---- pool1: 2x2/stride-2 max = 4 shifted reads from the y1 VMEM slab ----
    for b in range(bs):
        s = b * L_Y1
        m = jnp.maximum(
            jnp.maximum(y1_ref[:, s:s + L_P1], y1_ref[:, s + 1:s + 1 + L_P1]),
            jnp.maximum(y1_ref[:, s + WP:s + WP + L_P1],
                        y1_ref[:, s + WP + 1:s + WP + 1 + L_P1]))
        p1_ref[:, b * L_P1:(b + 1) * L_P1] = m.astype(bf16)

    # ---- im2col for conv2 (taps live on the stride-2 pooled grid) ----
    for t in range(K * K):
        kh, kw = divmod(t, K)
        off = 2 * (kh * WP + kw)                            # <= 264
        for b in range(bs):
            im2_ref[t * oc1:(t + 1) * oc1, b * L_Y2:(b + 1) * L_Y2] = \
                p1_ref[:, b * L_P1 + off:b * L_P1 + off + L_Y2]

    # ---- conv2 + bias + ReLU (K = 400 packed matmul per sample) ----
    for b in range(bs):
        y = jnp.dot(w2_ref[...], im2_ref[:, b * L_Y2:(b + 1) * L_Y2],
                    preferred_element_type=f32)
        y2_ref[:, b * L_Y2:(b + 1) * L_Y2] = jnp.maximum(y + b2_ref[...], 0.0)

    # ---- pool2 (stride-4 holey layout) ----
    for b in range(bs):
        s = b * L_Y2
        m = jnp.maximum(
            jnp.maximum(y2_ref[:, s:s + L_P2], y2_ref[:, s + 2:s + 2 + L_P2]),
            jnp.maximum(y2_ref[:, s + 2 * WP:s + 2 * WP + L_P2],
                        y2_ref[:, s + 2 * WP + 2:s + 2 * WP + 2 + L_P2]))
        p2_ref[:, b * L_P2:(b + 1) * L_P2] = m.astype(bf16)

    # ---- gather the 25 valid pool2 taps per sample into a (oc2p*25, Bs)
    #      stack; PyTorch's channel-major flatten order is absorbed into the
    #      fc1 weight packing. ----
    for t in range(K * K):
        kh, kw = divmod(t, K)
        off = 4 * (kh * WP + kw)                            # <= 528
        for b in range(bs):
            col = b * L_P2 + off
            fcs_ref[t * oc2p:(t + 1) * oc2p, b:b + 1] = p2_ref[:, col:col + 1]

    # ---- fc1 + ReLU + fc2 (all Bs samples at once, lane-major logits) ----
    # TODO(synk): nn.Dropout between fc1 and ReLU is identity in eval mode;
    # training-mode dropout mask is not implemented.
    z = jnp.dot(wf1_ref[...], fcs_ref[...], preferred_element_type=f32)
    z = jnp.maximum(z + bf1_ref[...], 0.0)
    out = jnp.dot(wf2_ref[...], z.astype(bf16),
                  preferred_element_type=f32) + bf2_ref[...]
    o_ref[...] = out.astype(o_ref.dtype)


# ---------------------------------------------------------------------------
# One-time parameter packing (pre-transpose / pre-cast at init)
# ---------------------------------------------------------------------------
def pack_params(params):
    bf16, f32 = jnp.bfloat16, jnp.float32

    w1 = params["conv1_w"]                                   # (16, C, 5, 5)
    oc1, c_in = w1.shape[0], w1.shape[1]
    cp = max(8, ((c_in + 7) // 8) * 8)                       # pad channels
    w1p = jnp.transpose(w1, (0, 2, 3, 1))                    # (O, kh, kw, C)
    w1p = jnp.pad(w1p, ((0, 0), (0, 0), (0, 0), (0, cp - c_in)))
    w1p = w1p.reshape(oc1, K * K * cp)                       # col = t*cp + c

    w2 = params["conv2_w"]                                   # (18, 16, 5, 5)
    oc2, ic2 = w2.shape[0], w2.shape[1]
    oc2p = ((oc2 + 7) // 8) * 8                              # 18 -> 24
    w2p = jnp.transpose(w2, (0, 2, 3, 1)).reshape(oc2, K * K * ic2)
    w2p = jnp.pad(w2p, ((0, oc2p - oc2), (0, 0)))            # zero extra OCs

    fc1_w = params["fc1_w"]                                  # (32, 18*5*5)
    nf1 = fc1_w.shape[0]
    wf1 = fc1_w.reshape(nf1, oc2, K, K)                      # torch flatten: c*25+t
    wf1 = jnp.transpose(wf1, (0, 2, 3, 1))                   # (N, kh, kw, c)
    wf1 = jnp.pad(wf1, ((0, 0), (0, 0), (0, 0), (0, oc2p - oc2)))
    wf1p = wf1.reshape(nf1, K * K * oc2p)                    # col = t*oc2p + c

    fc2_w = params["fc2_w"]                                  # (num_class, 32)
    return dict(
        w1=w1p.astype(bf16),
        b1=params["conv1_b"].reshape(oc1, 1).astype(f32),
        w2=w2p.astype(bf16),
        b2=jnp.pad(params["conv2_b"], (0, oc2p - oc2)).reshape(oc2p, 1).astype(f32),
        wf1=wf1p.astype(bf16),
        bf1=params["fc1_b"].reshape(nf1, 1).astype(f32),
        wf2=fc2_w.astype(bf16),
        bf2=params["fc2_b"].reshape(fc2_w.shape[0], 1).astype(f32),
    )


def _pick_block_batch(n):
    # Keep >= 2 grid steps when the batch allows (v7x has 2 TensorCores and
    # the grid axis is marked "parallel"); cap the block at 4 samples so the
    # per-step VMEM footprint (~1.4 MiB/sample) stays well inside every
    # generation's scoped-VMEM default.
    return max(1, min(4, n // 2)) if n > 1 else 1


# ---------------------------------------------------------------------------
# Forward pass
# ---------------------------------------------------------------------------
@jax.jit
def lenet1_forward(packed, x):
    n, c_in, h, w = x.shape
    if h != 32 or w != 32:
        raise ValueError("LeNet1 implies 32x32 spatial input (fc1 in_dim=18*5*5)")
    cp = packed["w1"].shape[1] // (K * K)
    oc1 = packed["w1"].shape[0]
    oc2p = packed["w2"].shape[0]
    nf1 = packed["wf1"].shape[0]
    num_class = packed["wf2"].shape[0]
    assert c_in <= cp

    bs = _pick_block_batch(n)
    n_pad = ((n + bs - 1) // bs) * bs
    g = n_pad // bs

    # Flatten spatial, cast to bf16 (matmul operand), zero-pad channels/lanes
    # and (if needed) the batch up to a multiple of the block size.
    xf = x.astype(jnp.bfloat16).reshape(n, c_in, h * w)
    xf = jnp.pad(xf, ((0, n_pad - n), (0, cp - c_in), (0, L_X - h * w)))

    out = pl.pallas_call(
        _lenet1_kernel,
        out_shape=jax.ShapeDtypeStruct((g, num_class, bs), jnp.float32),
        grid=(g,),
        in_specs=[
            pl.BlockSpec((bs, cp, L_X), lambda i: (i, 0, 0)),          # x block
            pl.BlockSpec(packed["w1"].shape, lambda i: (0, 0)),        # conv1 w
            pl.BlockSpec(packed["b1"].shape, lambda i: (0, 0)),        # conv1 b
            pl.BlockSpec(packed["w2"].shape, lambda i: (0, 0)),        # conv2 w
            pl.BlockSpec(packed["b2"].shape, lambda i: (0, 0)),        # conv2 b
            pl.BlockSpec(packed["wf1"].shape, lambda i: (0, 0)),       # fc1 w
            pl.BlockSpec(packed["bf1"].shape, lambda i: (0, 0)),       # fc1 b
            pl.BlockSpec(packed["wf2"].shape, lambda i: (0, 0)),       # fc2 w
            pl.BlockSpec(packed["bf2"].shape, lambda i: (0, 0)),       # fc2 b
        ],
        out_specs=pl.BlockSpec((None, num_class, bs), lambda i: (i, 0, 0)),
        scratch_shapes=[
            pltpu.VMEM((cp * K * K, bs * L_Y1), jnp.bfloat16),   # im2col conv1
            pltpu.VMEM((oc1, bs * L_Y1), jnp.float32),           # y1
            pltpu.VMEM((oc1, bs * L_P1), jnp.bfloat16),          # pool1
            pltpu.VMEM((oc1 * K * K, bs * L_Y2), jnp.bfloat16),  # im2col conv2
            pltpu.VMEM((oc2p, bs * L_Y2), jnp.float32),          # y2
            pltpu.VMEM((oc2p, bs * L_P2), jnp.bfloat16),         # pool2
            pltpu.VMEM((oc2p * K * K, bs), jnp.bfloat16),        # fc1 gather
        ],
        compiler_params=pltpu.CompilerParams(
            dimension_semantics=("parallel",),
            vmem_limit_bytes=32 * 1024 * 1024,
        ),
    )(xf, packed["w1"], packed["b1"], packed["w2"], packed["b2"],
      packed["wf1"], packed["bf1"], packed["wf2"], packed["bf2"])

    # (grid, num_class, Bs) lane-major logits -> (n, num_class)
    return out.transpose(0, 2, 1).reshape(n_pad, num_class)[:n]


# ---------------------------------------------------------------------------
# Parameters (PyTorch-style uniform(-1/sqrt(fan_in), 1/sqrt(fan_in)))
# ---------------------------------------------------------------------------
def _uniform(key, shape, fan_in):
    bound = 1.0 / jnp.sqrt(float(fan_in))
    return jax.random.uniform(key, shape, jnp.float32, -bound, bound)


def init_params(key, size_c, num_class=2):
    keys = jax.random.split(key, 8)
    return {
        "conv1_w": _uniform(keys[0], (16, size_c, 5, 5), size_c * 25),
        "conv1_b": _uniform(keys[1], (16,), size_c * 25),
        "conv2_w": _uniform(keys[2], (18, 16, 5, 5), 16 * 25),
        "conv2_b": _uniform(keys[3], (18,), 16 * 25),
        "fc1_w": _uniform(keys[4], (32, 18 * 5 * 5), 18 * 5 * 5),
        "fc1_b": _uniform(keys[5], (32,), 18 * 5 * 5),
        "fc2_w": _uniform(keys[6], (num_class, 32), 32),
        "fc2_b": _uniform(keys[7], (num_class,), 32),
    }


# ---------------------------------------------------------------------------
# Pure-JAX reference (PyTorch eval-mode semantics) for a correctness check
# ---------------------------------------------------------------------------
def lenet1_reference(params, x):
    def conv_relu(y, w, b):
        dn = lax.conv_dimension_numbers(y.shape, w.shape, ("NCHW", "OIHW", "NCHW"))
        y = lax.conv_general_dilated(y, w, (1, 1), "VALID", dimension_numbers=dn)
        return jax.nn.relu(y + b.reshape(1, -1, 1, 1))

    def pool(y):
        return lax.reduce_window(y, -jnp.inf, lax.max,
                                 (1, 1, 2, 2), (1, 1, 2, 2), "VALID")

    y = pool(conv_relu(x, params["conv1_w"], params["conv1_b"]))
    y = pool(conv_relu(y, params["conv2_w"], params["conv2_b"]))
    y = y.reshape(y.shape[0], -1)
    y = jax.nn.relu(y @ params["fc1_w"].T + params["fc1_b"])
    return y @ params["fc2_w"].T + params["fc2_b"]


if __name__ == "__main__":
    size_c, batch, num_class = 3, 2, 2
    key = jax.random.PRNGKey(0)
    k_x, k_p = jax.random.split(key)
    # Spatial 32x32 is implied by the module: 32 -> 28 -> 14 -> 10 -> 5.
    x = jax.random.normal(k_x, (batch, size_c, 32, 32), dtype=jnp.float32)
    params = init_params(k_p, size_c, num_class=num_class)
    packed = pack_params(params)

    out = lenet1_forward(packed, x)
    jax.block_until_ready(out)
    assert out.shape == (batch, num_class), out.shape
    assert out.dtype == jnp.float32

    ref = lenet1_reference(params, x)
    max_err = float(jnp.max(jnp.abs(out - ref)))
    # bf16 MXU operands (per perf review): typical error ~1e-3; 5e-2 bound.
    assert max_err < 5e-2, f"kernel/reference mismatch: max_err={max_err}"
    print("KERNEL_OK")
</pallas_src>

<mosaic_0001>
module attributes {stable_mosaic.version = 11 : i64} {
  func.func @_lenet1_kernel(%arg0: i32, %arg1: memref<1x8x1536xbf16, #tpu.memory_space<vmem>>, %arg2: memref<16x200xbf16, #tpu.memory_space<vmem>>, %arg3: memref<16x1xf32, #tpu.memory_space<vmem>>, %arg4: memref<24x400xbf16, #tpu.memory_space<vmem>>, %arg5: memref<24x1xf32, #tpu.memory_space<vmem>>, %arg6: memref<32x600xbf16, #tpu.memory_space<vmem>>, %arg7: memref<32x1xf32, #tpu.memory_space<vmem>>, %arg8: memref<2x32xbf16, #tpu.memory_space<vmem>>, %arg9: memref<2x1xf32, #tpu.memory_space<vmem>>, %arg10: memref<1x2x1xf32, #tpu.memory_space<vmem>>, %arg11: memref<200x1280xbf16, #tpu.memory_space<vmem>>, %arg12: memref<16x1280xf32, #tpu.memory_space<vmem>>, %arg13: memref<16x1152xbf16, #tpu.memory_space<vmem>>, %arg14: memref<400x768xbf16, #tpu.memory_space<vmem>>, %arg15: memref<24x768xf32, #tpu.memory_space<vmem>>, %arg16: memref<24x640xbf16, #tpu.memory_space<vmem>>, %arg17: memref<600x1xbf16, #tpu.memory_space<vmem>>) attributes {dimension_semantics = [#tpu.dimension_semantics<parallel>], iteration_bounds = array<i64: 2>, scalar_prefetch = 0 : i64, scratch_operands = 7 : i64, tpu.core_type = #tpu.core_type<tc>, window_params = [{transform_indices = @transform_0, window_bounds = array<i64: 1, 8, 1536>}, {pipeline_mode = #tpu.pipeline_mode<synchronous>, transform_indices = @transform_1, window_bounds = array<i64: 16, 200>}, {pipeline_mode = #tpu.pipeline_mode<synchronous>, transform_indices = @transform_2, window_bounds = array<i64: 16, 1>}, {pipeline_mode = #tpu.pipeline_mode<synchronous>, transform_indices = @transform_3, window_bounds = array<i64: 24, 400>}, {pipeline_mode = #tpu.pipeline_mode<synchronous>, transform_indices = @transform_4, window_bounds = array<i64: 24, 1>}, {pipeline_mode = #tpu.pipeline_mode<synchronous>, transform_indices = @transform_5, window_bounds = array<i64: 32, 600>}, {pipeline_mode = #tpu.pipeline_mode<synchronous>, transform_indices = @transform_6, window_bounds = array<i64: 32, 1>}, {pipeline_mode = #tpu.pipeline_mode<synchronous>, transform_indices = @transform_7, window_bounds = array<i64: 2, 32>}, {pipeline_mode = #tpu.pipeline_mode<synchronous>, transform_indices = @transform_8, window_bounds = array<i64: 2, 1>}, {transform_indices = @transform_9, window_bounds = array<i64: 1, 2, 1>}]} {
    %c0 = arith.constant 0 : index
    %c0_0 = arith.constant 0 : index
    %c0_1 = arith.constant 0 : index
    %0 = vector.load %arg1[%c0, %c0_0, %c0_1] : memref<1x8x1536xbf16, #tpu.memory_space<vmem>>, vector<1x8x1280xbf16>
    %1 = vector.shape_cast %0 : vector<1x8x1280xbf16> to vector<8x1280xbf16>
    %c0_2 = arith.constant 0 : index
    %c0_3 = arith.constant 0 : index
    %2 = vector.load %arg11[%c0_2, %c0_3] : memref<200x1280xbf16, #tpu.memory_space<vmem>>, vector<8x1280xbf16>
    tpu.vector_store %arg11[%c0_2, %c0_3], %1 {strides = array<i32>} : memref<200x1280xbf16, #tpu.memory_space<vmem>>, vector<8x1280xbf16>,
    %c0_4 = arith.constant 0 : index
    %c0_5 = arith.constant 0 : index
    %c1 = arith.constant 1 : index
    %3 = vector.load %arg1[%c0_4, %c0_5, %c1] : memref<1x8x1536xbf16, #tpu.memory_space<vmem>>, vector<1x8x1280xbf16>
    %4 = vector.shape_cast %3 : vector<1x8x1280xbf16> to vector<8x1280xbf16>
    %c8 = arith.constant 8 : index
    %c0_6 = arith.constant 0 : index
    %5 = vector.load %arg11[%c8, %c0_6] : memref<200x1280xbf16, #tpu.memory_space<vmem>>, vector<8x1280xbf16>
    tpu.vector_store %arg11[%c8, %c0_6], %4 {strides = array<i32>} : memref<200x1280xbf16, #tpu.memory_space<vmem>>, vector<8x1280xbf16>,
    %c0_7 = arith.constant 0 : index
    %c0_8 = arith.constant 0 : index
    %c2 = arith.constant 2 : index
    %6 = vector.load %arg1[%c0_7, %c0_8, %c2] : memref<1x8x1536xbf16, #tpu.memory_space<vmem>>, vector<1x8x1280xbf16>
    %7 = vector.shape_cast %6 : vector<1x8x1280xbf16> to vector<8x1280xbf16>
    %c16 = arith.constant 16 : index
    %c0_9 = arith.constant 0 : index
    %8 = vector.load %arg11[%c16, %c0_9] : memref<200x1280xbf16, #tpu.memory_space<vmem>>, vector<8x1280xbf16>
    tpu.vector_store %arg11[%c16, %c0_9], %7 {strides = array<i32>} : memref<200x1280xbf16, #tpu.memory_space<vmem>>, vector<8x1280xbf16>,
    %c0_10 = arith.constant 0 : index
    %c0_11 = arith.constant 0 : index
    %c3 = arith.constant 3 : index
    %9 = vector.load %arg1[%c0_10, %c0_11, %c3] : memref<1x8x1536xbf16, #tpu.memory_space<vmem>>, vector<1x8x1280xbf16>
    %10 = vector.shape_cast %9 : vector<1x8x1280xbf16> to vector<8x1280xbf16>
    %c24 = arith.constant 24 : index
    %c0_12 = arith.constant 0 : index
    %11 = vector.load %arg11[%c24, %c0_12] : memref<200x1280xbf16, #tpu.memory_space<vmem>>, vector<8x1280xbf16>
    tpu.vector_store %arg11[%c24, %c0_12], %10 {strides = array<i32>} : memref<200x1280xbf16, #tpu.memory_space<vmem>>, vector<8x1280xbf16>,
    %c0_13 = arith.constant 0 : index
    %c0_14 = arith.constant 0 : index
    %c4 = arith.constant 4 : index
    %12 = vector.load %arg1[%c0_13, %c0_14, %c4] : memref<1x8x1536xbf16, #tpu.memory_space<vmem>>, vector<1x8x1280xbf16>
    %13 = vector.shape_cast %12 : vector<1x8x1280xbf16> to vector<8x1280xbf16>
    %c32 = arith.constant 32 : index
    %c0_15 = arith.constant 0 : index
    %14 = vector.load %arg11[%c32, %c0_15] : memref<200x1280xbf16, #tpu.memory_space<vmem>>, vector<8x1280xbf16>
    tpu.vector_store %arg11[%c32, %c0_15], %13 {strides = array<i32>} : memref<200x1280xbf16, #tpu.memory_space<vmem>>, vector<8x1280xbf16>,
    %c0_16 = arith.constant 0 : index
    %c0_17 = arith.constant 0 : index
    %c32_18 = arith.constant 32 : index
    %15 = vector.load %arg1[%c0_16, %c0_17, %c32_18] : memref<1x8x1536xbf16, #tpu.memory_space<vmem>>, vector<1x8x1280xbf16>
    %16 = vector.shape_cast %15 : vector<1x8x1280xbf16> to vector<8x1280xbf16>
    %c40 = arith.constant 40 : index
    %c0_19 = arith.constant 0 : index
    %17 = vector.load %arg11[%c40, %c0_19] : memref<200x1280xbf16, #tpu.memory_space<vmem>>, vector<8x1280xbf16>
    tpu.vector_store %arg11[%c40, %c0_19], %16 {strides = array<i32>} : memref<200x1280xbf16, #tpu.memory_space<vmem>>, vector<8x1280xbf16>,
    %c0_20 = arith.constant 0 : index
    %c0_21 = arith.constant 0 : index
    %c33 = arith.constant 33 : index
    %18 = vector.load %arg1[%c0_20, %c0_21, %c33] : memref<1x8x1536xbf16, #tpu.memory_space<vmem>>, vector<1x8x1280xbf16>
    %19 = vector.shape_cast %18 : vector<1x8x1280xbf16> to vector<8x1280xbf16>
    %c48 = arith.constant 48 : index
    %c0_22 = arith.constant 0 : index
    %20 = vector.load %arg11[%c48, %c0_22] : memref<200x1280xbf16, #tpu.memory_space<vmem>>, vector<8x1280xbf16>
    tpu.vector_store %arg11[%c48, %c0_22], %19 {strides = array<i32>} : memref<200x1280xbf16, #tpu.memory_space<vmem>>, vector<8x1280xbf16>,
    %c0_23 = arith.constant 0 : index
    %c0_24 = arith.constant 0 : index
    %c34 = arith.constant 34 : index
    %21 = vector.load %arg1[%c0_23, %c0_24, %c34] : memref<1x8x1536xbf16, #tpu.memory_space<vmem>>, vector<1x8x1280xbf16>
    %22 = vector.shape_cast %21 : vector<1x8x1280xbf16> to vector<8x1280xbf16>
    %c56 = arith.constant 56 : index
    %c0_25 = arith.constant 0 : index
    %23 = vector.load %arg11[%c56, %c0_25] : memref<200x1280xbf16, #tpu.memory_space<vmem>>, vector<8x1280xbf16>
    tpu.vector_store %arg11[%c56, %c0_25], %22 {strides = array<i32>} : memref<200x1280xbf16, #tpu.memory_space<vmem>>, vector<8x1280xbf16>,
    %c0_26 = arith.constant 0 : index
    %c0_27 = arith.constant 0 : index
    %c35 = arith.constant 35 : index
    %24 = vector.load %arg1[%c0_26, %c0_27, %c35] : memref<1x8x1536xbf16, #tpu.memory_space<vmem>>, vector<1x8x1280xbf16>
    %25 = vector.shape_cast %24 : vector<1x8x1280xbf16> to vector<8x1280xbf16>
    %c64 = arith.constant 64 : index
    %c0_28 = arith.constant 0 : index
    %26 = vector.load %arg11[%c64, %c0_28] : memref<200x1280xbf16, #tpu.memory_space<vmem>>, vector<8x1280xbf16>
    tpu.vector_store %arg11[%c64, %c0_28], %25 {strides = array<i32>} : memref<200x1280xbf16, #tpu.memory_space<vmem>>, vector<8x1280xbf16>,
    %c0_29 = arith.constant 0 : index
    %c0_30 = arith.constant 0 : index
    %c36 = arith.constant 36 : index
    %27 = vector.load %arg1[%c0_29, %c0_30, %c36] : memref<1x8x1536xbf16, #tpu.memory_space<vmem>>, vector<1x8x1280xbf16>
    %28 = vector.shape_cast %27 : vector<1x8x1280xbf16> to vector<8x1280xbf16>
    %c72 = arith.constant 72 : index
    %c0_31 = arith.constant 0 : index
    %29 = vector.load %arg11[%c72, %c0_31] : memref<200x1280xbf16, #tpu.memory_space<vmem>>, vector<8x1280xbf16>
    tpu.vector_store %arg11[%c72, %c0_31], %28 {strides = array<i32>} : memref<200x1280xbf16, #tpu.memory_space<vmem>>, vector<8x1280xbf16>,
    %c0_32 = arith.constant 0 : index
    %c0_33 = arith.constant 0 : index
    %c64_34 = arith.constant 64 : index
    %30 = vector.load %arg1[%c0_32, %c0_33, %c64_34] : memref<1x8x1536xbf16, #tpu.memory_space<vmem>>, vector<1x8x1280xbf16>
    %31 = vector.shape_cast %30 : vector<1x8x1280xbf16> to vector<8x1280xbf16>
    %c80 = arith.constant 80 : index
    %c0_35 = arith.constant 0 : index
    %32 = vector.load %arg11[%c80, %c0_35] : memref<200x1280xbf16, #tpu.memory_space<vmem>>, vector<8x1280xbf16>
    tpu.vector_store %arg11[%c80, %c0_35], %31 {strides = array<i32>} : memref<200x1280xbf16, #tpu.memory_space<vmem>>, vector<8x1280xbf16>,
    %c0_36 = arith.constant 0 : index
    %c0_37 = arith.constant 0 : index
    %c65 = arith.constant 65 : index
    %33 = vector.load %arg1[%c0_36, %c0_37, %c65] : memref<1x8x1536xbf16, #tpu.memory_space<vmem>>, vector<1x8x1280xbf16>
    %34 = vector.shape_cast %33 : vector<1x8x1280xbf16> to vector<8x1280xbf16>
    %c88 = arith.constant 88 : index
    %c0_38 = arith.constant 0 : index
    %35 = vector.load %arg11[%c88, %c0_38] : memref<200x1280xbf16, #tpu.memory_space<vmem>>, vector<8x1280xbf16>
    tpu.vector_store %arg11[%c88, %c0_38], %34 {strides = array<i32>} : memref<200x1280xbf16, #tpu.memory_space<vmem>>, vector<8x1280xbf16>,
    %c0_39 = arith.constant 0 : index
    %c0_40 = arith.constant 0 : index
    %c66 = arith.constant 66 : index
    %36 = vector.load %arg1[%c0_39, %c0_40, %c66] : memref<1x8x1536xbf16, #tpu.memory_space<vmem>>, vector<1x8x1280xbf16>
    %37 = vector.shape_cast %36 : vector<1x8x1280xbf16> to vector<8x1280xbf16>
    %c96 = arith.constant 96 : index
    %c0_41 = arith.constant 0 : index
    %38 = vector.load %arg11[%c96, %c0_41] : memref<200x1280xbf16, #tpu.memory_space<vmem>>, vector<8x1280xbf16>
    tpu.vector_store %arg11[%c96, %c0_41], %37 {strides = array<i32>} : memref<200x1280xbf16, #tpu.memory_space<vmem>>, vector<8x1280xbf16>,
    %c0_42 = arith.constant 0 : index
    %c0_43 = arith.constant 0 : index
    %c67 = arith.constant 67 : index
    %39 = vector.load %arg1[%c0_42, %c0_43, %c67] : memref<1x8x1536xbf16, #tpu.memory_space<vmem>>, vector<1x8x1280xbf16>
    %40 = vector.shape_cast %39 : vector<1x8x1280xbf16> to vector<8x1280xbf16>
    %c104 = arith.constant 104 : index
    %c0_44 = arith.constant 0 : index
    %41 = vector.load %arg11[%c104, %c0_44] : memref<200x1280xbf16, #tpu.memory_space<vmem>>, vector<8x1280xbf16>
    tpu.vector_store %arg11[%c104, %c0_44], %40 {strides = array<i32>} : memref<200x1280xbf16, #tpu.memory_space<vmem>>, vector<8x1280xbf16>,
    %c0_45 = arith.constant 0 : index
    %c0_46 = arith.constant 0 : index
    %c68 = arith.constant 68 : index
    %42 = vector.load %arg1[%c0_45, %c0_46, %c68] : memref<1x8x1536xbf16, #tpu.memory_space<vmem>>, vector<1x8x1280xbf16>
    %43 = vector.shape_cast %42 : vector<1x8x1280xbf16> to vector<8x1280xbf16>
    %c112 = arith.constant 112 : index
    %c0_47 = arith.constant 0 : index
    %44 = vector.load %arg11[%c112, %c0_47] : memref<200x1280xbf16, #tpu.memory_space<vmem>>, vector<8x1280xbf16>
    tpu.vector_store %arg11[%c112, %c0_47], %43 {strides = array<i32>} : memref<200x1280xbf16, #tpu.memory_space<vmem>>, vector<8x1280xbf16>,
    %c0_48 = arith.constant 0 : index
    %c0_49 = arith.constant 0 : index
    %c96_50 = arith.constant 96 : index
    %45 = vector.load %arg1[%c0_48, %c0_49, %c96_50] : memref<1x8x1536xbf16, #tpu.memory_space<vmem>>, vector<1x8x1280xbf16>
    %46 = vector.shape_cast %45 : vector<1x8x1280xbf16> to vector<8x1280xbf16>
    %c120 = arith.constant 120 : index
    %c0_51 = arith.constant 0 : index
    %47 = vector.load %arg11[%c120, %c0_51] : memref<200x1280xbf16, #tpu.memory_space<vmem>>, vector<8x1280xbf16>
    tpu.vector_store %arg11[%c120, %c0_51], %46 {strides = array<i32>} : memref<200x1280xbf16, #tpu.memory_space<vmem>>, vector<8x1280xbf16>,
    %c0_52 = arith.constant 0 : index
    %c0_53 = arith.constant 0 : index
    %c97 = arith.constant 97 : index
    %48 = vector.load %arg1[%c0_52, %c0_53, %c97] : memref<1x8x1536xbf16, #tpu.memory_space<vmem>>, vector<1x8x1280xbf16>
    %49 = vector.shape_cast %48 : vector<1x8x1280xbf16> to vector<8x1280xbf16>
    %c128 = arith.constant 128 : index
    %c0_54 = arith.constant 0 : index
    %50 = vector.load %arg11[%c128, %c0_54] : memref<200x1280xbf16, #tpu.memory_space<vmem>>, vector<8x1280xbf16>
    tpu.vector_store %arg11[%c128, %c0_54], %49 {strides = array<i32>} : memref<200x1280xbf16, #tpu.memory_space<vmem>>, vector<8x1280xbf16>,
    %c0_55 = arith.constant 0 : index
    %c0_56 = arith.constant 0 : index
    %c98 = arith.constant 98 : index
    %51 = vector.load %arg1[%c0_55, %c0_56, %c98] : memref<1x8x1536xbf16, #tpu.memory_space<vmem>>, vector<1x8x1280xbf16>
    %52 = vector.shape_cast %51 : vector<1x8x1280xbf16> to vector<8x1280xbf16>
    %c136 = arith.constant 136 : index
    %c0_57 = arith.constant 0 : index
    %53 = vector.load %arg11[%c136, %c0_57] : memref<200x1280xbf16, #tpu.memory_space<vmem>>, vector<8x1280xbf16>
    tpu.vector_store %arg11[%c136, %c0_57], %52 {strides = array<i32>} : memref<200x1280xbf16, #tpu.memory_space<vmem>>, vector<8x1280xbf16>,
    %c0_58 = arith.constant 0 : index
    %c0_59 = arith.constant 0 : index
    %c99 = arith.constant 99 : index
    %54 = vector.load %arg1[%c0_58, %c0_59, %c99] : memref<1x8x1536xbf16, #tpu.memory_space<vmem>>, vector<1x8x1280xbf16>
    %55 = vector.shape_cast %54 : vector<1x8x1280xbf16> to vector<8x1280xbf16>
    %c144 = arith.constant 144 : index
    %c0_60 = arith.constant 0 : index
    %56 = vector.load %arg11[%c144, %c0_60] : memref<200x1280xbf16, #tpu.memory_space<vmem>>, vector<8x1280xbf16>
    tpu.vector_store %arg11[%c144, %c0_60], %55 {strides = array<i32>} : memref<200x1280xbf16, #tpu.memory_space<vmem>>, vector<8x1280xbf16>,
    %c0_61 = arith.constant 0 : index
    %c0_62 = arith.constant 0 : index
    %c100 = arith.constant 100 : index
    %57 = vector.load %arg1[%c0_61, %c0_62, %c100] : memref<1x8x1536xbf16, #tpu.memory_space<vmem>>, vector<1x8x1280xbf16>
    %58 = vector.shape_cast %57 : vector<1x8x1280xbf16> to vector<8x1280xbf16>
    %c152 = arith.constant 152 : index
    %c0_63 = arith.constant 0 : index
    %59 = vector.load %arg11[%c152, %c0_63] : memref<200x1280xbf16, #tpu.memory_space<vmem>>, vector<8x1280xbf16>
    tpu.vector_store %arg11[%c152, %c0_63], %58 {strides = array<i32>} : memref<200x1280xbf16, #tpu.memory_space<vmem>>, vector<8x1280xbf16>,
    %c0_64 = arith.constant 0 : index
    %c0_65 = arith.constant 0 : index
    %c128_66 = arith.constant 128 : index
    %60 = vector.load %arg1[%c0_64, %c0_65, %c128_66] : memref<1x8x1536xbf16, #tpu.memory_space<vmem>>, vector<1x8x1280xbf16>
    %61 = vector.shape_cast %60 : vector<1x8x1280xbf16> to vector<8x1280xbf16>
    %c160 = arith.constant 160 : index
    %c0_67 = arith.constant 0 : index
    %62 = vector.load %arg11[%c160, %c0_67] : memref<200x1280xbf16, #tpu.memory_space<vmem>>, vector<8x1280xbf16>
    tpu.vector_store %arg11[%c160, %c0_67], %61 {strides = array<i32>} : memref<200x1280xbf16, #tpu.memory_space<vmem>>, vector<8x1280xbf16>,
    %c0_68 = arith.constant 0 : index
    %c0_69 = arith.constant 0 : index
    %c129 = arith.constant 129 : index
    %63 = vector.load %arg1[%c0_68, %c0_69, %c129] : memref<1x8x1536xbf16, #tpu.memory_space<vmem>>, vector<1x8x1280xbf16>
    %64 = vector.shape_cast %63 : vector<1x8x1280xbf16> to vector<8x1280xbf16>
    %c168 = arith.constant 168 : index
    %c0_70 = arith.constant 0 : index
    %65 = vector.load %arg11[%c168, %c0_70] : memref<200x1280xbf16, #tpu.memory_space<vmem>>, vector<8x1280xbf16>
    tpu.vector_store %arg11[%c168, %c0_70], %64 {strides = array<i32>} : memref<200x1280xbf16, #tpu.memory_space<vmem>>, vector<8x1280xbf16>,
    %c0_71 = arith.constant 0 : index
    %c0_72 = arith.constant 0 : index
    %c130 = arith.constant 130 : index
    %66 = vector.load %arg1[%c0_71, %c0_72, %c130] : memref<1x8x1536xbf16, #tpu.memory_space<vmem>>, vector<1x8x1280xbf16>
    %67 = vector.shape_cast %66 : vector<1x8x1280xbf16> to vector<8x1280xbf16>
    %c176 = arith.constant 176 : index
    %c0_73 = arith.constant 0 : index
    %68 = vector.load %arg11[%c176, %c0_73] : memref<200x1280xbf16, #tpu.memory_space<vmem>>, vector<8x1280xbf16>
    tpu.vector_store %arg11[%c176, %c0_73], %67 {strides = array<i32>} : memref<200x1280xbf16, #tpu.memory_space<vmem>>, vector<8x1280xbf16>,
    %c0_74 = arith.constant 0 : index
    %c0_75 = arith.constant 0 : index
    %c131 = arith.constant 131 : index
    %69 = vector.load %arg1[%c0_74, %c0_75, %c131] : memref<1x8x1536xbf16, #tpu.memory_space<vmem>>, vector<1x8x1280xbf16>
    %70 = vector.shape_cast %69 : vector<1x8x1280xbf16> to vector<8x1280xbf16>
    %c184 = arith.constant 184 : index
    %c0_76 = arith.constant 0 : index
    %71 = vector.load %arg11[%c184, %c0_76] : memref<200x1280xbf16, #tpu.memory_space<vmem>>, vector<8x1280xbf16>
    tpu.vector_store %arg11[%c184, %c0_76], %70 {strides = array<i32>} : memref<200x1280xbf16, #tpu.memory_space<vmem>>, vector<8x1280xbf16>,
    %c0_77 = arith.constant 0 : index
    %c0_78 = arith.constant 0 : index
    %c132 = arith.constant 132 : index
    %72 = vector.load %arg1[%c0_77, %c0_78, %c132] : memref<1x8x1536xbf16, #tpu.memory_space<vmem>>, vector<1x8x1280xbf16>
    %73 = vector.shape_cast %72 : vector<1x8x1280xbf16> to vector<8x1280xbf16>
    %c192 = arith.constant 192 : index
    %c0_79 = arith.constant 0 : index
    %74 = vector.load %arg11[%c192, %c0_79] : memref<200x1280xbf16, #tpu.memory_space<vmem>>, vector<8x1280xbf16>
    tpu.vector_store %arg11[%c192, %c0_79], %73 {strides = array<i32>} : memref<200x1280xbf16, #tpu.memory_space<vmem>>, vector<8x1280xbf16>,
    %c0_80 = arith.constant 0 : index
    %c0_81 = arith.constant 0 : index
    %75 = vector.load %arg2[%c0_80, %c0_81] : memref<16x200xbf16, #tpu.memory_space<vmem>>, vector<16x200xbf16>
    %c0_82 = arith.constant 0 : index
    %c0_83 = arith.constant 0 : index
    %76 = vector.load %arg11[%c0_82, %c0_83] : memref<200x1280xbf16, #tpu.memory_space<vmem>>, vector<200x1280xbf16>
    %cst = arith.constant dense<0.000000e+00> : vector<16x1280xf32>
    %77 = tpu.matmul %75, %76, %cst {dimension_numbers = #tpu.dot_dimension_numbers<[1], [0], [0], [1], [0, 0, 1, 1], [], []>} : vector<16x200xbf16>, vector<200x1280xbf16>, vector<16x1280xf32> -> vector<16x1280xf32>
    %c0_84 = arith.constant 0 : index
    %c0_85 = arith.constant 0 : index
    %78 = vector.load %arg3[%c0_84, %c0_85] : memref<16x1xf32, #tpu.memory_space<vmem>>, vector<16x1xf32>
    %79 = vector.broadcast %78 : vector<16x1xf32> to vector<16x1280xf32>
    %80 = arith.addf %77, %79 : vector<16x1280xf32>
    %cst_86 = arith.constant 0.000000e+00 : f32
    %81 = vector.broadcast %cst_86 : f32 to vector<16x1280xf32>
    %82 = arith.maximumf %80, %81 : vector<16x1280xf32>
    %c0_87 = arith.constant 0 : index
    %c0_88 = arith.constant 0 : index
    %83 = vector.load %arg12[%c0_87, %c0_88] : memref<16x1280xf32, #tpu.memory_space<vmem>>, vector<16x1280xf32>
    tpu.vector_store %arg12[%c0_87, %c0_88], %82 {strides = array<i32>} : memref<16x1280xf32, #tpu.memory_space<vmem>>, vector<16x1280xf32>,
    %c0_89 = arith.constant 0 : index
    %c0_90 = arith.constant 0 : index
    %84 = vector.load %arg12[%c0_89, %c0_90] : memref<16x1280xf32, #tpu.memory_space<vmem>>, vector<16x1152xf32>
    %c0_91 = arith.constant 0 : index
    %c1_92 = arith.constant 1 : index
    %85 = vector.load %arg12[%c0_91, %c1_92] : memref<16x1280xf32, #tpu.memory_space<vmem>>, vector<16x1152xf32>
    %86 = arith.maximumf %84, %85 : vector<16x1152xf32>
    %c0_93 = arith.constant 0 : index
    %c32_94 = arith.constant 32 : index
    %87 = vector.load %arg12[%c0_93, %c32_94] : memref<16x1280xf32, #tpu.memory_space<vmem>>, vector<16x1152xf32>
    %c0_95 = arith.constant 0 : index
    %c33_96 = arith.constant 33 : index
    %88 = vector.load %arg12[%c0_95, %c33_96] : memref<16x1280xf32, #tpu.memory_space<vmem>>, vector<16x1152xf32>
    %89 = arith.maximumf %87, %88 : vector<16x1152xf32>
    %90 = arith.maximumf %86, %89 : vector<16x1152xf32>
    %91 = arith.truncf %90 : vector<16x1152xf32> to vector<16x1152xbf16>
    %c0_97 = arith.constant 0 : index
    %c0_98 = arith.constant 0 : index
    %92 = vector.load %arg13[%c0_97, %c0_98] : memref<16x1152xbf16, #tpu.memory_space<vmem>>, vector<16x1152xbf16>
    tpu.vector_store %arg13[%c0_97, %c0_98], %91 {strides = array<i32>} : memref<16x1152xbf16, #tpu.memory_space<vmem>>, vector<16x1152xbf16>,
    %c0_99 = arith.constant 0 : index
    %c0_100 = arith.constant 0 : index
    %93 = vector.load %arg13[%c0_99, %c0_100] : memref<16x1152xbf16, #tpu.memory_space<vmem>>, vector<16x768xbf16>
    %c0_101 = arith.constant 0 : index
    %c0_102 = arith.constant 0 : index
    %94 = vector.load %arg14[%c0_101, %c0_102] : memref<400x768xbf16, #tpu.memory_space<vmem>>, vector<16x768xbf16>
    tpu.vector_store %arg14[%c0_101, %c0_102], %93 {strides = array<i32>} : memref<400x768xbf16, #tpu.memory_space<vmem>>, vector<16x768xbf16>,
    %c0_103 = arith.constant 0 : index
    %c2_104 = arith.constant 2 : index
    %95 = vector.load %arg13[%c0_103, %c2_104] : memref<16x1152xbf16, #tpu.memory_space<vmem>>, vector<16x768xbf16>
    %c16_105 = arith.constant 16 : index
    %c0_106 = arith.constant 0 : index
    %96 = vector.load %arg14[%c16_105, %c0_106] : memref<400x768xbf16, #tpu.memory_space<vmem>>, vector<16x768xbf16>
    tpu.vector_store %arg14[%c16_105, %c0_106], %95 {strides = array<i32>} : memref<400x768xbf16, #tpu.memory_space<vmem>>, vector<16x768xbf16>,
    %c0_107 = arith.constant 0 : index
    %c4_108 = arith.constant 4 : index
    %97 = vector.load %arg13[%c0_107, %c4_108] : memref<16x1152xbf16, #tpu.memory_space<vmem>>, vector<16x768xbf16>
    %c32_109 = arith.constant 32 : index
    %c0_110 = arith.constant 0 : index
    %98 = vector.load %arg14[%c32_109, %c0_110] : memref<400x768xbf16, #tpu.memory_space<vmem>>, vector<16x768xbf16>
    tpu.vector_store %arg14[%c32_109, %c0_110], %97 {strides = array<i32>} : memref<400x768xbf16, #tpu.memory_space<vmem>>, vector<16x768xbf16>,
    %c0_111 = arith.constant 0 : index
    %c6 = arith.constant 6 : index
    %99 = vector.load %arg13[%c0_111, %c6] : memref<16x1152xbf16, #tpu.memory_space<vmem>>, vector<16x768xbf16>
    %c48_112 = arith.constant 48 : index
    %c0_113 = arith.constant 0 : index
    %100 = vector.load %arg14[%c48_112, %c0_113] : memref<400x768xbf16, #tpu.memory_space<vmem>>, vector<16x768xbf16>
    tpu.vector_store %arg14[%c48_112, %c0_113], %99 {strides = array<i32>} : memref<400x768xbf16, #tpu.memory_space<vmem>>, vector<16x768xbf16>,
    %c0_114 = arith.constant 0 : index
    %c8_115 = arith.constant 8 : index
    %101 = vector.load %arg13[%c0_114, %c8_115] : memref<16x1152xbf16, #tpu.memory_space<vmem>>, vector<16x768xbf16>
    %c64_116 = arith.constant 64 : index
    %c0_117 = arith.constant 0 : index
    %102 = vector.load %arg14[%c64_116, %c0_117] : memref<400x768xbf16, #tpu.memory_space<vmem>>, vector<16x768xbf16>
    tpu.vector_store %arg14[%c64_116, %c0_117], %101 {strides = array<i32>} : memref<400x768xbf16, #tpu.memory_space<vmem>>, vector<16x768xbf16>,
    %c0_118 = arith.constant 0 : index
    %c64_119 = arith.constant 64 : index
    %103 = vector.load %arg13[%c0_118, %c64_119] : memref<16x1152xbf16, #tpu.memory_space<vmem>>, vector<16x768xbf16>
    %c80_120 = arith.constant 80 : index
    %c0_121 = arith.constant 0 : index
    %104 = vector.load %arg14[%c80_120, %c0_121] : memref<400x768xbf16, #tpu.memory_space<vmem>>, vector<16x768xbf16>
    tpu.vector_store %arg14[%c80_120, %c0_121], %103 {strides = array<i32>} : memref<400x768xbf16, #tpu.memory_space<vmem>>, vector<16x768xbf16>,
    %c0_122 = arith.constant 0 : index
    %c66_123 = arith.constant 66 : index
    %105 = vector.load %arg13[%c0_122, %c66_123] : memref<16x1152xbf16, #tpu.memory_space<vmem>>, vector<16x768xbf16>
    %c96_124 = arith.constant 96 : index
    %c0_125 = arith.constant 0 : index
    %106 = vector.load %arg14[%c96_124, %c0_125] : memref<400x768xbf16, #tpu.memory_space<vmem>>, vector<16x768xbf16>
    tpu.vector_store %arg14[%c96_124, %c0_125], %105 {strides = array<i32>} : memref<400x768xbf16, #tpu.memory_space<vmem>>, vector<16x768xbf16>,
    %c0_126 = arith.constant 0 : index
    %c68_127 = arith.constant 68 : index
    %107 = vector.load %arg13[%c0_126, %c68_127] : memref<16x1152xbf16, #tpu.memory_space<vmem>>, vector<16x768xbf16>
    %c112_128 = arith.constant 112 : index
    %c0_129 = arith.constant 0 : index
    %108 = vector.load %arg14[%c112_128, %c0_129] : memref<400x768xbf16, #tpu.memory_space<vmem>>, vector<16x768xbf16>
    tpu.vector_store %arg14[%c112_128, %c0_129], %107 {strides = array<i32>} : memref<400x768xbf16, #tpu.memory_space<vmem>>, vector<16x768xbf16>,
    %c0_130 = arith.constant 0 : index
    %c70 = arith.constant 70 : index
    %109 = vector.load %arg13[%c0_130, %c70] : memref<16x1152xbf16, #tpu.memory_space<vmem>>, vector<16x768xbf16>
    %c128_131 = arith.constant 128 : index
    %c0_132 = arith.constant 0 : index
    %110 = vector.load %arg14[%c128_131, %c0_132] : memref<400x768xbf16, #tpu.memory_space<vmem>>, vector<16x768xbf16>
    tpu.vector_store %arg14[%c128_131, %c0_132], %109 {strides = array<i32>} : memref<400x768xbf16, #tpu.memory_space<vmem>>, vector<16x768xbf16>,
    %c0_133 = arith.constant 0 : index
    %c72_134 = arith.constant 72 : index
    %111 = vector.load %arg13[%c0_133, %c72_134] : memref<16x1152xbf16, #tpu.memory_space<vmem>>, vector<16x768xbf16>
    %c144_135 = arith.constant 144 : index
    %c0_136 = arith.constant 0 : index
    %112 = vector.load %arg14[%c144_135, %c0_136] : memref<400x768xbf16, #tpu.memory_space<vmem>>, vector<16x768xbf16>
    tpu.vector_store %arg14[%c144_135, %c0_136], %111 {strides = array<i32>} : memref<400x768xbf16, #tpu.memory_space<vmem>>, vector<16x768xbf16>,
    %c0_137 = arith.constant 0 : index
    %c128_138 = arith.constant 128 : index
    %113 = vector.load %arg13[%c0_137, %c128_138] : memref<16x1152xbf16, #tpu.memory_space<vmem>>, vector<16x768xbf16>
    %c160_139 = arith.constant 160 : index
    %c0_140 = arith.constant 0 : index
    %114 = vector.load %arg14[%c160_139, %c0_140] : memref<400x768xbf16, #tpu.memory_space<vmem>>, vector<16x768xbf16>
    tpu.vector_store %arg14[%c160_139, %c0_140], %113 {strides = array<i32>} : memref<400x768xbf16, #tpu.memory_space<vmem>>, vector<16x768xbf16>,
    %c0_141 = arith.constant 0 : index
    %c130_142 = arith.constant 130 : index
    %115 = vector.load %arg13[%c0_141, %c130_142] : memref<16x1152xbf16, #tpu.memory_space<vmem>>, vector<16x768xbf16>
    %c176_143 = arith.constant 176 : index
    %c0_144 = arith.constant 0 : index
    %116 = vector.load %arg14[%c176_143, %c0_144] : memref<400x768xbf16, #tpu.memory_space<vmem>>, vector<16x768xbf16>
    tpu.vector_store %arg14[%c176_143, %c0_144], %115 {strides = array<i32>} : memref<400x768xbf16, #tpu.memory_space<vmem>>, vector<16x768xbf16>,
    %c0_145 = arith.constant 0 : index
    %c132_146 = arith.constant 132 : index
    %117 = vector.load %arg13[%c0_145, %c132_146] : memref<16x1152xbf16, #tpu.memory_space<vmem>>, vector<16x768xbf16>
    %c192_147 = arith.constant 192 : index
    %c0_148 = arith.constant 0 : index
    %118 = vector.load %arg14[%c192_147, %c0_148] : memref<400x768xbf16, #tpu.memory_space<vmem>>, vector<16x768xbf16>
    tpu.vector_store %arg14[%c192_147, %c0_148], %117 {strides = array<i32>} : memref<400x768xbf16, #tpu.memory_space<vmem>>, vector<16x768xbf16>,
    %c0_149 = arith.constant 0 : index
    %c134 = arith.constant 134 : index
    %119 = vector.load %arg13[%c0_149, %c134] : memref<16x1152xbf16, #tpu.memory_space<vmem>>, vector<16x768xbf16>
    %c208 = arith.constant 208 : index
    %c0_150 = arith.constant 0 : index
    %120 = vector.load %arg14[%c208, %c0_150] : memref<400x768xbf16, #tpu.memory_space<vmem>>, vector<16x768xbf16>
    tpu.vector_store %arg14[%c208, %c0_150], %119 {strides = array<i32>} : memref<400x768xbf16, #tpu.memory_space<vmem>>, vector<16x768xbf16>,
    %c0_151 = arith.constant 0 : index
    %c136_152 = arith.constant 136 : index
    %121 = vector.load %arg13[%c0_151, %c136_152] : memref<16x1152xbf16, #tpu.memory_space<vmem>>, vector<16x768xbf16>
    %c224 = arith.constant 224 : index
    %c0_153 = arith.constant 0 : index
    %122 = vector.load %arg14[%c224, %c0_153] : memref<400x768xbf16, #tpu.memory_space<vmem>>, vector<16x768xbf16>
    tpu.vector_store %arg14[%c224, %c0_153], %121 {strides = array<i32>} : memref<400x768xbf16, #tpu.memory_space<vmem>>, vector<16x768xbf16>,
    %c0_154 = arith.constant 0 : index
    %c192_155 = arith.constant 192 : index
    %123 = vector.load %arg13[%c0_154, %c192_155] : memref<16x1152xbf16, #tpu.memory_space<vmem>>, vector<16x768xbf16>
    %c240 = arith.constant 240 : index
    %c0_156 = arith.constant 0 : index
    %124 = vector.load %arg14[%c240, %c0_156] : memref<400x768xbf16, #tpu.memory_space<vmem>>, vector<16x768xbf16>
    tpu.vector_store %arg14[%c240, %c0_156], %123 {strides = array<i32>} : memref<400x768xbf16, #tpu.memory_space<vmem>>, vector<16x768xbf16>,
    %c0_157 = arith.constant 0 : index
    %c194 = arith.constant 194 : index
    %125 = vector.load %arg13[%c0_157, %c194] : memref<16x1152xbf16, #tpu.memory_space<vmem>>, vector<16x768xbf16>
    %c256 = arith.constant 256 : index
    %c0_158 = arith.constant 0 : index
    %126 = vector.load %arg14[%c256, %c0_158] : memref<400x768xbf16, #tpu.memory_space<vmem>>, vector<16x768xbf16>
    tpu.vector_store %arg14[%c256, %c0_158], %125 {strides = array<i32>} : memref<400x768xbf16, #tpu.memory_space<vmem>>, vector<16x768xbf16>,
    %c0_159 = arith.constant 0 : index
    %c196 = arith.constant 196 : index
    %127 = vector.load %arg13[%c0_159, %c196] : memref<16x1152xbf16, #tpu.memory_space<vmem>>, vector<16x768xbf16>
    %c272 = arith.constant 272 : index
    %c0_160 = arith.constant 0 : index
    %128 = vector.load %arg14[%c272, %c0_160] : memref<400x768xbf16, #tpu.memory_space<vmem>>, vector<16x768xbf16>
    tpu.vector_store %arg14[%c272, %c0_160], %127 {strides = array<i32>} : memref<400x768xbf16, #tpu.memory_space<vmem>>, vector<16x768xbf16>,
    %c0_161 = arith.constant 0 : index
    %c198 = arith.constant 198 : index
    %129 = vector.load %arg13[%c0_161, %c198] : memref<16x1152xbf16, #tpu.memory_space<vmem>>, vector<16x768xbf16>
    %c288 = arith.constant 288 : index
    %c0_162 = arith.constant 0 : index
    %130 = vector.load %arg14[%c288, %c0_162] : memref<400x768xbf16, #tpu.memory_space<vmem>>, vector<16x768xbf16>
    tpu.vector_store %arg14[%c288, %c0_162], %129 {strides = array<i32>} : memref<400x768xbf16, #tpu.memory_space<vmem>>, vector<16x768xbf16>,
    %c0_163 = arith.constant 0 : index
    %c200 = arith.constant 200 : index
    %131 = vector.load %arg13[%c0_163, %c200] : memref<16x1152xbf16, #tpu.memory_space<vmem>>, vector<16x768xbf16>
    %c304 = arith.constant 304 : index
    %c0_164 = arith.constant 0 : index
    %132 = vector.load %arg14[%c304, %c0_164] : memref<400x768xbf16, #tpu.memory_space<vmem>>, vector<16x768xbf16>
    tpu.vector_store %arg14[%c304, %c0_164], %131 {strides = array<i32>} : memref<400x768xbf16, #tpu.memory_space<vmem>>, vector<16x768xbf16>,
    %c0_165 = arith.constant 0 : index
    %c256_166 = arith.constant 256 : index
    %133 = vector.load %arg13[%c0_165, %c256_166] : memref<16x1152xbf16, #tpu.memory_space<vmem>>, vector<16x768xbf16>
    %c320 = arith.constant 320 : index
    %c0_167 = arith.constant 0 : index
    %134 = vector.load %arg14[%c320, %c0_167] : memref<400x768xbf16, #tpu.memory_space<vmem>>, vector<16x768xbf16>
    tpu.vector_store %arg14[%c320, %c0_167], %133 {strides = array<i32>} : memref<400x768xbf16, #tpu.memory_space<vmem>>, vector<16x768xbf16>,
    %c0_168 = arith.constant 0 : index
    %c258 = arith.constant 258 : index
    %135 = vector.load %arg13[%c0_168, %c258] : memref<16x1152xbf16, #tpu.memory_space<vmem>>, vector<16x768xbf16>
    %c336 = arith.constant 336 : index
    %c0_169 = arith.constant 0 : index
    %136 = vector.load %arg14[%c336, %c0_169] : memref<400x768xbf16, #tpu.memory_space<vmem>>, vector<16x768xbf16>
    tpu.vector_store %arg14[%c336, %c0_169], %135 {strides = array<i32>} : memref<400x768xbf16, #tpu.memory_space<vmem>>, vector<16x768xbf16>,
    %c0_170 = arith.constant 0 : index
    %c260 = arith.constant 260 : index
    %137 = vector.load %arg13[%c0_170, %c260] : memref<16x1152xbf16, #tpu.memory_space<vmem>>, vector<16x768xbf16>
    %c352 = arith.constant 352 : index
    %c0_171 = arith.constant 0 : index
    %138 = vector.load %arg14[%c352, %c0_171] : memref<400x768xbf16, #tpu.memory_space<vmem>>, vector<16x768xbf16>
    tpu.vector_store %arg14[%c352, %c0_171], %137 {strides = array<i32>} : memref<400x768xbf16, #tpu.memory_space<vmem>>, vector<16x768xbf16>,
    %c0_172 = arith.constant 0 : index
    %c262 = arith.constant 262 : index
    %139 = vector.load %arg13[%c0_172, %c262] : memref<16x1152xbf16, #tpu.memory_space<vmem>>, vector<16x768xbf16>
    %c368 = arith.constant 368 : index
    %c0_173 = arith.constant 0 : index
    %140 = vector.load %arg14[%c368, %c0_173] : memref<400x768xbf16, #tpu.memory_space<vmem>>, vector<16x768xbf16>
    tpu.vector_store %arg14[%c368, %c0_173], %139 {strides = array<i32>} : memref<400x768xbf16, #tpu.memory_space<vmem>>, vector<16x768xbf16>,
    %c0_174 = arith.constant 0 : index
    %c264 = arith.constant 264 : index
    %141 = vector.load %arg13[%c0_174, %c264] : memref<16x1152xbf16, #tpu.memory_space<vmem>>, vector<16x768xbf16>
    %c384 = arith.constant 384 : index
    %c0_175 = arith.constant 0 : index
    %142 = vector.load %arg14[%c384, %c0_175] : memref<400x768xbf16, #tpu.memory_space<vmem>>, vector<16x768xbf16>
    tpu.vector_store %arg14[%c384, %c0_175], %141 {strides = array<i32>} : memref<400x768xbf16, #tpu.memory_space<vmem>>, vector<16x768xbf16>,
    %c0_176 = arith.constant 0 : index
    %c0_177 = arith.constant 0 : index
    %143 = vector.load %arg4[%c0_176, %c0_177] : memref<24x400xbf16, #tpu.memory_space<vmem>>, vector<24x400xbf16>
    %c0_178 = arith.constant 0 : index
    %c0_179 = arith.constant 0 : index
    %144 = vector.load %arg14[%c0_178, %c0_179] : memref<400x768xbf16, #tpu.memory_space<vmem>>, vector<400x768xbf16>
    %cst_180 = arith.constant dense<0.000000e+00> : vector<24x768xf32>
    %145 = tpu.matmul %143, %144, %cst_180 {dimension_numbers = #tpu.dot_dimension_numbers<[1], [0], [0], [1], [0, 0, 1, 1], [], []>} : vector<24x400xbf16>, vector<400x768xbf16>, vector<24x768xf32> -> vector<24x768xf32>
    %c0_181 = arith.constant 0 : index
    %c0_182 = arith.constant 0 : index
    %146 = vector.load %arg5[%c0_181, %c0_182] : memref<24x1xf32, #tpu.memory_space<vmem>>, vector<24x1xf32>
    %147 = vector.broadcast %146 : vector<24x1xf32> to vector<24x768xf32>
    %148 = arith.addf %145, %147 : vector<24x768xf32>
    %cst_183 = arith.constant 0.000000e+00 : f32
    %149 = vector.broadcast %cst_183 : f32 to vector<24x768xf32>
    %150 = arith.maximumf %148, %149 : vector<24x768xf32>
    %c0_184 = arith.constant 0 : index
    %c0_185 = arith.constant 0 : index
    %151 = vector.load %arg15[%c0_184, %c0_185] : memref<24x768xf32, #tpu.memory_space<vmem>>, vector<24x768xf32>
    tpu.vector_store %arg15[%c0_184, %c0_185], %150 {strides = array<i32>} : memref<24x768xf32, #tpu.memory_space<vmem>>, vector<24x768xf32>,
    %c0_186 = arith.constant 0 : index
    %c0_187 = arith.constant 0 : index
    %152 = vector.load %arg15[%c0_186, %c0_187] : memref<24x768xf32, #tpu.memory_space<vmem>>, vector<24x640xf32>
    %c0_188 = arith.constant 0 : index
    %c2_189 = arith.constant 2 : index
    %153 = vector.load %arg15[%c0_188, %c2_189] : memref<24x768xf32, #tpu.memory_space<vmem>>, vector<24x640xf32>
    %154 = arith.maximumf %152, %153 : vector<24x640xf32>
    %c0_190 = arith.constant 0 : index
    %c64_191 = arith.constant 64 : index
    %155 = vector.load %arg15[%c0_190, %c64_191] : memref<24x768xf32, #tpu.memory_space<vmem>>, vector<24x640xf32>
    %c0_192 = arith.constant 0 : index
    %c66_193 = arith.constant 66 : index
    %156 = vector.load %arg15[%c0_192, %c66_193] : memref<24x768xf32, #tpu.memory_space<vmem>>, vector<24x640xf32>
    %157 = arith.maximumf %155, %156 : vector<24x640xf32>
    %158 = arith.maximumf %154, %157 : vector<24x640xf32>
    %159 = arith.truncf %158 : vector<24x640xf32> to vector<24x640xbf16>
    %c0_194 = arith.constant 0 : index
    %c0_195 = arith.constant 0 : index
    %160 = vector.load %arg16[%c0_194, %c0_195] : memref<24x640xbf16, #tpu.memory_space<vmem>>, vector<24x640xbf16>
    tpu.vector_store %arg16[%c0_194, %c0_195], %159 {strides = array<i32>} : memref<24x640xbf16, #tpu.memory_space<vmem>>, vector<24x640xbf16>,
    %c0_196 = arith.constant 0 : index
    %c0_197 = arith.constant 0 : index
    %161 = vector.load %arg16[%c0_196, %c0_197] : memref<24x640xbf16, #tpu.memory_space<vmem>>, vector<24x1xbf16>
    %c0_198 = arith.constant 0 : index
    %c0_199 = arith.constant 0 : index
    %162 = vector.load %arg17[%c0_198, %c0_199] : memref<600x1xbf16, #tpu.memory_space<vmem>>, vector<24x1xbf16>
    tpu.vector_store %arg17[%c0_198, %c0_199], %161 {strides = array<i32>} : memref<600x1xbf16, #tpu.memory_space<vmem>>, vector<24x1xbf16>,
    %c0_200 = arith.constant 0 : index
    %c4_201 = arith.constant 4 : index
    %163 = vector.load %arg16[%c0_200, %c4_201] : memref<24x640xbf16, #tpu.memory_space<vmem>>, vector<24x1xbf16>
    %c24_202 = arith.constant 24 : index
    %c0_203 = arith.constant 0 : index
    %164 = vector.load %arg17[%c24_202, %c0_203] : memref<600x1xbf16, #tpu.memory_space<vmem>>, vector<24x1xbf16>
    tpu.vector_store %arg17[%c24_202, %c0_203], %163 {strides = array<i32>} : memref<600x1xbf16, #tpu.memory_space<vmem>>, vector<24x1xbf16>,
    %c0_204 = arith.constant 0 : index
    %c8_205 = arith.constant 8 : index
    %165 = vector.load %arg16[%c0_204, %c8_205] : memref<24x640xbf16, #tpu.memory_space<vmem>>, vector<24x1xbf16>
    %c48_206 = arith.constant 48 : index
    %c0_207 = arith.constant 0 : index
    %166 = vector.load %arg17[%c48_206, %c0_207] : memref<600x1xbf16, #tpu.memory_space<vmem>>, vector<24x1xbf16>
    tpu.vector_store %arg17[%c48_206, %c0_207], %165 {strides = array<i32>} : memref<600x1xbf16, #tpu.memory_space<vmem>>, vector<24x1xbf16>,
    %c0_208 = arith.constant 0 : index
    %c12 = arith.constant 12 : index
    %167 = vector.load %arg16[%c0_208, %c12] : memref<24x640xbf16, #tpu.memory_space<vmem>>, vector<24x1xbf16>
    %c72_209 = arith.constant 72 : index
    %c0_210 = arith.constant 0 : index
    %168 = vector.load %arg17[%c72_209, %c0_210] : memref<600x1xbf16, #tpu.memory_space<vmem>>, vector<24x1xbf16>
    tpu.vector_store %arg17[%c72_209, %c0_210], %167 {strides = array<i32>} : memref<600x1xbf16, #tpu.memory_space<vmem>>, vector<24x1xbf16>,
    %c0_211 = arith.constant 0 : index
    %c16_212 = arith.constant 16 : index
    %169 = vector.load %arg16[%c0_211, %c16_212] : memref<24x640xbf16, #tpu.memory_space<vmem>>, vector<24x1xbf16>
    %c96_213 = arith.constant 96 : index
    %c0_214 = arith.constant 0 : index
    %170 = vector.load %arg17[%c96_213, %c0_214] : memref<600x1xbf16, #tpu.memory_space<vmem>>, vector<24x1xbf16>
    tpu.vector_store %arg17[%c96_213, %c0_214], %169 {strides = array<i32>} : memref<600x1xbf16, #tpu.memory_space<vmem>>, vector<24x1xbf16>,
    %c0_215 = arith.constant 0 : index
    %c128_216 = arith.constant 128 : index
    %171 = vector.load %arg16[%c0_215, %c128_216] : memref<24x640xbf16, #tpu.memory_space<vmem>>, vector<24x1xbf16>
    %c120_217 = arith.constant 120 : index
    %c0_218 = arith.constant 0 : index
    %172 = vector.load %arg17[%c120_217, %c0_218] : memref<600x1xbf16, #tpu.memory_space<vmem>>, vector<24x1xbf16>
    tpu.vector_store %arg17[%c120_217, %c0_218], %171 {strides = array<i32>} : memref<600x1xbf16, #tpu.memory_space<vmem>>, vector<24x1xbf16>,
    %c0_219 = arith.constant 0 : index
    %c132_220 = arith.constant 132 : index
    %173 = vector.load %arg16[%c0_219, %c132_220] : memref<24x640xbf16, #tpu.memory_space<vmem>>, vector<24x1xbf16>
    %c144_221 = arith.constant 144 : index
    %c0_222 = arith.constant 0 : index
    %174 = vector.load %arg17[%c144_221, %c0_222] : memref<600x1xbf16, #tpu.memory_space<vmem>>, vector<24x1xbf16>
    tpu.vector_store %arg17[%c144_221, %c0_222], %173 {strides = array<i32>} : memref<600x1xbf16, #tpu.memory_space<vmem>>, vector<24x1xbf16>,
    %c0_223 = arith.constant 0 : index
    %c136_224 = arith.constant 136 : index
    %175 = vector.load %arg16[%c0_223, %c136_224] : memref<24x640xbf16, #tpu.memory_space<vmem>>, vector<24x1xbf16>
    %c168_225 = arith.constant 168 : index
    %c0_226 = arith.constant 0 : index
    %176 = vector.load %arg17[%c168_225, %c0_226] : memref<600x1xbf16, #tpu.memory_space<vmem>>, vector<24x1xbf16>
    tpu.vector_store %arg17[%c168_225, %c0_226], %175 {strides = array<i32>} : memref<600x1xbf16, #tpu.memory_space<vmem>>, vector<24x1xbf16>,
    %c0_227 = arith.constant 0 : index
    %c140 = arith.constant 140 : index
    %177 = vector.load %arg16[%c0_227, %c140] : memref<24x640xbf16, #tpu.memory_space<vmem>>, vector<24x1xbf16>
    %c192_228 = arith.constant 192 : index
    %c0_229 = arith.constant 0 : index
    %178 = vector.load %arg17[%c192_228, %c0_229] : memref<600x1xbf16, #tpu.memory_space<vmem>>, vector<24x1xbf16>
    tpu.vector_store %arg17[%c192_228, %c0_229], %177 {strides = array<i32>} : memref<600x1xbf16, #tpu.memory_space<vmem>>, vector<24x1xbf16>,
    %c0_230 = arith.constant 0 : index
    %c144_231 = arith.constant 144 : index
    %179 = vector.load %arg16[%c0_230, %c144_231] : memref<24x640xbf16, #tpu.memory_space<vmem>>, vector<24x1xbf16>
    %c216 = arith.constant 216 : index
    %c0_232 = arith.constant 0 : index
    %180 = vector.load %arg17[%c216, %c0_232] : memref<600x1xbf16, #tpu.memory_space<vmem>>, vector<24x1xbf16>
    tpu.vector_store %arg17[%c216, %c0_232], %179 {strides = array<i32>} : memref<600x1xbf16, #tpu.memory_space<vmem>>, vector<24x1xbf16>,
    %c0_233 = arith.constant 0 : index
    %c256_234 = arith.constant 256 : index
    %181 = vector.load %arg16[%c0_233, %c256_234] : memref<24x640xbf16, #tpu.memory_space<vmem>>, vector<24x1xbf16>
    %c240_235 = arith.constant 240 : index
    %c0_236 = arith.constant 0 : index
    %182 = vector.load %arg17[%c240_235, %c0_236] : memref<600x1xbf16, #tpu.memory_space<vmem>>, vector<24x1xbf16>
    tpu.vector_store %arg17[%c240_235, %c0_236], %181 {strides = array<i32>} : memref<600x1xbf16, #tpu.memory_space<vmem>>, vector<24x1xbf16>,
    %c0_237 = arith.constant 0 : index
    %c260_238 = arith.constant 260 : index
    %183 = vector.load %arg16[%c0_237, %c260_238] : memref<24x640xbf16, #tpu.memory_space<vmem>>, vector<24x1xbf16>
    %c264_239 = arith.constant 264 : index
    %c0_240 = arith.constant 0 : index
    %184 = vector.load %arg17[%c264_239, %c0_240] : memref<600x1xbf16, #tpu.memory_space<vmem>>, vector<24x1xbf16>
    tpu.vector_store %arg17[%c264_239, %c0_240], %183 {strides = array<i32>} : memref<600x1xbf16, #tpu.memory_space<vmem>>, vector<24x1xbf16>,
    %c0_241 = arith.constant 0 : index
    %c264_242 = arith.constant 264 : index
    %185 = vector.load %arg16[%c0_241, %c264_242] : memref<24x640xbf16, #tpu.memory_space<vmem>>, vector<24x1xbf16>
    %c288_243 = arith.constant 288 : index
    %c0_244 = arith.constant 0 : index
    %186 = vector.load %arg17[%c288_243, %c0_244] : memref<600x1xbf16, #tpu.memory_space<vmem>>, vector<24x1xbf16>
    tpu.vector_store %arg17[%c288_243, %c0_244], %185 {strides = array<i32>} : memref<600x1xbf16, #tpu.memory_space<vmem>>, vector<24x1xbf16>,
    %c0_245 = arith.constant 0 : index
    %c268 = arith.constant 268 : index
    %187 = vector.load %arg16[%c0_245, %c268] : memref<24x640xbf16, #tpu.memory_space<vmem>>, vector<24x1xbf16>
    %c312 = arith.constant 312 : index
    %c0_246 = arith.constant 0 : index
    %188 = vector.load %arg17[%c312, %c0_246] : memref<600x1xbf16, #tpu.memory_space<vmem>>, vector<24x1xbf16>
    tpu.vector_store %arg17[%c312, %c0_246], %187 {strides = array<i32>} : memref<600x1xbf16, #tpu.memory_space<vmem>>, vector<24x1xbf16>,
    %c0_247 = arith.constant 0 : index
    %c272_248 = arith.constant 272 : index
    %189 = vector.load %arg16[%c0_247, %c272_248] : memref<24x640xbf16, #tpu.memory_space<vmem>>, vector<24x1xbf16>
    %c336_249 = arith.constant 336 : index
    %c0_250 = arith.constant 0 : index
    %190 = vector.load %arg17[%c336_249, %c0_250] : memref<600x1xbf16, #tpu.memory_space<vmem>>, vector<24x1xbf16>
    tpu.vector_store %arg17[%c336_249, %c0_250], %189 {strides = array<i32>} : memref<600x1xbf16, #tpu.memory_space<vmem>>, vector<24x1xbf16>,
    %c0_251 = arith.constant 0 : index
    %c384_252 = arith.constant 384 : index
    %191 = vector.load %arg16[%c0_251, %c384_252] : memref<24x640xbf16, #tpu.memory_space<vmem>>, vector<24x1xbf16>
    %c360 = arith.constant 360 : index
    %c0_253 = arith.constant 0 : index
    %192 = vector.load %arg17[%c360, %c0_253] : memref<600x1xbf16, #tpu.memory_space<vmem>>, vector<24x1xbf16>
    tpu.vector_store %arg17[%c360, %c0_253], %191 {strides = array<i32>} : memref<600x1xbf16, #tpu.memory_space<vmem>>, vector<24x1xbf16>,
    %c0_254 = arith.constant 0 : index
    %c388 = arith.constant 388 : index
    %193 = vector.load %arg16[%c0_254, %c388] : memref<24x640xbf16, #tpu.memory_space<vmem>>, vector<24x1xbf16>
    %c384_255 = arith.constant 384 : index
    %c0_256 = arith.constant 0 : index
    %194 = vector.load %arg17[%c384_255, %c0_256] : memref<600x1xbf16, #tpu.memory_space<vmem>>, vector<24x1xbf16>
    tpu.vector_store %arg17[%c384_255, %c0_256], %193 {strides = array<i32>} : memref<600x1xbf16, #tpu.memory_space<vmem>>, vector<24x1xbf16>,
    %c0_257 = arith.constant 0 : index
    %c392 = arith.constant 392 : index
    %195 = vector.load %arg16[%c0_257, %c392] : memref<24x640xbf16, #tpu.memory_space<vmem>>, vector<24x1xbf16>
    %c408 = arith.constant 408 : index
    %c0_258 = arith.constant 0 : index
    %196 = vector.load %arg17[%c408, %c0_258] : memref<600x1xbf16, #tpu.memory_space<vmem>>, vector<24x1xbf16>
    tpu.vector_store %arg17[%c408, %c0_258], %195 {strides = array<i32>} : memref<600x1xbf16, #tpu.memory_space<vmem>>, vector<24x1xbf16>,
    %c0_259 = arith.constant 0 : index
    %c396 = arith.constant 396 : index
    %197 = vector.load %arg16[%c0_259, %c396] : memref<24x640xbf16, #tpu.memory_space<vmem>>, vector<24x1xbf16>
    %c432 = arith.constant 432 : index
    %c0_260 = arith.constant 0 : index
    %198 = vector.load %arg17[%c432, %c0_260] : memref<600x1xbf16, #tpu.memory_space<vmem>>, vector<24x1xbf16>
    tpu.vector_store %arg17[%c432, %c0_260], %197 {strides = array<i32>} : memref<600x1xbf16, #tpu.memory_space<vmem>>, vector<24x1xbf16>,
    %c0_261 = arith.constant 0 : index
    %c400 = arith.constant 400 : index
    %199 = vector.load %arg16[%c0_261, %c400] : memref<24x640xbf16, #tpu.memory_space<vmem>>, vector<24x1xbf16>
    %c456 = arith.constant 456 : index
    %c0_262 = arith.constant 0 : index
    %200 = vector.load %arg17[%c456, %c0_262] : memref<600x1xbf16, #tpu.memory_space<vmem>>, vector<24x1xbf16>
    tpu.vector_store %arg17[%c456, %c0_262], %199 {strides = array<i32>} : memref<600x1xbf16, #tpu.memory_space<vmem>>, vector<24x1xbf16>,
    %c0_263 = arith.constant 0 : index
    %c512 = arith.constant 512 : index
    %201 = vector.load %arg16[%c0_263, %c512] : memref<24x640xbf16, #tpu.memory_space<vmem>>, vector<24x1xbf16>
    %c480 = arith.constant 480 : index
    %c0_264 = arith.constant 0 : index
    %202 = vector.load %arg17[%c480, %c0_264] : memref<600x1xbf16, #tpu.memory_space<vmem>>, vector<24x1xbf16>
    tpu.vector_store %arg17[%c480, %c0_264], %201 {strides = array<i32>} : memref<600x1xbf16, #tpu.memory_space<vmem>>, vector<24x1xbf16>,
    %c0_265 = arith.constant 0 : index
    %c516 = arith.constant 516 : index
    %203 = vector.load %arg16[%c0_265, %c516] : memref<24x640xbf16, #tpu.memory_space<vmem>>, vector<24x1xbf16>
    %c504 = arith.constant 504 : index
    %c0_266 = arith.constant 0 : index
    %204 = vector.load %arg17[%c504, %c0_266] : memref<600x1xbf16, #tpu.memory_space<vmem>>, vector<24x1xbf16>
    tpu.vector_store %arg17[%c504, %c0_266], %203 {strides = array<i32>} : memref<600x1xbf16, #tpu.memory_space<vmem>>, vector<24x1xbf16>,
    %c0_267 = arith.constant 0 : index
    %c520 = arith.constant 520 : index
    %205 = vector.load %arg16[%c0_267, %c520] : memref<24x640xbf16, #tpu.memory_space<vmem>>, vector<24x1xbf16>
    %c528 = arith.constant 528 : index
    %c0_268 = arith.constant 0 : index
    %206 = vector.load %arg17[%c528, %c0_268] : memref<600x1xbf16, #tpu.memory_space<vmem>>, vector<24x1xbf16>
    tpu.vector_store %arg17[%c528, %c0_268], %205 {strides = array<i32>} : memref<600x1xbf16, #tpu.memory_space<vmem>>, vector<24x1xbf16>,
    %c0_269 = arith.constant 0 : index
    %c524 = arith.constant 524 : index
    %207 = vector.load %arg16[%c0_269, %c524] : memref<24x640xbf16, #tpu.memory_space<vmem>>, vector<24x1xbf16>
    %c552 = arith.constant 552 : index
    %c0_270 = arith.constant 0 : index
    %208 = vector.load %arg17[%c552, %c0_270] : memref<600x1xbf16, #tpu.memory_space<vmem>>, vector<24x1xbf16>
    tpu.vector_store %arg17[%c552, %c0_270], %207 {strides = array<i32>} : memref<600x1xbf16, #tpu.memory_space<vmem>>, vector<24x1xbf16>,
    %c0_271 = arith.constant 0 : index
    %c528_272 = arith.constant 528 : index
    %209 = vector.load %arg16[%c0_271, %c528_272] : memref<24x640xbf16, #tpu.memory_space<vmem>>, vector<24x1xbf16>
    %c576 = arith.constant 576 : index
    %c0_273 = arith.constant 0 : index
    %210 = vector.load %arg17[%c576, %c0_273] : memref<600x1xbf16, #tpu.memory_space<vmem>>, vector<24x1xbf16>
    tpu.vector_store %arg17[%c576, %c0_273], %209 {strides = array<i32>} : memref<600x1xbf16, #tpu.memory_space<vmem>>, vector<24x1xbf16>,
    %c0_274 = arith.constant 0 : index
    %c0_275 = arith.constant 0 : index
    %211 = vector.load %arg6[%c0_274, %c0_275] : memref<32x600xbf16, #tpu.memory_space<vmem>>, vector<32x600xbf16>
    %c0_276 = arith.constant 0 : index
    %c0_277 = arith.constant 0 : index
    %212 = vector.load %arg17[%c0_276, %c0_277] : memref<600x1xbf16, #tpu.memory_space<vmem>>, vector<600x1xbf16>
    %cst_278 = arith.constant dense<0.000000e+00> : vector<32x1xf32>
    %213 = tpu.matmul %211, %212, %cst_278 {dimension_numbers = #tpu.dot_dimension_numbers<[1], [0], [0], [1], [0, 0, 1, 1], [], []>} : vector<32x600xbf16>, vector<600x1xbf16>, vector<32x1xf32> -> vector<32x1xf32>
    %c0_279 = arith.constant 0 : index
    %c0_280 = arith.constant 0 : index
    %214 = vector.load %arg7[%c0_279, %c0_280] : memref<32x1xf32, #tpu.memory_space<vmem>>, vector<32x1xf32>
    %215 = arith.addf %213, %214 : vector<32x1xf32>
    %cst_281 = arith.constant 0.000000e+00 : f32
    %216 = vector.broadcast %cst_281 : f32 to vector<32x1xf32>
    %217 = arith.maximumf %215, %216 : vector<32x1xf32>
    %c0_282 = arith.constant 0 : index
    %c0_283 = arith.constant 0 : index
    %218 = vector.load %arg8[%c0_282, %c0_283] : memref<2x32xbf16, #tpu.memory_space<vmem>>, vector<2x32xbf16>
    %219 = arith.truncf %217 : vector<32x1xf32> to vector<32x1xbf16>
    %cst_284 = arith.constant dense<0.000000e+00> : vector<2x1xf32>
    %220 = tpu.matmul %218, %219, %cst_284 {dimension_numbers = #tpu.dot_dimension_numbers<[1], [0], [0], [1], [0, 0, 1, 1], [], []>} : vector<2x32xbf16>, vector<32x1xbf16>, vector<2x1xf32> -> vector<2x1xf32>
    %c0_285 = arith.constant 0 : index
    %c0_286 = arith.constant 0 : index
    %221 = vector.load %arg9[%c0_285, %c0_286] : memref<2x1xf32, #tpu.memory_space<vmem>>, vector<2x1xf32>
    %222 = arith.addf %220, %221 : vector<2x1xf32>
    %c0_287 = arith.constant 0 : index
    %c0_288 = arith.constant 0 : index
    %c0_289 = arith.constant 0 : index
    %223 = vector.load %arg10[%c0_287, %c0_288, %c0_289] : memref<1x2x1xf32, #tpu.memory_space<vmem>>, vector<1x2x1xf32>
    %224 = vector.shape_cast %223 : vector<1x2x1xf32> to vector<2x1xf32>
    %225 = vector.shape_cast %222 : vector<2x1xf32> to vector<1x2x1xf32>
    tpu.vector_store %arg10[%c0_287, %c0_288, %c0_289], %225 {strides = array<i32>} : memref<1x2x1xf32, #tpu.memory_space<vmem>>, vector<1x2x1xf32>,
    return
  }
  func.func @transform_0(%arg0: i32) -> (i32, i32, i32) {
    %c0_i32 = arith.constant 0 : i32
    %c0_i32_0 = arith.constant 0 : i32
    %c0_i32_1 = arith.constant 0 : i32
    return %arg0, %c0_i32, %c0_i32_0 : i32, i32, i32
  }
  func.func @transform_1(%arg0: i32) -> (i32, i32) {
    %c0_i32 = arith.constant 0 : i32
    %c0_i32_0 = arith.constant 0 : i32
    %c0_i32_1 = arith.constant 0 : i32
    return %c0_i32, %c0_i32_0 : i32, i32
  }
  func.func @transform_2(%arg0: i32) -> (i32, i32) {
    %c0_i32 = arith.constant 0 : i32
    %c0_i32_0 = arith.constant 0 : i32
    %c0_i32_1 = arith.constant 0 : i32
    return %c0_i32, %c0_i32_0 : i32, i32
  }
  func.func @transform_3(%arg0: i32) -> (i32, i32) {
    %c0_i32 = arith.constant 0 : i32
    %c0_i32_0 = arith.constant 0 : i32
    %c0_i32_1 = arith.constant 0 : i32
    return %c0_i32, %c0_i32_0 : i32, i32
  }
  func.func @transform_4(%arg0: i32) -> (i32, i32) {
    %c0_i32 = arith.constant 0 : i32
    %c0_i32_0 = arith.constant 0 : i32
    %c0_i32_1 = arith.constant 0 : i32
    return %c0_i32, %c0_i32_0 : i32, i32
  }
  func.func @transform_5(%arg0: i32) -> (i32, i32) {
    %c0_i32 = arith.constant 0 : i32
    %c0_i32_0 = arith.constant 0 : i32
    %c0_i32_1 = arith.constant 0 : i32
    return %c0_i32, %c0_i32_0 : i32, i32
  }
  func.func @transform_6(%arg0: i32) -> (i32, i32) {
    %c0_i32 = arith.constant 0 : i32
    %c0_i32_0 = arith.constant 0 : i32
    %c0_i32_1 = arith.constant 0 : i32
    return %c0_i32, %c0_i32_0 : i32, i32
  }
  func.func @transform_7(%arg0: i32) -> (i32, i32) {
    %c0_i32 = arith.constant 0 : i32
    %c0_i32_0 = arith.constant 0 : i32
    %c0_i32_1 = arith.constant 0 : i32
    return %c0_i32, %c0_i32_0 : i32, i32
  }
  func.func @transform_8(%arg0: i32) -> (i32, i32) {
    %c0_i32 = arith.constant 0 : i32
    %c0_i32_0 = arith.constant 0 : i32
    %c0_i32_1 = arith.constant 0 : i32
    return %c0_i32, %c0_i32_0 : i32, i32
  }
  func.func @transform_9(%arg0: i32) -> (i32, i32, i32) {
    %c0_i32 = arith.constant 0 : i32
    %c0_i32_0 = arith.constant 0 : i32
    %c0_i32_1 = arith.constant 0 : i32
    return %arg0, %c0_i32, %c0_i32_0 : i32, i32, i32
  }
}

</mosaic_0001>

<bundles_post_ra>
// kernel: lenet1_forward.1
= control target key start
LH: loop header
LB: loop body
LE: loop exit
PB: predicated region body
PF: predicated region fallthrough
CT: control target
= control target key end

     0   :  { %s6587_s30 = smov 0   ;;  %s9378_s0 = inlined_call_operand.vmem [shape: bf16[2,8,1536], index: 0, kind: input, shape index: {}]   ;;  %s9379_s1 = inlined_call_operand.vmem [shape: bf16[16,200], index: 1, kind: input, shape index: {}]   ;;  %s9380_s2 = inlined_call_operand.vmem [shape: f32[16,1], index: 2, kind: input, shape index: {}]   ;;  %s9381_s3 = inlined_call_operand.vmem [shape: bf16[24,400], index: 3, kind: input, shape index: {}]   ;;  %s9382_s4 = inlined_call_operand.vmem [shape: f32[24,1], index: 4, kind: input, shape index: {}]   ;;  %s9383_s5 = inlined_call_operand.vmem [shape: bf16[32,600], index: 5, kind: input, shape index: {}]   ;;  %s9384_s6 = inlined_call_operand.vmem [shape: f32[32,1], index: 6, kind: input, shape index: {}]   ;;  %s9385_s7 = inlined_call_operand.vmem [shape: bf16[2,32], index: 7, kind: input, shape index: {}]   ;;  %s9386_s8 = inlined_call_operand.vmem [shape: f32[2,1], index: 8, kind: input, shape index: {}]   ;;  %s9387_s9 = inlined_call_operand.vmem [shape: f32[2,2,1], index: 9, kind: output, shape index: {}]  }
   0x1 LB: > { %s5837_s10 = sadd.s32 4294967295, %s6507_s30   ;;  %p5841_p0 = scmp.ge.s32.totalorder %s6507_s30, 1  ;;  %s6507_s30 = sphi %s6587_s30, %s19_s30  }
   0x2   : > { %p287_p1 = scmp.lt.s32.totalorder %s6507_s30, 3 }
   0x4   : > { %p288_p2 = pnand %p5841_p0, %p287_p1 }
   0x5   : > { %p322_p3 = scmp.lt.s32.totalorder (!%p288_p2), %s5837_s10, 1  ;;  %s6509_s15 = smov (!%p288_p2), 126   ;;  %v6698_v4 = vld [vmem:[%s9379_s1 + $0x4] ss:$8 sps:$4 sm:$0xff] (!%p288_p2)   ;;  %vm2295_vm0 = vcmask (!%p288_p2), 588800   ;;  %vm372_vm1 = vcmask (!%p288_p2), 1043456  }
   0x6   : > { %291 = sbr.rel (%p288_p2) target bundleno = 2356 (0x934), region = 56  ;;  %s6510_s16 = smov (!%p288_p2), 127   ;;  %5977 = vmatprep.mubr.msk.bf16.mxu0 (!%p288_p2), %vm2295_vm0, %v6698_v4  ;;  %5979 = vmatprep.mubr.msk.bf16.mxu1 (!%p288_p2), %vm2295_vm0, %v6698_v4  ;;  %vm374_vm2 = vcmask (!%p288_p2), 1039360   ;;  %vm476_vm3 = vcmask (!%p288_p2), 1022976   ;;  %vm425_vm4 = vcmask (!%p288_p2), 1031168   ;;  %vm527_vm5 = vcmask (!%p288_p2), 1014784  }
   0x7   : > { %s6511_s17 = smov (!%p288_p2), 125   ;;  %s6512_s18 = smov (!%p288_p2), 124   ;;  %vm578_vm6 = vcmask (!%p288_p2), 785408   ;;  %vm629_vm7 = vcmask (!%p288_p2), 777216   ;;  %vm680_vm8 = vcmask (!%p288_p2), 769024   ;;  %vm731_vm9 = vcmask (!%p288_p2), 760832  }
   0x8   : > { %s6513_s19 = smov (!%p288_p2), 96   ;;  %s6514_s20 = smov (!%p288_p2), 95   ;;  %vm782_vm10 = vcmask (!%p288_p2), 752640   ;;  %vm9409_vm11 = vcmask (!%p288_p2), 523264   ;;  %vm9408_vm12 = vcmask (!%p288_p2), 515072   ;;  %vm9397_vm13 = vcmask (!%p288_p2), 506880  }
   0x9   : > { %s6515_s21 = smov (!%p288_p2), 94   ;;  %s6516_s22 = smov (!%p288_p2), 93   ;;  %vm9396_vm14 = vcmask (!%p288_p2), 498688   ;;  %vm9399_vm15 = vcmask (!%p288_p2), 490496  }
   0xa   : > { %s6517_s23 = smov (!%p288_p2), 92   ;;  %s6518_s24 = smov (!%p288_p2), 64  }
   0xb   : > { %s9403_s25 = smov (!%p288_p2), 63   ;;  %s9401_s26 = smov (!%p288_p2), 62  }
   0xc   : > { %s6521_s27 = smov (!%p288_p2), 61   ;;  %s9388_s28 = smov (!%p288_p2), 60  }
   0xd   : > { %s9491_s10 = smov (!%p322_p3, %s5837_s10), 1  ;;  %s6523_s29 = smov 32  }
   0xe   : > { %s6205_s11 = smul.u32 48, %s9491_s10  ;;  %s9394_s12 = smov 30  }
   0xf   : > { %s9390_s13 = smov 29  }
  0x10   : > { %s6601_s14 = scalar_lea.vmem %s9378_s0, %s6205_s11  ;;  %s9392_s11 = smov 31  }
  0x11   : > { %v6604_v0 = vld [vmem:[%s6601_s14] sm:$0xff]  ;;  %v6611_v1 = vld [vmem:[%s6601_s14 + $0x8] sm:$0xff]  ;;  %v6711_v5 = vld [vmem:[%s6601_s14 + $0x18] sm:$0xff] }
  0x12   : > { %406 = vrot.lane.b32.xlu1 %v6604_v0, %s6509_s15  ;;  %354 = vrot.lane.b32.xlu0 %v6604_v0, %s6510_s16  ;;  %v1323_v2 = vld [vmem:[%s6601_s14 + $0xc] sm:$0xff]  ;;  %v6687_v3 = vld [vmem:[%s6601_s14 + $0x4] sm:$0xff] }
  0x13   : > { %v6714_v6 = vld [vmem:[%s6601_s14 + $0x10] sm:$0xff] }
  0x16   : > { %408 = vrot.lane.b32.xlu1 %v6611_v1, %s6509_s15  ;;  %356 = vrot.lane.b32.xlu0 %v6611_v1, %s6510_s16 }
  0x1a   : > { %459 = vrot.lane.b32.xlu1 %v6611_v1, %s6511_s17  ;;  %457 = vrot.lane.b32.xlu0 %v6604_v0, %s6511_s17 }
  0x1e   : > { %510 = vrot.lane.b32.xlu1 %v6611_v1, %s6512_s18  ;;  %508 = vrot.lane.b32.xlu0 %v6604_v0, %s6512_s18 }
  0x22   : > { %561 = vrot.lane.b32.xlu1 %v6611_v1, %s6513_s19  ;;  %559 = vrot.lane.b32.xlu0 %v6604_v0, %s6513_s19 }
  0x26   : > { %612 = vrot.lane.b32.xlu1 %v6611_v1, %s6514_s20  ;;  %610 = vrot.lane.b32.xlu0 %v6604_v0, %s6514_s20 }
  0x2a   : > { %663 = vrot.lane.b32.xlu1 %v6611_v1, %s6515_s21  ;;  %661 = vrot.lane.b32.xlu0 %v6604_v0, %s6515_s21 }
  0x2e   : > { %714 = vrot.lane.b32.xlu1 %v6611_v1, %s6516_s22  ;;  %712 = vrot.lane.b32.xlu0 %v6604_v0, %s6516_s22 }
  0x32   : > { %765 = vrot.lane.b32.xlu1 %v6611_v1, %s6517_s23  ;;  %763 = vrot.lane.b32.xlu0 %v6604_v0, %s6517_s23 }
  0x36   : > { %816 = vrot.lane.b32.xlu1 %v6611_v1, %s6518_s24  ;;  %814 = vrot.lane.b32.xlu0 %v6604_v0, %s6518_s24 }
  0x3a   : > { %867 = vrot.lane.b32.xlu1 %v6611_v1, %s9403_s25  ;;  %865 = vrot.lane.b32.xlu0 %v6604_v0, %s9403_s25 }
  0x3e   : > { %918 = vrot.lane.b32.xlu1 %v6611_v1, %s9401_s26  ;;  %916 = vrot.lane.b32.xlu0 %v6604_v0, %s9401_s26 }
  0x42   : > { %969 = vrot.lane.b32.xlu1 %v6611_v1, %s6521_s27  ;;  %967 = vrot.lane.b32.xlu0 %v6604_v0, %s6521_s27 }
  0x46   : > { %1020 = vrot.lane.b32.xlu1 %v6611_v1, %s9388_s28  ;;  %1018 = vrot.lane.b32.xlu0 %v6604_v0, %s9388_s28  ;;  %s6527_s28 = smov 28  }
  0x4a   : > { %1071 = vrot.lane.b32.xlu1 %v6611_v1, %s6523_s29  ;;  %1069 = vrot.lane.b32.xlu0 %v6604_v0, %s6523_s29 }
  0x4e   : > { %1122 = vrot.lane.b32.xlu1 %v6611_v1, %s9392_s11  ;;  %1120 = vrot.lane.b32.xlu0 %v6604_v0, %s9392_s11  ;;  %s9410_s11 = smov 60  }
  0x52   : > { %1173 = vrot.lane.b32.xlu1 %v6611_v1, %s9394_s12  ;;  %1171 = vrot.lane.b32.xlu0 %v6604_v0, %s9394_s12 }
  0x56   : > { %1224 = vrot.lane.b32.xlu1 %v6611_v1, %s9390_s13  ;;  %1222 = vrot.lane.b32.xlu0 %v6604_v0, %s9390_s13  ;;  %s9411_s13 = smov 31  }
  0x5a   : > { %1275 = vrot.lane.b32.xlu1 %v6611_v1, %s6527_s28  ;;  %1273 = vrot.lane.b32.xlu0 %v6604_v0, %s6527_s28 }
  0x5e   : > { %1336 = vrot.lane.b32.xlu1 %v1323_v2, %s6510_s16  ;;  %1334 = vrot.lane.b32.xlu0 %v6687_v3, %s6510_s16 }
  0x62   : > { %1386 = vrot.lane.b32.xlu1 %v1323_v2, %s6509_s15  ;;  %1384 = vrot.lane.b32.xlu0 %v6687_v3, %s6509_s15 }
  0x66   : > { %1436 = vrot.lane.b32.xlu1 %v1323_v2, %s6511_s17  ;;  %1434 = vrot.lane.b32.xlu0 %v6687_v3, %s6511_s17 }
  0x6a   : > { %1486 = vrot.lane.b32.xlu1 %v1323_v2, %s6512_s18  ;;  %1484 = vrot.lane.b32.xlu0 %v6687_v3, %s6512_s18 }
  0x6e   : > { %360 = vrot.lane.b32.xlu1 %v6711_v5, %s6510_s16  ;;  %358 = vrot.lane.b32.xlu0 %v6714_v6, %s6510_s16 }
  0x72   : > { %461 = vrot.lane.b32.xlu1 %v6714_v6, %s6511_s17  ;;  %410 = vrot.lane.b32.xlu0 %v6714_v6, %s6509_s15 }
  0x76   : > { %463 = vrot.lane.b32.xlu1 %v6711_v5, %s6511_s17  ;;  %412 = vrot.lane.b32.xlu0 %v6711_v5, %s6509_s15 }
  0x7a   : > { %563 = vrot.lane.b32.xlu1 %v6714_v6, %s6513_s19  ;;  %512 = vrot.lane.b32.xlu0 %v6714_v6, %s6512_s18 }
  0x7e   : > { %565 = vrot.lane.b32.xlu1 %v6711_v5, %s6513_s19  ;;  %514 = vrot.lane.b32.xlu0 %v6711_v5, %s6512_s18 }
  0x82   : > { %665 = vrot.lane.b32.xlu1 %v6714_v6, %s6515_s21  ;;  %614 = vrot.lane.b32.xlu0 %v6714_v6, %s6514_s20 }
  0x84   : > { %v407_v7 = vpop.permute.xlu1 %406  ;;  %v355_v8 = vpop.permute.xlu0 %354 }
  0x85   : > { %v418_v9 = vrot.slane %v407_v7, 4  ;;  %v366_v12 = vrot.slane %v355_v8, 4 }
  0x86   : > { %667 = vrot.lane.b32.xlu1 %v6711_v5, %s6515_s21  ;;  %616 = vrot.lane.b32.xlu0 %v6711_v5, %s6514_s20 }
  0x88   : > { %v6744_v10 = vpop.permute.xlu1 %408  ;;  %v6746_v11 = vpop.permute.xlu0 %356 }
  0x89   : > { %v419_v13 = vrot.slane %v6744_v10, 4  ;;  %v367_v14 = vrot.slane %v6746_v11, 4 }
  0x8a   : > { %767 = vrot.lane.b32.xlu1 %v6714_v6, %s6517_s23  ;;  %716 = vrot.lane.b32.xlu0 %v6714_v6, %s6516_s22 }
  0x8b   : > { %v373_v15 = vsel %vm372_vm1, %v366_v12, %v367_v14  ;;  %v424_v19 = vsel %vm372_vm1, %v418_v9, %v419_v13 }
  0x8c   : > { %v6757_v16 = vpop.permute.xlu1 %459  ;;  %v458_v17 = vpop.permute.xlu0 %457  ;;  %v375_v18 = vsel %vm374_vm2, %v355_v8, %v373_v15  ;;  %v426_v28 = vsel %vm425_vm4, %v407_v7, %v424_v19 }
  0x8d   : > { %v470_v20 = vrot.slane %v6757_v16, 4  ;;  %v469_v21 = vrot.slane %v458_v17, 4  ;;  %v5847_v22 = vcombine.high %v6604_v0, %v375_v18  ;;  %v5846_v23 = vcombine.low %v6604_v0, %v375_v18 }
  0x8e   : > { %769 = vrot.lane.b32.xlu1 %v6711_v5, %s6517_s23  ;;  %718 = vrot.lane.b32.xlu0 %v6711_v5, %s6516_s22 }
  0x8f   : > { %v475_v24 = vsel %vm372_vm1, %v469_v21, %v470_v20  ;;  %2330 = vmatprep.subr.bf16.mxu0 %v5847_v22 }
  0x90   : > { %v477_v25 = vsel %vm476_vm3, %v458_v17, %v475_v24  ;;  %v6774_v26 = vpop.permute.xlu1 %510  ;;  %v509_v27 = vpop.permute.xlu0 %508  ;;  %2331 = vmatpush1.bf16.msra.mxu0 %v5846_v23 }
  0x91   : > { %v521_v29 = vrot.slane %v6774_v26, 4  ;;  %v520_v30 = vrot.slane %v509_v27, 4  ;;  %v5857_v31 = vcombine.high %v426_v28, %v477_v25  ;;  %v5856_v32 = vcombine.low %v426_v28, %v477_v25 }
  0x92   : > { %869 = vrot.lane.b32.xlu1 %v6714_v6, %s9403_s25  ;;  %818 = vrot.lane.b32.xlu0 %v6714_v6, %s6518_s24 }
  0x93   : > { %2332 = vmatprep.subr.bf16.mxu0 %v5857_v31  ;;  %v526_v35 = vsel %vm372_vm1, %v520_v30, %v521_v29 }
  0x94   : > { %v6782_v33 = vpop.permute.xlu1 %561  ;;  %v560_v34 = vpop.permute.xlu0 %559  ;;  %2333 = vmatpush1.bf16.msra.mxu0 %v5856_v32  ;;  %v528_v39 = vsel %vm527_vm5, %v509_v27, %v526_v35 }
  0x95   : > { %v572_v36 = vrot.slane %v6782_v33, 4  ;;  %v571_v37 = vrot.slane %v560_v34, 4 }
  0x96   : > { %871 = vrot.lane.b32.xlu1 %v6711_v5, %s9403_s25  ;;  %820 = vrot.lane.b32.xlu0 %v6711_v5, %s6518_s24 }
  0x97   : > { %v577_v38 = vsel %vm372_vm1, %v571_v37, %v572_v36 }
  0x98   : > { %v579_v40 = vsel %vm578_vm6, %v560_v34, %v577_v38  ;;  %v6797_v41 = vpop.permute.xlu1 %612  ;;  %v611_v42 = vpop.permute.xlu0 %610 }
  0x99   : > { %v623_v43 = vrot.slane %v6797_v41, 4  ;;  %v622_v44 = vrot.slane %v611_v42, 4  ;;  %v5867_v45 = vcombine.high %v528_v39, %v579_v40  ;;  %v5866_v46 = vcombine.low %v528_v39, %v579_v40 }
  0x9a   : > { %971 = vrot.lane.b32.xlu1 %v6714_v6, %s6521_s27  ;;  %920 = vrot.lane.b32.xlu0 %v6714_v6, %s9401_s26 }
  0x9b   : > { %2334 = vmatprep.subr.bf16.mxu0 %v5867_v45  ;;  %v628_v49 = vsel %vm372_vm1, %v622_v44, %v623_v43 }
  0x9c   : > { %v6804_v47 = vpop.permute.xlu1 %663  ;;  %v662_v48 = vpop.permute.xlu0 %661  ;;  %2335 = vmatpush1.bf16.msra.mxu0 %v5866_v46  ;;  %v630_v53 = vsel %vm629_vm7, %v611_v42, %v628_v49  ;;  %v1325_v49 = vld [vmem:[%s6601_s14 + $0x1c] sm:$0xff] }
  0x9d   : > { %v674_v50 = vrot.slane %v6804_v47, 4  ;;  %v673_v51 = vrot.slane %v662_v48, 4 }
  0x9e   : > { %973 = vrot.lane.b32.xlu1 %v6711_v5, %s6521_s27  ;;  %922 = vrot.lane.b32.xlu0 %v6711_v5, %s9401_s26 }
  0x9f   : > { %v679_v52 = vsel %vm372_vm1, %v673_v51, %v674_v50  ;;  %v6885_v51 = vld [vmem:[%s6601_s14 + $0x14] sm:$0xff] }
  0xa0   : > { %v681_v54 = vsel %vm680_vm8, %v662_v48, %v679_v52  ;;  %v6819_v55 = vpop.permute.xlu1 %714  ;;  %v713_v56 = vpop.permute.xlu0 %712 }
  0xa1   : > { %v725_v57 = vrot.slane %v6819_v55, 4  ;;  %v724_v58 = vrot.slane %v713_v56, 4  ;;  %v5877_v59 = vcombine.high %v630_v53, %v681_v54  ;;  %v5876_v60 = vcombine.low %v630_v53, %v681_v54 }
  0xa2   : > { %1073 = vrot.lane.b32.xlu1 %v6714_v6, %s6523_s29  ;;  %1022 = vrot.lane.b32.xlu0 %v6714_v6, %s9410_s11 }
  0xa3   : > { %2336 = vmatprep.subr.bf16.mxu0 %v5877_v59  ;;  %v730_v63 = vsel %vm372_vm1, %v724_v58, %v725_v57 }
  0xa4   : > { %v6826_v61 = vpop.permute.xlu1 %765  ;;  %v764_v62 = vpop.permute.xlu0 %763  ;;  %2337 = vmatpush1.bf16.msra.mxu0 %v5876_v60  ;;  %v732_v8 = vsel %vm731_vm9, %v713_v56, %v730_v63 }
  0xa5   : > { %v776_v0 = vrot.slane %v6826_v61, 4  ;;  %v775_v2 = vrot.slane %v764_v62, 4 }
  0xa6   : > { %1075 = vrot.lane.b32.xlu1 %v6711_v5, %s6523_s29  ;;  %1024 = vrot.lane.b32.xlu0 %v6711_v5, %s9410_s11 }
  0xa7   : > { %v781_v7 = vsel %vm372_vm1, %v775_v2, %v776_v0 }
  0xa8   : > { %v783_v9 = vsel %vm782_vm10, %v764_v62, %v781_v7  ;;  %v6841_v12 = vpop.permute.xlu1 %816  ;;  %v815_v15 = vpop.permute.xlu0 %814 }
  0xa9   : > { %v827_v17 = vrot.slane %v6841_v12, 4  ;;  %v826_v18 = vrot.slane %v815_v15, 4  ;;  %v5887_v19 = vcombine.high %v732_v8, %v783_v9  ;;  %v5886_v21 = vcombine.low %v732_v8, %v783_v9 }
  0xaa   : > { %1175 = vrot.lane.b32.xlu1 %v6714_v6, %s9394_s12  ;;  %1124 = vrot.lane.b32.xlu0 %v6714_v6, %s9411_s13 }
  0xab   : > { %2338 = vmatprep.subr.bf16.mxu0 %v5887_v19  ;;  %v832_v24 = vsel %vm372_vm1, %v826_v18, %v827_v17 }
  0xac   : > { %v6848_v22 = vpop.permute.xlu1 %867  ;;  %v866_v23 = vpop.permute.xlu0 %865  ;;  %2339 = vmatpush1.bf16.msra.mxu0 %v5886_v21  ;;  %v834_v30 = vsel %vm9409_vm11, %v815_v15, %v832_v24 }
  0xad   : > { %v878_v25 = vrot.slane %v6848_v22, 4  ;;  %v877_v27 = vrot.slane %v866_v23, 4 }
  0xae   : > { %1177 = vrot.lane.b32.xlu1 %v6711_v5, %s9394_s12  ;;  %1126 = vrot.lane.b32.xlu0 %v6711_v5, %s9411_s13  ;;  %s9412_s12 = smov 29  }
  0xaf   : > { %v883_v28 = vsel %vm372_vm1, %v877_v27, %v878_v25 }
  0xb0   : > { %v885_v31 = vsel %vm9408_vm12, %v866_v23, %v883_v28  ;;  %v6863_v32 = vpop.permute.xlu1 %918  ;;  %v917_v34 = vpop.permute.xlu0 %916 }
  0xb1   : > { %v929_v35 = vrot.slane %v6863_v32, 4  ;;  %v928_v37 = vrot.slane %v917_v34, 4  ;;  %v5897_v38 = vcombine.high %v834_v30, %v885_v31  ;;  %v5896_v39 = vcombine.low %v834_v30, %v885_v31 }
  0xb2   : > { %1277 = vrot.lane.b32.xlu1 %v6714_v6, %s6527_s28  ;;  %1226 = vrot.lane.b32.xlu0 %v6714_v6, %s9412_s12 }
  0xb3   : > { %2340 = vmatprep.subr.bf16.mxu0 %v5897_v38  ;;  %v934_v44 = vsel %vm372_vm1, %v928_v37, %v929_v35 }
  0xb4   : > { %v6870_v40 = vpop.permute.xlu1 %969  ;;  %v968_v42 = vpop.permute.xlu0 %967  ;;  %2341 = vmatpush1.bf16.msra.mxu0 %v5896_v39  ;;  %v936_v52 = vsel %vm9397_vm13, %v917_v34, %v934_v44  ;;  %vm1139_vm13 = vcmask 252928  }
  0xb5   : > { %v980_v45 = vrot.slane %v6870_v40, 4  ;;  %v979_v46 = vrot.slane %v968_v42, 4 }
  0xb6   : > { %1279 = vrot.lane.b32.xlu1 %v6711_v5, %s6527_s28  ;;  %1228 = vrot.lane.b32.xlu0 %v6711_v5, %s9412_s12 }
  0xb7   : > { %v985_v48 = vsel %vm372_vm1, %v979_v46, %v980_v45 }
  0xb8   : > { %v987_v53 = vsel %vm9396_vm14, %v968_v42, %v985_v48  ;;  %v6889_v54 = vpop.permute.xlu1 %1020  ;;  %v1019_v56 = vpop.permute.xlu0 %1018  ;;  %vm9398_vm14 = vcmask 261120   ;;  %v6928_v42 = vld [vmem:[%s6601_s14 + $0x20] sm:$0xff] }
  0xb9   : > { %v1031_v58 = vrot.slane %v6889_v54, 4  ;;  %v1030_v59 = vrot.slane %v1019_v56, 4  ;;  %v5907_v60 = vcombine.high %v936_v52, %v987_v53  ;;  %v5906_v62 = vcombine.low %v936_v52, %v987_v53 }
  0xba   : > { %1340 = vrot.lane.b32.xlu1 %v1325_v49, %s6510_s16  ;;  %1338 = vrot.lane.b32.xlu0 %v6885_v51, %s6510_s16 }
  0xbb   : > { %2342 = vmatprep.subr.bf16.mxu0 %v5907_v60  ;;  %v1036_v2 = vsel %vm372_vm1, %v1030_v59, %v1031_v58 }
  0xbc   : > { %v6895_v5 = vpop.permute.xlu1 %1071  ;;  %v1070_v63 = vpop.permute.xlu0 %1069  ;;  %2343 = vmatpush1.bf16.msra.mxu0 %v5906_v62  ;;  %v1038_v15 = vsel %vm9399_vm15, %v1019_v56, %v1036_v2  ;;  %vm1241_vm15 = vcmask 236544  }
  0xbd   : > { %v1082_v7 = vrot.slane %v6895_v5, 4  ;;  %v1081_v8 = vrot.slane %v1070_v63, 4 }
  0xbe   : > { %1438 = vrot.lane.b32.xlu1 %v6885_v51, %s6511_s17  ;;  %1388 = vrot.lane.b32.xlu0 %v6885_v51, %s6509_s15 }
  0xbf   : > { %v1087_v9 = vsel %vm372_vm1, %v1081_v8, %v1082_v7 }
  0xc0   : > { %v1089_v18 = vsel %vm9398_vm14, %v1070_v63, %v1087_v9  ;;  %v6910_v19 = vpop.permute.xlu1 %1122  ;;  %v1121_v21 = vpop.permute.xlu0 %1120  ;;  %vm9400_vm14 = vcmask 244736  }
  0xc1   : > { %v1133_v23 = vrot.slane %v6910_v19, 4  ;;  %v1132_v24 = vrot.slane %v1121_v21, 4  ;;  %v5917_v27 = vcombine.high %v1038_v15, %v1089_v18  ;;  %v5916_v28 = vcombine.low %v1038_v15, %v1089_v18 }
  0xc2   : > { %1440 = vrot.lane.b32.xlu1 %v1325_v49, %s6511_s17  ;;  %1390 = vrot.lane.b32.xlu0 %v1325_v49, %s6509_s15 }
  0xc3   : > { %2344 = vmatprep.subr.bf16.mxu0 %v5917_v27  ;;  %v1138_v34 = vsel %vm372_vm1, %v1132_v24, %v1133_v23 }
  0xc4   : > { %v6915_v30 = vpop.permute.xlu1 %1173  ;;  %v1172_v31 = vpop.permute.xlu0 %1171  ;;  %2345 = vmatpush1.bf16.msra.mxu0 %v5916_v28  ;;  %v1140_v44 = vsel %vm1139_vm13, %v1121_v21, %v1138_v34 }
  0xc5   : > { %v1184_v37 = vrot.slane %v6915_v30, 4  ;;  %v1183_v38 = vrot.slane %v1172_v31, 4 }
  0xc6   : > { %1490 = vrot.lane.b32.xlu1 %v1325_v49, %s6512_s18  ;;  %1488 = vrot.lane.b32.xlu0 %v6885_v51, %s6512_s18 }
  0xc7   : > { %v1189_v39 = vsel %vm372_vm1, %v1183_v38, %v1184_v37 }
  0xc8   : > { %v1191_v46 = vsel %vm9400_vm14, %v1172_v31, %v1189_v39  ;;  %v6932_v48 = vpop.permute.xlu1 %1224  ;;  %v1223_v52 = vpop.permute.xlu0 %1222  ;;  %vm1292_vm14 = vcmask 228352  }
  0xc9   : > { %v1235_v53 = vrot.slane %v6932_v48, 4  ;;  %v1234_v56 = vrot.slane %v1223_v52, 4  ;;  %v5927_v49 = vcombine.high %v1140_v44, %v1191_v46  ;;  %v5926_v59 = vcombine.low %v1140_v44, %v1191_v46 }
  0xca   : > { %414 = vrot.lane.b32.xlu1 %v6928_v42, %s6509_s15  ;;  %362 = vrot.lane.b32.xlu0 %v6928_v42, %s6510_s16 }
  0xcb   : > { %2346 = vmatprep.subr.bf16.mxu0 %v5927_v49  ;;  %v1240_v63 = vsel %vm372_vm1, %v1234_v56, %v1235_v53 }
  0xcc   : > { %v6939_v60 = vpop.permute.xlu1 %1275  ;;  %v1274_v62 = vpop.permute.xlu0 %1273  ;;  %2347 = vmatpush1.bf16.msra.mxu0 %v5926_v59  ;;  %v1242_v15 = vsel %vm1241_vm15, %v1223_v52, %v1240_v63 }
  0xcd   : > { %v1286_v2 = vrot.slane %v6939_v60, 4  ;;  %v1285_v8 = vrot.slane %v1274_v62, 4 }
  0xce   : > { %516 = vrot.lane.b32.xlu1 %v6928_v42, %s6512_s18  ;;  %465 = vrot.lane.b32.xlu0 %v6928_v42, %s6511_s17 }
  0xcf   : > { %v1291_v9 = vsel %vm372_vm1, %v1285_v8, %v1286_v2 }
  0xd0   : > { %v1293_v18 = vsel %vm1292_vm14, %v1274_v62, %v1291_v9  ;;  %v6954_v21 = vpop.permute.xlu1 %1336  ;;  %v1335_v24 = vpop.permute.xlu0 %1334 }
  0xd1   : > { %v1347_v27 = vrot.slane %v6954_v21, 4  ;;  %v1346_v28 = vrot.slane %v1335_v24, 4  ;;  %v5937_v31 = vcombine.high %v1242_v15, %v1293_v18  ;;  %v5936_v34 = vcombine.low %v1242_v15, %v1293_v18 }
  0xd2   : > { %618 = vrot.lane.b32.xlu1 %v6928_v42, %s6514_s20  ;;  %567 = vrot.lane.b32.xlu0 %v6928_v42, %s6513_s19 }
  0xd3   : > { %v1352_v38 = vsel %vm372_vm1, %v1346_v28, %v1347_v27  ;;  %2348 = vmatprep.subr.bf16.mxu0 %v5937_v31 }
  0xd4   : > { %v1353_v39 = vsel %vm374_vm2, %v1335_v24, %v1352_v38  ;;  %v6965_v44 = vpop.permute.xlu1 %1386  ;;  %v1385_v46 = vpop.permute.xlu0 %1384  ;;  %2349 = vmatpush1.bf16.msra.mxu0 %v5936_v34 }
  0xd5   : > { %v9407_v52 = vrot.slane %v6965_v44, 4  ;;  %v1396_v56 = vrot.slane %v1385_v46, 4  ;;  %v5947_v49 = vcombine.high %v6687_v3, %v1353_v39  ;;  %v5946_v59 = vcombine.low %v6687_v3, %v1353_v39 }
  0xd6   : > { %720 = vrot.lane.b32.xlu1 %v6928_v42, %s6516_s22  ;;  %669 = vrot.lane.b32.xlu0 %v6928_v42, %s6515_s21 }
  0xd7   : > { %2350 = vmatprep.subr.bf16.mxu0 %v5947_v49  ;;  %v1402_v8 = vsel %vm372_vm1, %v1396_v56, %v9407_v52  ;;  %v347_v49 = vld [vmem:[%s6601_s14 + $0x28] sm:$0xf] }
  0xd8   : > { %v6974_v62 = vpop.permute.xlu1 %1436  ;;  %v1435_v63 = vpop.permute.xlu0 %1434  ;;  %2351 = vmatpush1.bf16.msra.mxu0 %v5946_v59  ;;  %v1403_v18 = vsel %vm425_vm4, %v1385_v46, %v1402_v8 }
  0xd9   : > { %v9406_v9 = vrot.slane %v6974_v62, 4  ;;  %v1446_v15 = vrot.slane %v1435_v63, 4 }
  0xda   : > { %822 = vrot.lane.b32.xlu1 %v6928_v42, %s6518_s24  ;;  %771 = vrot.lane.b32.xlu0 %v6928_v42, %s6517_s23 }
  0xdb   : > { %v1452_v3 = vsel %vm372_vm1, %v1446_v15, %v9406_v9 }
  0xdc   : > { %v1453_v24 = vsel %vm476_vm3, %v1435_v63, %v1452_v3  ;;  %v6989_v28 = vpop.permute.xlu1 %1486  ;;  %v1485_v31 = vpop.permute.xlu0 %1484 }
  0xdd   : > { %v9405_v34 = vrot.slane %v6989_v28, 4  ;;  %v1496_v38 = vrot.slane %v1485_v31, 4  ;;  %v5957_v39 = vcombine.high %v1403_v18, %v1453_v24  ;;  %v5956_v56 = vcombine.low %v1403_v18, %v1453_v24 }
  0xde   : > { %924 = vrot.lane.b32.xlu1 %v6928_v42, %s9401_s26  ;;  %873 = vrot.lane.b32.xlu0 %v6928_v42, %s9403_s25  ;;  %s9413_s25 = smov 30  }
  0xdf   : > { %v1502_v46 = vsel %vm372_vm1, %v1496_v38, %v9405_v34  ;;  %2352 = vmatprep.subr.bf16.mxu0 %v5957_v39 }
  0xe0   : > { %v1503_v59 = vsel %vm527_vm5, %v1485_v31, %v1502_v46  ;;  %v7001_v63 = vpop.permute.xlu1 %360  ;;  %v359_v8 = vpop.permute.xlu0 %358  ;;  %2353 = vmatpush1.bf16.msra.mxu0 %v5956_v56  ;;  %v7018_v56 = vld [vmem:[%s9379_s1] ss:$8 sps:$4 sm:$0xff]  }
  0xe1   : > { %v5967_v15 = vcombine.high %v1503_v59, %v1503_v59  ;;  %v9404_v3 = vrot.slane %v7001_v63, 4  ;;  %v368_v18 = vrot.slane %v359_v8, 4  ;;  %v5966_v24 = vcombine.low %v1503_v59, %v1503_v59 }
  0xe2   : > { %364 = vrot.lane.b32.xlu1 %v347_v49, %s6510_s16  ;;  %975 = vrot.lane.b32.xlu0 %v6928_v42, %s6521_s27 }
  0xe3   : > { %v378_v38 = vsel %vm372_vm1, %v368_v18, %v9404_v3  ;;  %5976 = vmatprep.subr.msk.bf16.mxu0 %vm372_vm1, %v5967_v15  ;;  %v2301_v31 = vsel %vm372_vm1, %v5966_v24, 0  ;;  %v376_v39 = vsel %vm372_vm1, %v367_v14, %v368_v18 }
  0xe4   : > { %v379_v46 = vsel %vm374_vm2, %v359_v8, %v378_v38  ;;  %v462_v49 = vpop.permute.xlu1 %461  ;;  %v411_v59 = vpop.permute.xlu0 %410  ;;  %2355 = vmatpush1.bf16.msra.mxu0 %v2301_v31  ;;  %v377_v15 = vsel %vm374_vm2, %v6746_v11, %v376_v39  ;;  %v450_v11 = vld [vmem:[%s6601_s14 + $0x28] sm:$0xf] }
  0xe5   : > { %v5850_v24 = vcombine.low %v6714_v6, %v379_v46  ;;  %v471_v3 = vrot.slane %v462_v49, 4  ;;  %v420_v34 = vrot.slane %v411_v59, 4  ;;  %v5849_v14 = vcombine.high %v6611_v1, %v377_v15  ;;  %v399_v38 = vld [vmem:[%s6601_s14 + $0x28] sm:$0xf] }
  0xe6   : > { %1077 = vrot.lane.b32.xlu1 %v6928_v42, %s6523_s29  ;;  %1026 = vrot.lane.b32.xlu0 %v6928_v42, %s9410_s11  ;;  %v5851_v8 = vcombine.high %v6714_v6, %v379_v46  ;;  %v5848_v18 = vcombine.low %v6611_v1, %v377_v15 }
  0xe7   : > { %2373 = vmatprep.subr.bf16.mxu1 %v5849_v14  ;;  %2363 = vmatmul.mubr.bf16.vlgmr.msra.gmra.mrb[0].mxu0 %v7018_v56  ;;  %v427_v31 = vsel %vm372_vm1, %v419_v13, %v420_v34  ;;  %v478_v39 = vsel %vm372_vm1, %v470_v20, %v471_v3  ;;  %v6528_v20 = vmov 0  }
  0xe8   : > { %2416 = vmatprep.subr.bf16.mxu0 %v5851_v8  ;;  %v7040_v9 = vpop.permute.xlu1 %463  ;;  %v7042_v52 = vpop.permute.xlu0 %412  ;;  %2374 = vmatpush1.bf16.msra.mxu1 %v5848_v18  ;;  %v428_v1 = vsel %vm425_vm4, %v6744_v10, %v427_v31  ;;  %v479_v6 = vsel %vm476_vm3, %v6757_v16, %v478_v39  ;;  %v501_v39 = vld [vmem:[%s6601_s14 + $0x28] sm:$0xf] }
  0xe9   : > { %v472_v46 = vrot.slane %v7040_v9, 4  ;;  %v421_v13 = vrot.slane %v7042_v52, 4  ;;  %2417 = vmatpush1.bf16.msra.mxu0 %v5850_v24  ;;  %v5859_v15 = vcombine.high %v428_v1, %v479_v6  ;;  %v5858_v14 = vcombine.low %v428_v1, %v479_v6  ;;  %5981 = vmatprep.mubr.msk.bf16.mxu0 %vm2295_vm0, %v6698_v4 }
  0xea   : > { %467 = vrot.lane.b32.xlu1 %v450_v11, %s6511_s17  ;;  %416 = vrot.lane.b32.xlu0 %v399_v38, %s6509_s15 }
  0xeb   : > { %2375 = vmatprep.subr.bf16.mxu1 %v5859_v15  ;;  %v429_v10 = vsel %vm372_vm1, %v420_v34, %v421_v13  ;;  %v480_v16 = vsel %vm372_vm1, %v471_v3, %v472_v46  ;;  %6243 = vset.pattern.permute.xlu1 %v6528_v20  ;;  %v552_v3 = vld [vmem:[%s6601_s14 + $0x28] sm:$0xf] }
  0xec   : > { %v564_v24 = vpop.permute.xlu1 %563  ;;  %v513_v8 = vpop.permute.xlu0 %512  ;;  %2376 = vmatpush1.bf16.msra.mxu1 %v5858_v14  ;;  %v430_v4 = vsel %vm425_vm4, %v411_v59, %v429_v10  ;;  %v481_v18 = vsel %vm476_vm3, %v462_v49, %v480_v16  ;;  %6242 = vset.pattern.permute.xlu0 %v6528_v20 }
  0xed   : > { %v573_v11 = vrot.slane %v564_v24, 4  ;;  %v522_v38 = vrot.slane %v513_v8, 4  ;;  %v5860_v31 = vcombine.low %v430_v4, %v481_v18  ;;  %v5861_v34 = vcombine.high %v430_v4, %v481_v18 }
  0xee   : > { %1179 = vrot.lane.b32.xlu1 %v6928_v42, %s9413_s25  ;;  %1128 = vrot.lane.b32.xlu0 %v6928_v42, %s9411_s13 }
  0xef   : > { %2418 = vmatprep.subr.bf16.mxu0 %v5861_v34  ;;  %v529_v59 = vsel %vm372_vm1, %v521_v29, %v522_v38  ;;  %v580_v49 = vsel %vm372_vm1, %v572_v36, %v573_v11 }
  0xf0   : > { %v7074_v1 = vpop.permute.xlu1 %565  ;;  %v7076_v6 = vpop.permute.xlu0 %514  ;;  %2419 = vmatpush1.bf16.msra.mxu0 %v5860_v31  ;;  %v530_v15 = vsel %vm527_vm5, %v6774_v26, %v529_v59  ;;  %v581_v14 = vsel %vm578_vm6, %v6782_v33, %v580_v49 }
  0xf1   : > { %v574_v10 = vrot.slane %v7074_v1, 4  ;;  %v523_v16 = vrot.slane %v7076_v6, 4  ;;  %v5869_v29 = vcombine.high %v530_v15, %v581_v14  ;;  %v5868_v20 = vcombine.low %v530_v15, %v581_v14 }
  0xf2   : > { %569 = vrot.lane.b32.xlu1 %v552_v3, %s6513_s19  ;;  %518 = vrot.lane.b32.xlu0 %v501_v39, %s6512_s18 }
  0xf3   : > { %2377 = vmatprep.subr.bf16.mxu1 %v5869_v29  ;;  %v531_v26 = vsel %vm372_vm1, %v522_v38, %v523_v16  ;;  %v582_v33 = vsel %vm372_vm1, %v573_v11, %v574_v10  ;;  %v654_v38 = vld [vmem:[%s6601_s14 + $0x28] sm:$0xf] }
  0xf4   : > { %v666_v36 = vpop.permute.xlu1 %665  ;;  %v615_v4 = vpop.permute.xlu0 %614  ;;  %2378 = vmatpush1.bf16.msra.mxu1 %v5868_v20  ;;  %v532_v18 = vsel %vm527_vm5, %v513_v8, %v531_v26  ;;  %v583_v31 = vsel %vm578_vm6, %v564_v24, %v582_v33  ;;  %v603_v11 = vld [vmem:[%s6601_s14 + $0x28] sm:$0xf] }
  0xf5   : > { %v675_v34 = vrot.slane %v666_v36, 4  ;;  %v624_v3 = vrot.slane %v615_v4, 4  ;;  %v5870_v39 = vcombine.low %v532_v18, %v583_v31  ;;  %v5871_v59 = vcombine.high %v532_v18, %v583_v31  ;;  %v1326_v33 = vld [vmem:[%s6601_s14 + $0x24] sm:$0xff] }
  0xf6   : > { %1281 = vrot.lane.b32.xlu1 %v6928_v42, %s6527_s28  ;;  %1230 = vrot.lane.b32.xlu0 %v6928_v42, %s9412_s12 }
  0xf7   : > { %2420 = vmatprep.subr.bf16.mxu0 %v5871_v59  ;;  %v631_v8 = vsel %vm372_vm1, %v623_v43, %v624_v3  ;;  %v682_v24 = vsel %vm372_vm1, %v674_v50, %v675_v34  ;;  %v705_v50 = vld [vmem:[%s6601_s14 + $0x28] sm:$0xf] }
  0xf8   : > { %v7106_v49 = vpop.permute.xlu1 %667  ;;  %v7108_v15 = vpop.permute.xlu0 %616  ;;  %2421 = vmatpush1.bf16.msra.mxu0 %v5870_v39  ;;  %v632_v42 = vsel %vm629_vm7, %v6797_v41, %v631_v8  ;;  %v683_v14 = vsel %vm680_vm8, %v6804_v47, %v682_v24 }
  0xf9   : > { %v676_v29 = vrot.slane %v7106_v49, 4  ;;  %v625_v20 = vrot.slane %v7108_v15, 4  ;;  %v5879_v43 = vcombine.high %v632_v42, %v683_v14  ;;  %v5878_v26 = vcombine.low %v632_v42, %v683_v14 }
  0xfa   : > { %671 = vrot.lane.b32.xlu1 %v654_v38, %s6515_s21  ;;  %620 = vrot.lane.b32.xlu0 %v603_v11, %s6514_s20  ;;  %s9414_s20 = smov 63   ;;  %s9415_s21 = smov 62  }
  0xfb   : > { %2379 = vmatprep.subr.bf16.mxu1 %v5879_v43  ;;  %v633_v41 = vsel %vm372_vm1, %v624_v3, %v625_v20  ;;  %v684_v47 = vsel %vm372_vm1, %v675_v34, %v676_v29  ;;  %v756_v3 = vld [vmem:[%s6601_s14 + $0x28] sm:$0xf] }
  0xfc   : > { %v768_v18 = vpop.permute.xlu1 %767  ;;  %v717_v31 = vpop.permute.xlu0 %716  ;;  %2380 = vmatpush1.bf16.msra.mxu1 %v5878_v26  ;;  %v634_v39 = vsel %vm629_vm7, %v615_v4, %v633_v41  ;;  %v685_v59 = vsel %vm680_vm8, %v666_v36, %v684_v47 }
  0xfd   : > { %v777_v38 = vrot.slane %v768_v18, 4  ;;  %v726_v11 = vrot.slane %v717_v31, 4  ;;  %v5880_v8 = vcombine.low %v634_v39, %v685_v59  ;;  %v5881_v24 = vcombine.high %v634_v39, %v685_v59 }
  0xfe   : > { %722 = vrot.lane.b32.xlu1 %v705_v50, %s6516_s22  ;;  %1342 = vrot.lane.b32.xlu0 %v1326_v33, %s6510_s16 }
  0xff   : > { %2422 = vmatprep.subr.bf16.mxu0 %v5881_v24  ;;  %v733_v34 = vsel %vm372_vm1, %v725_v57, %v726_v11  ;;  %v784_v4 = vsel %vm372_vm1, %v776_v0, %v777_v38  ;;  %v807_v0 = vld [vmem:[%s6601_s14 + $0x28] sm:$0xf] }
 0x100   : > { %v7137_v36 = vpop.permute.xlu1 %769  ;;  %v7139_v42 = vpop.permute.xlu0 %718  ;;  %2423 = vmatpush1.bf16.msra.mxu0 %v5880_v8  ;;  %v734_v14 = vsel %vm731_vm9, %v6819_v55, %v733_v34  ;;  %v785_v43 = vsel %vm782_vm10, %v6826_v61, %v784_v4 }
 0x101   : > { %v778_v26 = vrot.slane %v7137_v36, 4  ;;  %v727_v50 = vrot.slane %v7139_v42, 4  ;;  %v5889_v57 = vcombine.high %v734_v14, %v785_v43  ;;  %v5888_v41 = vcombine.low %v734_v14, %v785_v43 }
 0x102   : > { %1392 = vrot.lane.b32.xlu1 %v1326_v33, %s6509_s15  ;;  %773 = vrot.lane.b32.xlu0 %v756_v3, %s6517_s23 }
 0x103   : > { %2381 = vmatprep.subr.bf16.mxu1 %v5889_v57  ;;  %v735_v55 = vsel %vm372_vm1, %v726_v11, %v727_v50  ;;  %v786_v61 = vsel %vm372_vm1, %v777_v38, %v778_v26  ;;  %v858_v11 = vld [vmem:[%s6601_s14 + $0x28] sm:$0xf] }
 0x104   : > { %v870_v47 = vpop.permute.xlu1 %869  ;;  %v819_v39 = vpop.permute.xlu0 %818  ;;  %2382 = vmatpush1.bf16.msra.mxu1 %v5888_v41  ;;  %v736_v59 = vsel %vm731_vm9, %v717_v31, %v735_v55  ;;  %v787_v8 = vsel %vm782_vm10, %v768_v18, %v786_v61  ;;  %v909_v61 = vld [vmem:[%s6601_s14 + $0x28] sm:$0xf] }
 0x105   : > { %v879_v24 = vrot.slane %v870_v47, 4  ;;  %v828_v3 = vrot.slane %v819_v39, 4  ;;  %v5890_v34 = vcombine.low %v736_v59, %v787_v8  ;;  %v5891_v4 = vcombine.high %v736_v59, %v787_v8 }
 0x106   : > { %824 = vrot.lane.b32.xlu1 %v807_v0, %s6518_s24  ;;  %1442 = vrot.lane.b32.xlu0 %v1326_v33, %s6511_s17 }
 0x107   : > { %2424 = vmatprep.subr.bf16.mxu0 %v5891_v4  ;;  %v835_v38 = vsel %vm372_vm1, %v827_v17, %v828_v3  ;;  %v886_v18 = vsel %vm372_vm1, %v878_v25, %v879_v24  ;;  %v960_v25 = vld [vmem:[%s6601_s14 + $0x28] sm:$0xf] }
 0x108   : > { %v7167_v31 = vpop.permute.xlu1 %871  ;;  %v7169_v14 = vpop.permute.xlu0 %820  ;;  %2425 = vmatpush1.bf16.msra.mxu0 %v5890_v34  ;;  %v836_v43 = vsel %vm9409_vm11, %v6841_v12, %v835_v38  ;;  %v887_v57 = vsel %vm9408_vm12, %v6848_v22, %v886_v18 }
 0x109   : > { %v880_v41 = vrot.slane %v7167_v31, 4  ;;  %v829_v0 = vrot.slane %v7169_v14, 4  ;;  %v5899_v17 = vcombine.high %v836_v43, %v887_v57  ;;  %v5898_v55 = vcombine.low %v836_v43, %v887_v57  ;;  %v1011_v43 = vld [vmem:[%s6601_s14 + $0x28] sm:$0xf] }
 0x10a   : > { %1492 = vrot.lane.b32.xlu1 %v1326_v33, %s6512_s18  ;;  %875 = vrot.lane.b32.xlu0 %v858_v11, %s9414_s20 }
 0x10b   : > { %2383 = vmatprep.subr.bf16.mxu1 %v5899_v17  ;;  %v837_v12 = vsel %vm372_vm1, %v828_v3, %v829_v0  ;;  %v888_v22 = vsel %vm372_vm1, %v879_v24, %v880_v41  ;;  %v1062_v3 = vld [vmem:[%s6601_s14 + $0x28] sm:$0xf] }
 0x10c   : > { %v972_v59 = vpop.permute.xlu1 %971  ;;  %v921_v8 = vpop.permute.xlu0 %920  ;;  %2384 = vmatpush1.bf16.msra.mxu1 %v5898_v55  ;;  %v838_v33 = vsel %vm9409_vm11, %v819_v39, %v837_v12  ;;  %v889_v34 = vsel %vm9408_vm12, %v870_v47, %v888_v22  ;;  %vm9416_vm12 = vcmask 506880   ;;  %vm9417_vm11 = vcmask 498688   ;;  %v1113_v22 = vld [vmem:[%s6601_s14 + $0x28] sm:$0xf] }
 0x10d   : > { %v981_v4 = vrot.slane %v972_v59, 4  ;;  %v930_v11 = vrot.slane %v921_v8, 4  ;;  %v5900_v38 = vcombine.low %v838_v33, %v889_v34  ;;  %v5901_v18 = vcombine.high %v838_v33, %v889_v34 }
 0x10e   : > { %977 = vrot.lane.b32.xlu1 %v960_v25, %s6521_s27  ;;  %926 = vrot.lane.b32.xlu0 %v909_v61, %s9415_s21 }
 0x10f   : > { %2426 = vmatprep.subr.bf16.mxu0 %v5901_v18  ;;  %v937_v24 = vsel %vm372_vm1, %v929_v35, %v930_v11  ;;  %v988_v47 = vsel %vm372_vm1, %v980_v45, %v981_v4  ;;  %v1164_v45 = vld [vmem:[%s6601_s14 + $0x28] sm:$0xf] }
 0x110   : > { %v7199_v39 = vpop.permute.xlu1 %973  ;;  %v7201_v57 = vpop.permute.xlu0 %922  ;;  %2427 = vmatpush1.bf16.msra.mxu0 %v5900_v38  ;;  %v938_v17 = vsel %vm9416_vm12, %v6863_v32, %v937_v24  ;;  %v989_v55 = vsel %vm9417_vm11, %v6870_v40, %v988_v47  ;;  %vm9418_vm11 = vmmov %vm9416_vm12  ;;  %vm9419_vm12 = vcmask 498688  }
 0x111   : > { %v982_v25 = vrot.slane %v7199_v39, 4  ;;  %v931_v61 = vrot.slane %v7201_v57, 4  ;;  %v5909_v35 = vcombine.high %v938_v17, %v989_v55  ;;  %v5908_v12 = vcombine.low %v938_v17, %v989_v55  ;;  %v1215_v17 = vld [vmem:[%s6601_s14 + $0x28] sm:$0xf] }
 0x112   : > { %1079 = vrot.lane.b32.xlu1 %v1062_v3, %s6523_s29  ;;  %1028 = vrot.lane.b32.xlu0 %v1011_v43, %s9410_s11 }
 0x113   : > { %2385 = vmatprep.subr.bf16.mxu1 %v5909_v35  ;;  %v939_v32 = vsel %vm372_vm1, %v930_v11, %v931_v61  ;;  %v990_v40 = vsel %vm372_vm1, %v981_v4, %v982_v25  ;;  %v1266_v11 = vld [vmem:[%s6601_s14 + $0x28] sm:$0xf] }
 0x114   : > { %v1074_v33 = vpop.permute.xlu1 %1073  ;;  %v1023_v34 = vpop.permute.xlu0 %1022  ;;  %2386 = vmatpush1.bf16.msra.mxu1 %v5908_v12  ;;  %v940_v38 = vsel %vm9418_vm11, %v921_v8, %v939_v32  ;;  %v991_v18 = vsel %vm9419_vm12, %v972_v59, %v990_v40  ;;  %vm9420_vm11 = vcmask 490496   ;;  %vm9421_vm12 = vcmask 261120   ;;  %v1327_v40 = vld [vmem:[%s6601_s14 + $0x2c] sm:$0xf] }
 0x115   : > { %v1083_v3 = vrot.slane %v1074_v33, 4  ;;  %v1032_v43 = vrot.slane %v1023_v34, 4  ;;  %v5910_v24 = vcombine.low %v940_v38, %v991_v18  ;;  %v5911_v47 = vcombine.high %v940_v38, %v991_v18 }
 0x116   : > { %1181 = vrot.lane.b32.xlu1 %v1164_v45, %s9413_s25  ;;  %1130 = vrot.lane.b32.xlu0 %v1113_v22, %s9411_s13  ;;  %s6532_s13 = smov 56  }
 0x117   : > { %2428 = vmatprep.subr.bf16.mxu0 %v5911_v47  ;;  %v1039_v4 = vsel %vm372_vm1, %v1031_v58, %v1032_v43  ;;  %v1090_v59 = vsel %vm372_vm1, %v1082_v7, %v1083_v3  ;;  %v1377_v7 = vld [vmem:[%s6601_s14 + $0x2c] sm:$0xf] }
 0x118   : > { %v7231_v8 = vpop.permute.xlu1 %1075  ;;  %v7233_v55 = vpop.permute.xlu0 %1024  ;;  %2429 = vmatpush1.bf16.msra.mxu0 %v5910_v24  ;;  %v1040_v35 = vsel %vm9420_vm11, %v6889_v54, %v1039_v4  ;;  %v1091_v12 = vsel %vm9421_vm12, %v6895_v5, %v1090_v59 }
 0x119   : > { %v1084_v45 = vrot.slane %v7231_v8, 4  ;;  %v1033_v22 = vrot.slane %v7233_v55, 4  ;;  %v5919_v58 = vcombine.high %v1040_v35, %v1091_v12  ;;  %v5918_v32 = vcombine.low %v1040_v35, %v1091_v12  ;;  %v1427_v35 = vld [vmem:[%s6601_s14 + $0x2c] sm:$0xf] }
 0x11a   : > { %1283 = vrot.lane.b32.xlu1 %v1266_v11, %s6527_s28  ;;  %1232 = vrot.lane.b32.xlu0 %v1215_v17, %s9412_s12 }
 0x11b   : > { %2387 = vmatprep.subr.bf16.mxu1 %v5919_v58  ;;  %v1041_v54 = vsel %vm372_vm1, %v1032_v43, %v1033_v22  ;;  %v1092_v5 = vsel %vm372_vm1, %v1083_v3, %v1084_v45  ;;  %v1477_v43 = vld [vmem:[%s6601_s14 + $0x2c] sm:$0xf] }
 0x11c   : > { %v1176_v38 = vpop.permute.xlu1 %1175  ;;  %v1125_v18 = vpop.permute.xlu0 %1124  ;;  %2388 = vmatpush1.bf16.msra.mxu1 %v5918_v32  ;;  %v1042_v24 = vsel %vm9420_vm11, %v1023_v34, %v1041_v54  ;;  %v1093_v47 = vsel %vm9421_vm12, %v1074_v33, %v1092_v5  ;;  %vm9422_vm11 = vcmask 244736   ;;  %v1649_v5 = vld [vmem:[%s9380_s2] sm:$0xff] }
 0x11d   : > { %v1185_v11 = vrot.slane %v1176_v38, 4  ;;  %v1134_v17 = vrot.slane %v1125_v18, 4  ;;  %v5920_v4 = vcombine.low %v1042_v24, %v1093_v47  ;;  %v5921_v59 = vcombine.high %v1042_v24, %v1093_v47  ;;  %vm9423_vm12 = vmmov %vm9422_vm11 }
 0x11e   : > { %1394 = vrot.lane.b32.xlu1 %v1377_v7, %s6509_s15  ;;  %1344 = vrot.lane.b32.xlu0 %v1327_v40, %s6510_s16 }
 0x11f   : > { %2430 = vmatprep.subr.bf16.mxu0 %v5921_v59  ;;  %v1141_v3 = vsel %vm372_vm1, %v1133_v23, %v1134_v17  ;;  %v1192_v34 = vsel %vm372_vm1, %v1184_v37, %v1185_v11 }
 0x120   : > { %v7263_v33 = vpop.permute.xlu1 %1177  ;;  %v7265_v12 = vpop.permute.xlu0 %1126  ;;  %2431 = vmatpush1.bf16.msra.mxu0 %v5920_v4  ;;  %v1142_v58 = vsel %vm1139_vm13, %v6910_v19, %v1141_v3  ;;  %v1193_v32 = vsel %vm9422_vm11, %v6915_v30, %v1192_v34  ;;  %v1650_v30 = vld [vmem:[%s9380_s2 + $0x8] sm:$0xff]  ;;  %vm9429_vm11 = vcmask 515072  }
 0x121   : > { %v1186_v7 = vrot.slane %v7263_v33, 4  ;;  %v1135_v40 = vrot.slane %v7265_v12, 4  ;;  %v5929_v23 = vcombine.high %v1142_v58, %v1193_v32  ;;  %v5928_v54 = vcombine.low %v1142_v58, %v1193_v32 }
 0x122   : > { %1494 = vrot.lane.b32.xlu1 %v1477_v43, %s6512_s18  ;;  %1444 = vrot.lane.b32.xlu0 %v1427_v35, %s6511_s17 }
 0x123   : > { %2389 = vmatprep.subr.bf16.mxu1 %v5929_v23  ;;  %v1143_v37 = vsel %vm372_vm1, %v1134_v17, %v1135_v40  ;;  %v1194_v19 = vsel %vm372_vm1, %v1185_v11, %v1186_v7 }
 0x124   : > { %v1278_v24 = vpop.permute.xlu1 %1277  ;;  %v1227_v47 = vpop.permute.xlu0 %1226  ;;  %2390 = vmatpush1.bf16.msra.mxu1 %v5928_v54  ;;  %v1144_v4 = vsel %vm1139_vm13, %v1125_v18, %v1143_v37  ;;  %v1195_v59 = vsel %vm9423_vm12, %v1176_v38, %v1194_v19  ;;  %vm9430_vm12 = vcmask 506880  }
 0x125   : > { %v1287_v17 = vrot.slane %v1278_v24, 4  ;;  %v1236_v43 = vrot.slane %v1227_v47, 4  ;;  %v5930_v35 = vcombine.low %v1144_v4, %v1195_v59  ;;  %v5931_v3 = vcombine.high %v1144_v4, %v1195_v59 }
 0x126   : > { %1658 = vperm.xlu1 %6243, %v1650_v30   ;;  %1653 = vperm.xlu0 %6242, %v1649_v5  }
 0x127   : > { %2432 = vmatprep.subr.bf16.mxu0 %v5931_v3  ;;  %v1243_v11 = vsel %vm372_vm1, %v1235_v53, %v1236_v43  ;;  %v1294_v34 = vsel %vm372_vm1, %v1286_v2, %v1287_v17 }
 0x128   : > { %v7295_v58 = vpop.permute.xlu1 %1279  ;;  %v7297_v18 = vpop.permute.xlu0 %1228  ;;  %2433 = vmatpush1.bf16.msra.mxu0 %v5930_v35  ;;  %v1244_v38 = vsel %vm1241_vm15, %v6932_v48, %v1243_v11  ;;  %v1295_v32 = vsel %vm1292_vm14, %v6939_v60, %v1294_v34  ;;  %v1313_v11 = vld [vmem:[%s6601_s14 + $0xc] sm:$0xff] }
 0x129   : > { %v1288_v23 = vrot.slane %v7295_v58, 4  ;;  %v1237_v53 = vrot.slane %v7297_v18, 4  ;;  %v5939_v54 = vcombine.high %v1244_v38, %v1295_v32  ;;  %v5938_v37 = vcombine.low %v1244_v38, %v1295_v32 }
 0x12b   : > { %2391 = vmatprep.subr.bf16.mxu1 %v5939_v54  ;;  %v1245_v2 = vsel %vm372_vm1, %v1236_v43, %v1237_v53  ;;  %v1296_v19 = vsel %vm372_vm1, %v1287_v17, %v1288_v23 }
 0x12c   : > { %v7311_v48 = vpop.permute.xlu1 %1340  ;;  %v1339_v30 = vpop.permute.xlu0 %1338  ;;  %2392 = vmatpush1.bf16.msra.mxu1 %v5938_v37  ;;  %v1246_v60 = vsel %vm1241_vm15, %v1227_v47, %v1245_v2  ;;  %v1297_v5 = vsel %vm1292_vm14, %v1278_v24, %v1296_v19 }
 0x12d   : > { %v1349_v4 = vrot.slane %v7311_v48, 4  ;;  %v1348_v59 = vrot.slane %v1339_v30, 4  ;;  %v5940_v35 = vcombine.low %v1246_v60, %v1297_v5  ;;  %v5941_v3 = vcombine.high %v1246_v60, %v1297_v5 }
 0x12e   : > { %v9424_v5 = vrot.slane %v6965_v44, 4 }
 0x12f   : > { %v1356_v43 = vsel %vm372_vm1, %v1348_v59, %v1349_v4  ;;  %2434 = vmatprep.subr.bf16.mxu0 %v5941_v3  ;;  %v1354_v17 = vsel %vm372_vm1, %v1347_v27, %v1348_v59 }
 0x130   : > { %v1357_v34 = vsel %vm374_vm2, %v1339_v30, %v1356_v43  ;;  %v1439_v47 = vpop.permute.xlu1 %1438  ;;  %v1389_v38 = vpop.permute.xlu0 %1388  ;;  %2435 = vmatpush1.bf16.msra.mxu0 %v5940_v35  ;;  %v1355_v24 = vsel %vm374_vm2, %v6954_v21, %v1354_v17  ;;  %v9425_v30 = vrot.slane %v6974_v62, 4 }
 0x131   : > { %v5950_v32 = vcombine.low %v6885_v51, %v1357_v34  ;;  %v1448_v54 = vrot.slane %v1439_v47, 4  ;;  %v1398_v37 = vrot.slane %v1389_v38, 4  ;;  %v5949_v2 = vcombine.high %v1313_v11, %v1355_v24 }
 0x132   : > { %v5951_v19 = vcombine.high %v6885_v51, %v1357_v34  ;;  %v5948_v60 = vcombine.low %v1313_v11, %v1355_v24 }
 0x133   : > { %2393 = vmatprep.subr.bf16.mxu1 %v5949_v2  ;;  %v1404_v27 = vsel %vm372_vm1, %v9424_v5, %v1398_v37  ;;  %v1454_v59 = vsel %vm372_vm1, %v9425_v30, %v1448_v54 }
 0x134   : > { %2436 = vmatprep.subr.bf16.mxu0 %v5951_v19  ;;  %v7334_v35 = vpop.permute.xlu1 %1440  ;;  %v7336_v21 = vpop.permute.xlu0 %1390  ;;  %2394 = vmatpush1.bf16.msra.mxu1 %v5948_v60  ;;  %v1405_v3 = vsel %vm425_vm4, %v6965_v44, %v1404_v27  ;;  %v1455_v51 = vsel %vm476_vm3, %v6974_v62, %v1454_v59 }
 0x135   : > { %v1449_v11 = vrot.slane %v7334_v35, 4  ;;  %v1399_v43 = vrot.slane %v7336_v21, 4  ;;  %2437 = vmatpush1.bf16.msra.mxu0 %v5950_v32  ;;  %v5959_v17 = vcombine.high %v1405_v3, %v1455_v51  ;;  %v5958_v34 = vcombine.low %v1405_v3, %v1455_v51 }
 0x137   : > { %2395 = vmatprep.subr.bf16.mxu1 %v5959_v17  ;;  %v1406_v24 = vsel %vm372_vm1, %v1398_v37, %v1399_v43  ;;  %v1456_v2 = vsel %vm372_vm1, %v1448_v54, %v1449_v11  ;;  %v9426_v37 = vrot.slane %v6989_v28, 4 }
 0x138   : > { %v7350_v44 = vpop.permute.xlu1 %1490  ;;  %v1489_v19 = vpop.permute.xlu0 %1488  ;;  %2396 = vmatpush1.bf16.msra.mxu1 %v5958_v34  ;;  %v1407_v62 = vsel %vm425_vm4, %v1389_v38, %v1406_v24  ;;  %v1457_v60 = vsel %vm476_vm3, %v1439_v47, %v1456_v2 }
 0x139   : > { %v1499_v32 = vrot.slane %v7350_v44, 4  ;;  %v1498_v5 = vrot.slane %v1489_v19, 4  ;;  %v5960_v27 = vcombine.low %v1407_v62, %v1457_v60  ;;  %v5961_v30 = vcombine.high %v1407_v62, %v1457_v60 }
 0x13b   : > { %v1504_v59 = vsel %vm372_vm1, %v9426_v37, %v1498_v5  ;;  %v1506_v54 = vsel %vm372_vm1, %v1498_v5, %v1499_v32  ;;  %2438 = vmatprep.subr.bf16.mxu0 %v5961_v30  ;;  %v335_v5 = vld [vmem:[%s6601_s14 + $0x18] sm:$0xff] }
 0x13c   : > { %v1507_v3 = vsel %vm527_vm5, %v1489_v19, %v1506_v54  ;;  %v7362_v38 = vpop.permute.xlu1 %414  ;;  %v7364_v47 = vpop.permute.xlu0 %362  ;;  %2439 = vmatpush1.bf16.msra.mxu0 %v5960_v27  ;;  %v1505_v51 = vsel %vm527_vm5, %v6989_v28, %v1504_v59  ;;  %v9427_v27 = vrot.slane %v7001_v63, 4 }
 0x13d   : > { %v5970_v17 = vcombine.low %v1507_v3, %v1507_v3  ;;  %v5971_v34 = vcombine.high %v1507_v3, %v1507_v3  ;;  %v422_v24 = vrot.slane %v7362_v38, 4  ;;  %v370_v2 = vrot.slane %v7364_v47, 4 }
 0x13e   : > { %v5969_v62 = vcombine.high %v1505_v51, %v1505_v51  ;;  %v5968_v60 = vcombine.low %v1505_v51, %v1505_v51 }
 0x13f   : > { %5980 = vmatprep.subr.msk.bf16.mxu0 %vm372_vm1, %v5971_v34  ;;  %v2313_v19 = vsel %vm372_vm1, %v5970_v17, 0  ;;  %v380_v30 = vsel %vm372_vm1, %v9427_v27, %v370_v2  ;;  %v431_v3 = vsel %vm372_vm1, %v421_v13, %v422_v24 }
 0x140   : > { %5978 = vmatprep.subr.msk.bf16.mxu1 %vm372_vm1, %v5969_v62  ;;  %v7379_v28 = vpop.permute.xlu1 %516  ;;  %v7381_v37 = vpop.permute.xlu0 %465  ;;  %v2307_v59 = vsel %vm372_vm1, %v5968_v60, 0  ;;  %2441 = vmatpush1.bf16.msra.mxu0 %v2313_v19  ;;  %v381_v54 = vsel %vm374_vm2, %v7001_v63, %v380_v30  ;;  %v432_v19 = vsel %vm425_vm4, %v7042_v52, %v431_v3 }
 0x141   : > { %v524_v51 = vrot.slane %v7379_v28, 4  ;;  %v473_v17 = vrot.slane %v7381_v37, 4  ;;  %2398 = vmatpush1.bf16.msra.mxu1 %v2307_v59  ;;  %v5852_v34 = vcombine.low %v335_v5, %v381_v54  ;;  %v5853_v62 = vcombine.high %v335_v5, %v381_v54 }
 0x143   : > { %2449 = vmatmul.mubr.bf16.vlgmr.msra.gmra.mrb[4].mxu0 %v7018_v56  ;;  %2459 = vmatprep.subr.bf16.mxu1 %v5853_v62  ;;  %v482_v63 = vsel %vm372_vm1, %v472_v46, %v473_v17  ;;  %v533_v27 = vsel %vm372_vm1, %v523_v16, %v524_v51 }
 0x144   : > { %2406 = vmatmul.mubr.bf16.vlgmr.msra.gmra.mrb[0].mxu1 %v7018_v56  ;;  %v7400_v60 = vpop.permute.xlu1 %618  ;;  %v7402_v13 = vpop.permute.xlu0 %567  ;;  %v483_v5 = vsel %vm476_vm3, %v7040_v9, %v482_v63  ;;  %v6499_v56 = vld [vmem:[%s9379_s1 + $0x4] ss:$8 sps:$4 sm:$0xff]   ;;  %v534_v3 = vsel %vm527_vm5, %v7076_v6, %v533_v27 }
 0x145   : > { %5985 = vmatprep.mubr.msk.bf16.mxu0 %vm2295_vm0, %v6499_v56  ;;  %v626_v46 = vrot.slane %v7400_v60, 4  ;;  %v575_v30 = vrot.slane %v7402_v13, 4  ;;  %2460 = vmatpush1.bf16.msra.mxu1 %v5852_v34  ;;  %v5862_v52 = vcombine.low %v432_v19, %v483_v5  ;;  %v5863_v59 = vcombine.high %v432_v19, %v483_v5 }
 0x146   : > { %5983 = vmatprep.mubr.msk.bf16.mxu1 %vm2295_vm0, %v6499_v56  ;;  %vm9428_vm0 = vcmask 523264  }
 0x147   : > { %2461 = vmatprep.subr.bf16.mxu1 %v5863_v59  ;;  %v584_v9 = vsel %vm372_vm1, %v574_v10, %v575_v30  ;;  %v635_v62 = vsel %vm372_vm1, %v625_v20, %v626_v46 }
 0x148   : > { %v7425_v16 = vpop.permute.xlu1 %720  ;;  %v7427_v54 = vpop.permute.xlu0 %669  ;;  %v585_v34 = vsel %vm578_vm6, %v7074_v1, %v584_v9  ;;  %v636_v20 = vsel %vm629_vm7, %v7108_v15, %v635_v62 }
 0x149   : > { %v728_v63 = vrot.slane %v7425_v16, 4  ;;  %v677_v10 = vrot.slane %v7427_v54, 4  ;;  %2462 = vmatpush1.bf16.msra.mxu1 %v5862_v52  ;;  %v5872_v19 = vcombine.low %v534_v3, %v585_v34  ;;  %v5873_v5 = vcombine.high %v534_v3, %v585_v34 }
 0x14b   : > { %2463 = vmatprep.subr.bf16.mxu1 %v5873_v5  ;;  %v686_v1 = vsel %vm372_vm1, %v676_v29, %v677_v10  ;;  %v737_v52 = vsel %vm372_vm1, %v727_v50, %v728_v63 }
 0x14c   : > { %v7445_v6 = vpop.permute.xlu1 %822  ;;  %v7447_v27 = vpop.permute.xlu0 %771  ;;  %v687_v56 = vsel %vm680_vm8, %v7106_v49, %v686_v1  ;;  %v738_v50 = vsel %vm731_vm9, %v7139_v42, %v737_v52 }
 0x14d   : > { %v830_v59 = vrot.slane %v7445_v6, 4  ;;  %v779_v29 = vrot.slane %v7447_v27, 4  ;;  %2464 = vmatpush1.bf16.msra.mxu1 %v5872_v19  ;;  %v5882_v9 = vcombine.low %v636_v20, %v687_v56  ;;  %v5883_v3 = vcombine.high %v636_v20, %v687_v56 }
 0x14f   : > { %2465 = vmatprep.subr.bf16.mxu1 %v5883_v3  ;;  %v788_v49 = vsel %vm372_vm1, %v778_v26, %v779_v29  ;;  %v839_v19 = vsel %vm372_vm1, %v829_v0, %v830_v59 }
 0x150   : > { %v7465_v15 = vpop.permute.xlu1 %924  ;;  %v7467_v34 = vpop.permute.xlu0 %873  ;;  %v789_v62 = vsel %vm782_vm10, %v7137_v36, %v788_v49  ;;  %v840_v0 = vsel %vm9428_vm0, %v7169_v14, %v839_v19  ;;  %v336_v14 = vld [vmem:[%s6601_s14 + $0x20] sm:$0xff]  ;;  %vm9431_vm0 = vcmask 498688  }
 0x151   : > { %v932_v5 = vrot.slane %v7465_v15, 4  ;;  %v881_v26 = vrot.slane %v7467_v34, 4  ;;  %2466 = vmatpush1.bf16.msra.mxu1 %v5882_v9  ;;  %v5892_v1 = vcombine.low %v738_v50, %v789_v62  ;;  %v5893_v20 = vcombine.high %v738_v50, %v789_v62 }
 0x153   : > { %2467 = vmatprep.subr.bf16.mxu1 %v5893_v20  ;;  %v890_v36 = vsel %vm372_vm1, %v880_v41, %v881_v26  ;;  %v941_v9 = vsel %vm372_vm1, %v931_v61, %v932_v5 }
 0x154   : > { %v365_v42 = vpop.permute.xlu1 %364  ;;  %v7485_v56 = vpop.permute.xlu0 %975  ;;  %v891_v52 = vsel %vm9429_vm11, %v7167_v31, %v890_v36  ;;  %vm9432_vm11 = vcmask 490496  }
 0x155   : > { %v371_v3 = vrot.slane %v365_v42, 4  ;;  %v983_v49 = vrot.slane %v7485_v56, 4  ;;  %2468 = vmatpush1.bf16.msra.mxu1 %v5892_v1  ;;  %v5902_v41 = vcombine.low %v840_v0, %v891_v52  ;;  %v5903_v50 = vcombine.high %v840_v0, %v891_v52 }
 0x156   : > { %v942_v1 = vsel %vm9430_vm12, %v7201_v57, %v941_v9  ;;  %vm9433_vm12 = vcmask 261120  }
 0x157   : > { %v382_v62 = vsel %vm372_vm1, %v370_v2, %v371_v3  ;;  %2469 = vmatprep.subr.bf16.mxu1 %v5903_v50  ;;  %v992_v31 = vsel %vm372_vm1, %v982_v25, %v983_v49 }
 0x158   : > { %v7506_v19 = vpop.permute.xlu1 %1077  ;;  %v7508_v61 = vpop.permute.xlu0 %1026  ;;  %v993_v20 = vsel %vm9431_vm0, %v7199_v39, %v992_v31  ;;  %v383_v2 = vsel %vm374_vm2, %v7364_v47, %v382_v62  ;;  %vm9434_vm0 = vcmask 244736  }
 0x159   : > { %v1085_v36 = vrot.slane %v7506_v19, 4  ;;  %v1034_v42 = vrot.slane %v7508_v61, 4  ;;  %2470 = vmatpush1.bf16.msra.mxu1 %v5902_v41  ;;  %v5912_v25 = vcombine.low %v942_v1, %v993_v20  ;;  %v5913_v0 = vcombine.high %v942_v1, %v993_v20 }
 0x15a   : > { %v5854_v52 = vcombine.low %v336_v14, %v383_v2  ;;  %v5855_v3 = vcombine.high %v336_v14, %v383_v2 }
 0x15b   : > { %2471 = vmatprep.subr.bf16.mxu1 %v5913_v0  ;;  %v1043_v57 = vsel %vm372_vm1, %v1033_v22, %v1034_v42  ;;  %v1094_v39 = vsel %vm372_vm1, %v1084_v45, %v1085_v36 }
 0x15c   : > { %2502 = vmatprep.subr.bf16.mxu0 %v5855_v3  ;;  %v468_v47 = vpop.permute.xlu1 %467  ;;  %v417_v9 = vpop.permute.xlu0 %416  ;;  %v1044_v41 = vsel %vm9432_vm11, %v7233_v55, %v1043_v57  ;;  %v1095_v50 = vsel %vm9433_vm12, %v7231_v8, %v1094_v39 }
 0x15d   : > { %v474_v62 = vrot.slane %v468_v47, 4  ;;  %v423_v31 = vrot.slane %v417_v9, 4  ;;  %2472 = vmatpush1.bf16.msra.mxu1 %v5912_v25  ;;  %2503 = vmatpush1.bf16.msra.mxu0 %v5854_v52  ;;  %v5922_v22 = vcombine.low %v1044_v41, %v1095_v50  ;;  %v5923_v14 = vcombine.high %v1044_v41, %v1095_v50 }
 0x15f   : > { %v484_v1 = vsel %vm372_vm1, %v473_v17, %v474_v62  ;;  %v433_v45 = vsel %vm372_vm1, %v422_v24, %v423_v31  ;;  %2473 = vmatprep.subr.bf16.mxu1 %v5923_v14 }
 0x160   : > { %v7538_v20 = vpop.permute.xlu1 %1179  ;;  %v7540_v55 = vpop.permute.xlu0 %1128  ;;  %v434_v8 = vsel %vm425_vm4, %v7362_v38, %v433_v45  ;;  %v485_v2 = vsel %vm476_vm3, %v7381_v37, %v484_v1 }
 0x161   : > { %v1187_v25 = vrot.slane %v7538_v20, 4  ;;  %v1136_v0 = vrot.slane %v7540_v55, 4  ;;  %2474 = vmatpush1.bf16.msra.mxu1 %v5922_v22  ;;  %v5864_v17 = vcombine.low %v434_v8, %v485_v2  ;;  %v5865_v52 = vcombine.high %v434_v8, %v485_v2 }
 0x163   : > { %2504 = vmatprep.subr.bf16.mxu0 %v5865_v52  ;;  %v1145_v24 = vsel %vm372_vm1, %v1135_v40, %v1136_v0  ;;  %v1196_v38 = vsel %vm372_vm1, %v1186_v7, %v1187_v25 }
 0x164   : > { %v570_v37 = vpop.permute.xlu1 %569  ;;  %v519_v3 = vpop.permute.xlu0 %518  ;;  %2505 = vmatpush1.bf16.msra.mxu0 %v5864_v17  ;;  %v1146_v57 = vsel %vm1139_vm13, %v7265_v12, %v1145_v24  ;;  %v1197_v39 = vsel %vm9434_vm0, %v7263_v33, %v1196_v38 }
 0x165   : > { %v576_v47 = vrot.slane %v570_v37, 4  ;;  %v525_v9 = vrot.slane %v519_v3, 4  ;;  %v5932_v41 = vcombine.low %v1146_v57, %v1197_v39  ;;  %v5933_v50 = vcombine.high %v1146_v57, %v1197_v39 }
 0x167   : > { %v586_v40 = vsel %vm372_vm1, %v575_v30, %v576_v47  ;;  %v535_v7 = vsel %vm372_vm1, %v524_v51, %v525_v9  ;;  %2475 = vmatprep.subr.bf16.mxu1 %v5933_v50  ;;  %v1315_v9 = vld [vmem:[%s6601_s14 + $0x1c] sm:$0xff] }
 0x168   : > { %v7568_v62 = vpop.permute.xlu1 %1281  ;;  %v7570_v31 = vpop.permute.xlu0 %1230  ;;  %2476 = vmatpush1.bf16.msra.mxu1 %v5932_v41  ;;  %v536_v33 = vsel %vm527_vm5, %v7379_v28, %v535_v7  ;;  %v587_v12 = vsel %vm578_vm6, %v7402_v13, %v586_v40 }
 0x169   : > { %v1289_v22 = vrot.slane %v7568_v62, 4  ;;  %v1238_v30 = vrot.slane %v7570_v31, 4  ;;  %v5874_v14 = vcombine.low %v536_v33, %v587_v12  ;;  %v5875_v1 = vcombine.high %v536_v33, %v587_v12 }
 0x16b   : > { %2506 = vmatprep.subr.bf16.mxu0 %v5875_v1  ;;  %v1247_v51 = vsel %vm372_vm1, %v1237_v53, %v1238_v30  ;;  %v1298_v28 = vsel %vm372_vm1, %v1288_v23, %v1289_v22 }
 0x16c   : > { %v672_v13 = vpop.permute.xlu1 %671  ;;  %v621_v45 = vpop.permute.xlu0 %620  ;;  %2507 = vmatpush1.bf16.msra.mxu0 %v5874_v14  ;;  %v1248_v8 = vsel %vm1241_vm15, %v7297_v18, %v1247_v51  ;;  %v1299_v2 = vsel %vm1292_vm14, %v7295_v58, %v1298_v28 }
 0x16d   : > { %v678_v17 = vrot.slane %v672_v13, 4  ;;  %v627_v52 = vrot.slane %v621_v45, 4  ;;  %v5942_v24 = vcombine.low %v1248_v8, %v1299_v2  ;;  %v5943_v53 = vcombine.high %v1248_v8, %v1299_v2 }
 0x16f   : > { %v688_v38 = vsel %vm372_vm1, %v677_v10, %v678_v17  ;;  %v637_v23 = vsel %vm372_vm1, %v626_v46, %v627_v52  ;;  %2477 = vmatprep.subr.bf16.mxu1 %v5943_v53 }
 0x170   : > { %v723_v37 = vpop.permute.xlu1 %722  ;;  %v7598_v3 = vpop.permute.xlu0 %1342  ;;  %2478 = vmatpush1.bf16.msra.mxu1 %v5942_v24  ;;  %v638_v58 = vsel %vm629_vm7, %v7400_v60, %v637_v23  ;;  %v689_v18 = vsel %vm680_vm8, %v7427_v54, %v688_v38  ;;  %vm9435_vm7 = vcmask 523264   ;;  %vm9436_vm8 = vcmask 515072  }
 0x171   : > { %v729_v57 = vrot.slane %v723_v37, 4  ;;  %v1350_v39 = vrot.slane %v7598_v3, 4  ;;  %v5884_v47 = vcombine.low %v638_v58, %v689_v18  ;;  %v5885_v10 = vcombine.high %v638_v58, %v689_v18 }
 0x173   : > { %2508 = vmatprep.subr.bf16.mxu0 %v5885_v10  ;;  %v1358_v46 = vsel %vm372_vm1, %v1349_v4, %v1350_v39  ;;  %v739_v60 = vsel %vm372_vm1, %v728_v63, %v729_v57 }
 0x174   : > { %v7614_v41 = vpop.permute.xlu1 %1392  ;;  %v774_v54 = vpop.permute.xlu0 %773  ;;  %2509 = vmatpush1.bf16.msra.mxu0 %v5884_v47  ;;  %v1359_v50 = vsel %vm374_vm2, %v7311_v48, %v1358_v46  ;;  %v740_v63 = vsel %vm731_vm9, %v7425_v16, %v739_v60  ;;  %vm9437_vm9 = vcmask 506880  }
 0x175   : > { %v1400_v40 = vrot.slane %v7614_v41, 4  ;;  %v780_v7 = vrot.slane %v774_v54, 4  ;;  %v5952_v33 = vcombine.low %v1315_v9, %v1359_v50  ;;  %v5953_v12 = vcombine.high %v1315_v9, %v1359_v50 }
 0x177   : > { %v790_v4 = vsel %vm372_vm1, %v779_v29, %v780_v7  ;;  %2479 = vmatprep.subr.bf16.mxu1 %v5953_v12  ;;  %v1408_v51 = vsel %vm372_vm1, %v1399_v43, %v1400_v40 }
 0x178   : > { %v825_v14 = vpop.permute.xlu1 %824  ;;  %v7622_v1 = vpop.permute.xlu0 %1442  ;;  %2480 = vmatpush1.bf16.msra.mxu1 %v5952_v33  ;;  %v791_v48 = vsel %vm782_vm10, %v7447_v27, %v790_v4  ;;  %v1409_v43 = vsel %vm425_vm4, %v7336_v21, %v1408_v51  ;;  %vm9438_vm10 = vcmask 498688  }
 0x179   : > { %v831_v28 = vrot.slane %v825_v14, 4  ;;  %v1450_v29 = vrot.slane %v7622_v1, 4  ;;  %v5894_v13 = vcombine.low %v740_v63, %v791_v48  ;;  %v5895_v45 = vcombine.high %v740_v63, %v791_v48 }
 0x17b   : > { %2510 = vmatprep.subr.bf16.mxu0 %v5895_v45  ;;  %v1458_v16 = vsel %vm372_vm1, %v1449_v11, %v1450_v29  ;;  %v841_v27 = vsel %vm372_vm1, %v830_v59, %v831_v28 }
 0x17c   : > { %v7642_v8 = vpop.permute.xlu1 %1492  ;;  %v876_v2 = vpop.permute.xlu0 %875  ;;  %2511 = vmatpush1.bf16.msra.mxu0 %v5894_v13  ;;  %v1459_v17 = vsel %vm476_vm3, %v7334_v35, %v1458_v16  ;;  %v842_v37 = vsel %vm9435_vm7, %v7445_v6, %v841_v27 }
 0x17d   : > { %v1500_v52 = vrot.slane %v7642_v8, 4  ;;  %v882_v24 = vrot.slane %v876_v2, 4  ;;  %v5962_v53 = vcombine.low %v1409_v43, %v1459_v17  ;;  %v5963_v38 = vcombine.high %v1409_v43, %v1459_v17 }
 0x17f   : > { %v1508_v11 = vsel %vm372_vm1, %v1499_v32, %v1500_v52  ;;  %v892_v59 = vsel %vm372_vm1, %v881_v26, %v882_v24  ;;  %2481 = vmatprep.subr.bf16.mxu1 %v5963_v38 }
 0x180   : > { %v978_v21 = vpop.permute.xlu1 %977  ;;  %v927_v23 = vpop.permute.xlu0 %926  ;;  %2482 = vmatpush1.bf16.msra.mxu1 %v5962_v53  ;;  %v1509_v35 = vsel %vm527_vm5, %v7350_v44, %v1508_v11  ;;  %v893_v58 = vsel %vm9436_vm8, %v7467_v34, %v892_v59  ;;  %vm9443_vm8 = vmmov %vm9432_vm11 }
 0x181   : > { %v984_v18 = vrot.slane %v978_v21, 4  ;;  %v933_v57 = vrot.slane %v927_v23, 4  ;;  %v5973_v32 = vcombine.high %v1509_v35, %v1509_v35  ;;  %v5904_v47 = vcombine.low %v842_v37, %v893_v58  ;;  %v1316_v23 = vld [vmem:[%s6601_s14 + $0x24] sm:$0xff]  ;;  %s6529_s14 = smov 122  }
 0x182   : > { %v5905_v10 = vcombine.high %v842_v37, %v893_v58  ;;  %v5972_v9 = vcombine.low %v1509_v35, %v1509_v35 }
 0x183   : > { %v994_v26 = vsel %vm372_vm1, %v983_v49, %v984_v18  ;;  %v943_v44 = vsel %vm372_vm1, %v932_v5, %v933_v57  ;;  %5982 = vmatprep.subr.msk.bf16.mxu1 %vm372_vm1, %v5973_v32 }
 0x184   : > { %2512 = vmatprep.subr.bf16.mxu0 %v5905_v10  ;;  %v1080_v6 = vpop.permute.xlu1 %1079  ;;  %v1029_v46 = vpop.permute.xlu0 %1028  ;;  %v2319_v34 = vsel %vm372_vm1, %v5972_v9, 0  ;;  %v944_v60 = vsel %vm9437_vm9, %v7465_v15, %v943_v44  ;;  %v995_v54 = vsel %vm9438_vm10, %v7485_v56, %v994_v26  ;;  %v6500_v15 = vld [vmem:[%s9379_s1] ss:$8 sps:$4 sm:$0xff]   ;;  %vm9444_vm10 = vmmov %vm9443_vm8 }
 0x185   : > { %v1086_v50 = vrot.slane %v1080_v6, 4  ;;  %v1035_v7 = vrot.slane %v1029_v46, 4  ;;  %2484 = vmatpush1.bf16.msra.mxu1 %v2319_v34  ;;  %2513 = vmatpush1.bf16.msra.mxu0 %v5904_v47  ;;  %v5914_v49 = vcombine.low %v944_v60, %v995_v54  ;;  %v5915_v33 = vcombine.high %v944_v60, %v995_v54 }
 0x187   : > { %v1096_v5 = vsel %vm372_vm1, %v1085_v36, %v1086_v50  ;;  %v1045_v12 = vsel %vm372_vm1, %v1034_v42, %v1035_v7  ;;  %2514 = vmatprep.subr.bf16.mxu0 %v5915_v33 }
 0x188   : > { %2492 = vmatmul.mubr.bf16.vlgmr.msra.gmra.mrb[4].mxu1 %v6500_v15  ;;  %v1182_v56 = vpop.permute.xlu1 %1181  ;;  %v1131_v4 = vpop.permute.xlu0 %1130  ;;  %v1046_v14 = vsel %vm9432_vm11, %v7508_v61, %v1045_v12  ;;  %v1097_v63 = vsel %vm9433_vm12, %v7506_v19, %v1096_v5  ;;  %vm3304_vm11 = vcmask 457728  }
 0x189   : > { %v1188_v48 = vrot.slane %v1182_v56, 4  ;;  %v1137_v36 = vrot.slane %v1131_v4, 4  ;;  %2515 = vmatpush1.bf16.msra.mxu0 %v5914_v49  ;;  %v5924_v51 = vcombine.low %v1046_v14, %v1097_v63  ;;  %v5925_v28 = vcombine.high %v1046_v14, %v1097_v63 }
 0x18b   : > { %v1198_v42 = vsel %vm372_vm1, %v1187_v25, %v1188_v48  ;;  %v1147_v13 = vsel %vm372_vm1, %v1136_v0, %v1137_v36  ;;  %2516 = vmatprep.subr.bf16.mxu0 %v5925_v28 }
 0x18c   : > { %v1284_v45 = vpop.permute.xlu1 %1283  ;;  %v1233_v16 = vpop.permute.xlu0 %1232  ;;  %v1148_v61 = vsel %vm1139_vm13, %v7540_v55, %v1147_v13  ;;  %v1199_v19 = vsel %vm9434_vm0, %v7538_v20, %v1198_v42  ;;  %vm9439_vm13 = vmmov %vm9435_vm7 }
 0x18d   : > { %v1290_v27 = vrot.slane %v1284_v45, 4  ;;  %v1239_v2 = vrot.slane %v1233_v16, 4  ;;  %2517 = vmatpush1.bf16.msra.mxu0 %v5924_v51  ;;  %v5934_v43 = vcombine.low %v1148_v61, %v1199_v19  ;;  %v5935_v17 = vcombine.high %v1148_v61, %v1199_v19  ;;  %vm9445_vm12 = vmmov %vm9439_vm13 }
 0x18e   : > { %vm9446_vm0 = vmmov %vm9445_vm12 }
 0x18f   : > { %v1300_v25 = vsel %vm372_vm1, %v1289_v22, %v1290_v27  ;;  %v1249_v0 = vsel %vm372_vm1, %v1238_v30, %v1239_v2  ;;  %2518 = vmatprep.subr.bf16.mxu0 %v5935_v17 }
 0x190   : > { %v1395_v24 = vpop.permute.xlu1 %1394  ;;  %v1345_v55 = vpop.permute.xlu0 %1344  ;;  %v1250_v20 = vsel %vm1241_vm15, %v7570_v31, %v1249_v0  ;;  %v1301_v53 = vsel %vm1292_vm14, %v7568_v62, %v1300_v25  ;;  %vm9440_vm14 = vmmov %vm9435_vm7 }
 0x191   : > { %v1401_v38 = vrot.slane %v1395_v24, 4  ;;  %v1351_v11 = vrot.slane %v1345_v55, 4  ;;  %2519 = vmatpush1.bf16.msra.mxu0 %v5934_v43  ;;  %v5944_v59 = vcombine.low %v1250_v20, %v1301_v53  ;;  %v5945_v21 = vcombine.high %v1250_v20, %v1301_v53  ;;  %vm9441_vm15 = vmmov %vm9437_vm9 }
 0x192   : > { %vm9442_vm7 = vmmov %vm9437_vm9  ;;  %vm3257_vm9 = vcmask 474112  }
 0x193   : > { %v1360_v22 = vsel %vm372_vm1, %v1350_v39, %v1351_v11  ;;  %2520 = vmatprep.subr.bf16.mxu0 %v5945_v21  ;;  %v1410_v30 = vsel %vm372_vm1, %v1400_v40, %v1401_v38 }
 0x194   : > { %v1495_v35 = vpop.permute.xlu1 %1494  ;;  %v1445_v31 = vpop.permute.xlu0 %1444  ;;  %v1361_v62 = vsel %vm374_vm2, %v7598_v3, %v1360_v22  ;;  %v1411_v40 = vsel %vm425_vm4, %v7614_v41, %v1410_v30 }
 0x195   : > { %v1501_v37 = vrot.slane %v1495_v35, 4  ;;  %v1451_v58 = vrot.slane %v1445_v31, 4  ;;  %2521 = vmatpush1.bf16.msra.mxu0 %v5944_v59  ;;  %v5954_v18 = vcombine.low %v1316_v23, %v1361_v62  ;;  %v5955_v57 = vcombine.high %v1316_v23, %v1361_v62 }
 0x197   : > { %v1510_v32 = vsel %vm372_vm1, %v1500_v52, %v1501_v37  ;;  %v1460_v39 = vsel %vm372_vm1, %v1450_v29, %v1451_v58  ;;  %2522 = vmatprep.subr.bf16.mxu0 %v5955_v57 }
 0x198   : > { %v1461_v3 = vsel %vm476_vm3, %v7622_v1, %v1460_v39  ;;  %v1511_v9 = vsel %vm527_vm5, %v7642_v8, %v1510_v32  ;;  %vm3072_vm3 = vcmask 982016  }
 0x199   : > { %2523 = vmatpush1.bf16.msra.mxu0 %v5954_v18  ;;  %v5964_v47 = vcombine.low %v1411_v40, %v1461_v3  ;;  %v5965_v10 = vcombine.high %v1411_v40, %v1461_v3  ;;  %v5975_v26 = vcombine.high %v1511_v9, %v1511_v9  ;;  %v5974_v52 = vcombine.low %v1511_v9, %v1511_v9 }
 0x19b   : > { %2524 = vmatprep.subr.bf16.mxu0 %v5965_v10  ;;  %v2325_v29 = vsel %vm372_vm1, %v5974_v52, 0 }
 0x19d   : > { %2525 = vmatpush1.bf16.msra.mxu0 %v5964_v47 }
 0x19e   : > { %5984 = vmatprep.subr.msk.bf16.mxu0 %vm372_vm1, %v5975_v26 }
 0x1a1   : > { %2527 = vmatpush1.bf16.msra.mxu0 %v2325_v29 }
 0x1a4   : > { %2535 = vmatmul.mubr.bf16.vlgmr.msra.gmra.mrb[8].mxu0 %v6500_v15 }
 0x1a5   : > { %v1654_v46 = vpop.permute.xlu0 %1653  ;;  %v7731_v34 = vpop.permute.xlu1 %1658 }
 0x1ba   : > { %v2364_v41 = vpop.f32.mrb[0].mxu0 }
 0x1bb   : > { %v2366_v44 = vpop.f32.mrb[1].mxu0  ;;  %v7739_v12 = vadd.f32 %v2364_v41, %v1654_v46 }
 0x1bc   : > { %v2368_v6 = vpop.f32.mrb[2].mxu0  ;;  %v7733_v60 = vadd.f32 %v2366_v44, %v1654_v46 }
 0x1bd   : > { %v2370_v1 = vpop.f32.mrb[3].mxu0  ;;  %v7742_v15 = vadd.f32 %v2368_v6, %v7731_v34  ;;  %v2545_v61 = vmax.f32 %v7739_v12, 0.0 }
 0x1be   : > { %v2546_v36 = vmax.f32 %v7733_v60, 0.0  ;;  %v7775_v25 = vadd.f32 %v2370_v1, %v7731_v34 }
 0x1bf   : > { %v2555_v19 = vmax.f32 %v7742_v15, 0.0 }
 0x1c0   : > { %v2556_v38 = vmax.f32 %v7775_v25, 0.0 }
 0x1c1   : > { %v6249_v55 = vpack.i.bf16 %v2555_v19, %v2545_v61 }
 0x216   : > { %v2450_v8 = vpop.f32.mrb[4].mxu0 }
 0x217   : > { %v2407_v54 = vpop.f32.mrb[0].mxu1  ;;  %v7735_v50 = vadd.f32 %v2450_v8, %v1654_v46  ;;  %v2452_v7 = vpop.f32.mrb[5].mxu0 }
 0x218   : > { %v7737_v49 = vadd.f32 %v2407_v54, %v1654_v46  ;;  %v2409_v33 = vpop.f32.mrb[1].mxu1  ;;  %v2454_v5 = vpop.f32.mrb[6].mxu0  ;;  %v7778_v0 = vadd.f32 %v2452_v7, %v1654_v46 }
 0x219   : > { %v2549_v56 = vmax.f32 %v7735_v50, 0.0  ;;  %v7745_v4 = vadd.f32 %v2409_v33, %v1654_v46  ;;  %v2411_v14 = vpop.f32.mrb[2].mxu1  ;;  %v7748_v63 = vadd.f32 %v2454_v5, %v7731_v34  ;;  %v2456_v48 = vpop.f32.mrb[7].mxu0 }
 0x21a   : > { %v2547_v51 = vmax.f32 %v7737_v49, 0.0  ;;  %v2413_v28 = vpop.f32.mrb[3].mxu1  ;;  %v7761_v16 = vadd.f32 %v2411_v14, %v7731_v34  ;;  %v7772_v17 = vadd.f32 %v2456_v48, %v7731_v34  ;;  %v2550_v11 = vmax.f32 %v7778_v0, 0.0 }
 0x21b   : > { %v2548_v42 = vmax.f32 %v7745_v4, 0.0  ;;  %v7754_v13 = vadd.f32 %v2413_v28, %v7731_v34  ;;  %v2559_v2 = vmax.f32 %v7748_v63, 0.0 }
 0x21c   : > { %v6244_v45 = vpack.i.bf16 %v2547_v51, %v2546_v36  ;;  %v2557_v24 = vmax.f32 %v7761_v16, 0.0  ;;  %v2560_v53 = vmax.f32 %v7772_v17, 0.0 }
 0x21d   : > { %v6259_v27 = vpack.i.bf16 %v2549_v56, %v2548_v42  ;;  %v2558_v43 = vmax.f32 %v7754_v13, 0.0 }
 0x21e   : > { %6245 = vrot.lane.b32.xlu1 %v6244_v45, %s6510_s16  ;;  %v6254_v59 = vpack.i.bf16 %v2557_v24, %v2556_v38  ;;  %v6274_v21 = vpack.i.bf16 %v2560_v53, %v2550_v11 }
 0x21f   : > { %6260 = vrot.lane.b32.xlu0 %v6259_v27, %s6510_s16  ;;  %v6264_v20 = vpack.i.bf16 %v2559_v2, %v2558_v43 }
 0x222   : > { %6250 = vrot.lane.b32.xlu1 %v6249_v55, %s6510_s16 }
 0x223   : > { %6265 = vrot.lane.b32.xlu0 %v6264_v20, %s6510_s16 }
 0x226   : > { %6255 = vrot.lane.b32.xlu1 %v6254_v59, %s6510_s16 }
 0x227   : > { %6275 = vrot.lane.b32.xlu0 %v6274_v21, %s6510_s16 }
 0x25b   : > { %v2493_v23 = vpop.f32.mrb[4].mxu1 }
 0x25c   : > { %v7805_v22 = vadd.f32 %v2493_v23, %v1654_v46  ;;  %v2495_v30 = vpop.f32.mrb[5].mxu1 }
 0x25d   : > { %v2497_v35 = vpop.f32.mrb[6].mxu1  ;;  %v7817_v57 = vadd.f32 %v2495_v30, %v1654_v46 }
 0x25e   : > { %v7808_v31 = vadd.f32 %v2497_v35, %v7731_v34  ;;  %v2499_v62 = vpop.f32.mrb[7].mxu1  ;;  %v2551_v37 = vmax.f32 %v7805_v22, 0.0 }
 0x25f   : > { %v7820_v39 = vadd.f32 %v2499_v62, %v7731_v34  ;;  %v2552_v9 = vmax.f32 %v7817_v57, 0.0 }
 0x260   : > { %v2561_v58 = vmax.f32 %v7808_v31, 0.0 }
 0x261   : > { %v2562_v44 = vmax.f32 %v7820_v39, 0.0 }
 0x262   : > { %v6269_v18 = vpack.i.bf16 %v2561_v58, %v2551_v37 }
 0x264   : > { %6270 = vrot.lane.b32.xlu1 %v6269_v18, %s6510_s16 }
 0x277   : > { %v2536_v32 = vpop.f32.mrb[8].mxu0 }
 0x278   : > { %v7822_v40 = vadd.f32 %v2536_v32, %v1654_v46  ;;  %v2538_v3 = vpop.f32.mrb[9].mxu0 }
 0x279   : > { %v7824_v47 = vadd.f32 %v2538_v3, %v1654_v46  ;;  %v2540_v10 = vpop.f32.mrb[10].mxu0 }
 0x27a   : > { %v2553_v26 = vmax.f32 %v7822_v40, 0.0  ;;  %v7829_v52 = vadd.f32 %v2540_v10, %v7731_v34  ;;  %v2542_v29 = vpop.f32.mrb[11].mxu0 }
 0x27b   : > { %v7832_v41 = vadd.f32 %v2542_v29, %v7731_v34  ;;  %v2554_v46 = vmax.f32 %v7824_v47, 0.0 }
 0x27c   : > { %v6279_v6 = vpack.i.bf16 %v2553_v26, %v2552_v9  ;;  %v2563_v1 = vmax.f32 %v7829_v52, 0.0 }
 0x27d   : > { %v2564_v8 = vmax.f32 %v7832_v41, 0.0 }
 0x27e   : > { %v6284_v54 = vpack.i.bf16 %v2563_v1, %v2562_v44  ;;  %6280 = vrot.lane.b32.xlu0 %v6279_v6, %s6510_s16 }
 0x27f   : > { %v6289_v34 = vpack.i.bf16 %v2564_v8, %v2554_v46 }
 0x280   : > { %6285 = vrot.lane.b32.xlu1 %v6284_v54, %s6510_s16 }
 0x282   : > { %6290 = vrot.lane.b32.xlu0 %v6289_v34, %s6510_s16  ;;  %s6530_s16 = smov 120  }
 0x290   : > { %v6246_v7 = vpop.permute.xlu1 %6245 }
 0x291   : > { %v6248_v33 = vunpack.i.h.bf16 %v6246_v7  ;;  %v6247_v5 = vunpack.i.l.bf16 %v6246_v7  ;;  %v6261_v14 = vpop.permute.xlu0 %6260 }
 0x292   : > { %v6262_v48 = vunpack.i.l.bf16 %v6261_v14  ;;  %v6263_v62 = vunpack.i.h.bf16 %v6261_v14 }
 0x293   : > { %v2685_v28 = vsel %vm374_vm2, %v6247_v5, %v6248_v33 }
 0x294   : > { %v7856_v45 = vmax.f32 %v2546_v36, %v2685_v28  ;;  %v2686_v27 = vsel %vm374_vm2, %v6248_v33, %v6262_v48  ;;  %v6251_v55 = vpop.permute.xlu1 %6250  ;;  %v2687_v28 = vsel %vm374_vm2, %v6262_v48, %v6263_v62 }
 0x295   : > { %v7861_v20 = vmax.f32 %v2547_v51, %v2686_v27  ;;  %v6252_v59 = vunpack.i.l.bf16 %v6251_v55  ;;  %v6266_v21 = vpop.permute.xlu0 %6265  ;;  %v6253_v18 = vunpack.i.h.bf16 %v6251_v55  ;;  %v7900_v15 = vmax.f32 %v2548_v42, %v2687_v28 }
 0x296   : > { %v6268_v23 = vunpack.i.h.bf16 %v6266_v21  ;;  %v6267_v30 = vunpack.i.l.bf16 %v6266_v21 }
 0x297   : > { %v6294_v35 = vpack.i.bf16 %v7861_v20, %v7856_v45  ;;  %v2684_v60 = vsel %vm374_vm2, %v6252_v59, %v6247_v5 }
 0x298   : > { %v6256_v32 = vpop.permute.xlu1 %6255  ;;  %v2696_v36 = vsel %vm374_vm2, %v6267_v30, %v6268_v23  ;;  %v7873_v7 = vmax.f32 %v2545_v61, %v2684_v60 }
 0x299   : > { %v6258_v3 = vunpack.i.h.bf16 %v6256_v32  ;;  %v6257_v10 = vunpack.i.l.bf16 %v6256_v32  ;;  %v6276_v29 = vpop.permute.xlu0 %6275  ;;  %6295 = vrot.lane.b32.xlu1 %v6294_v35, %s6513_s19  ;;  %v7877_v33 = vmax.f32 %v2558_v43, %v2696_v36 }
 0x29a   : > { %v6278_v49 = vunpack.i.h.bf16 %v6276_v29  ;;  %v6277_v34 = vunpack.i.l.bf16 %v6276_v29 }
 0x29b   : > { %v2695_v51 = vsel %vm374_vm2, %v6258_v3, %v6267_v30  ;;  %v2693_v6 = vsel %vm374_vm2, %v6253_v18, %v6257_v10  ;;  %v2694_v54 = vsel %vm374_vm2, %v6257_v10, %v6258_v3 }
 0x29c   : > { %v7881_v5 = vmax.f32 %v2557_v24, %v2695_v51  ;;  %v7885_v14 = vmax.f32 %v2555_v19, %v2693_v6  ;;  %v7890_v27 = vmax.f32 %v2556_v38, %v2694_v54  ;;  %v2688_v16 = vsel %vm374_vm2, %v6263_v62, %v6277_v34 }
 0x29d   : > { %v2697_v61 = vsel %vm374_vm2, %v6268_v23, %v6278_v49  ;;  %v7906_v19 = vmax.f32 %v2549_v56, %v2688_v16 }
 0x29e   : > { %v6309_v12 = vpack.i.bf16 %v7877_v33, %v7881_v5  ;;  %v6299_v13 = vpack.i.bf16 %v7885_v14, %v7873_v7  ;;  %v7910_v43 = vmax.f32 %v2559_v2, %v2697_v61  ;;  %v6304_v25 = vpack.i.bf16 %v7890_v27, %v7900_v15 }
 0x2a0   : > { %6310 = vrot.lane.b32.xlu1 %v6309_v12, %s6513_s19  ;;  %6300 = vrot.lane.b32.xlu0 %v6299_v13, %s6513_s19  ;;  %v6314_v4 = vpack.i.bf16 %v7910_v43, %v7906_v19 }
 0x2a4   : > { %6305 = vrot.lane.b32.xlu0 %v6304_v25, %s6513_s19 }
 0x2a8   : > { %6315 = vrot.lane.b32.xlu0 %v6314_v4, %s6513_s19 }
 0x2d6   : > { %v6271_v42 = vpop.permute.xlu1 %6270 }
 0x2d7   : > { %v6273_v24 = vunpack.i.h.bf16 %v6271_v42  ;;  %v6272_v38 = vunpack.i.l.bf16 %v6271_v42 }
 0x2d9   : > { %v2698_v50 = vsel %vm374_vm2, %v6278_v49, %v6273_v24  ;;  %v2689_v56 = vsel %vm374_vm2, %v6277_v34, %v6272_v38 }
 0x2da   : > { %v7922_v63 = vmax.f32 %v2560_v53, %v2698_v50  ;;  %v7926_v2 = vmax.f32 %v2550_v11, %v2689_v56 }
 0x2dc   : > { %v6319_v48 = vpack.i.bf16 %v7922_v63, %v7926_v2 }
 0x2de   : > { %6320 = vrot.lane.b32.xlu1 %v6319_v48, %s6513_s19 }
 0x2f0   : > { %v6281_v55 = vpop.permute.xlu0 %6280 }
 0x2f1   : > { %v6283_v59 = vunpack.i.h.bf16 %v6281_v55  ;;  %v6282_v21 = vunpack.i.l.bf16 %v6281_v55 }
 0x2f2   : > { %v6286_v23 = vpop.permute.xlu1 %6285 }
 0x2f3   : > { %v2690_v30 = vsel %vm374_vm2, %v6272_v38, %v6282_v21  ;;  %v2691_v35 = vsel %vm374_vm2, %v6282_v21, %v6283_v59  ;;  %v6288_v17 = vunpack.i.h.bf16 %v6286_v23  ;;  %v6287_v53 = vunpack.i.l.bf16 %v6286_v23 }
 0x2f4   : > { %v7935_v0 = vmax.f32 %v2551_v37, %v2690_v30  ;;  %v7939_v11 = vmax.f32 %v2552_v9, %v2691_v35  ;;  %v6291_v62 = vpop.permute.xlu0 %6290 }
 0x2f5   : > { %v2699_v18 = vsel %vm374_vm2, %v6273_v24, %v6287_v53  ;;  %v2700_v32 = vsel %vm374_vm2, %v6287_v53, %v6288_v17  ;;  %v6293_v60 = vunpack.i.h.bf16 %v6291_v62  ;;  %v6292_v36 = vunpack.i.l.bf16 %v6291_v62 }
 0x2f6   : > { %v7945_v3 = vmax.f32 %v2561_v58, %v2699_v18  ;;  %v7949_v22 = vmax.f32 %v2562_v44, %v2700_v32  ;;  %v6324_v37 = vpack.i.bf16 %v7939_v11, %v7935_v0 }
 0x2f7   : > { %v2759_v57 = vmax.f32 %v2564_v8, %v6293_v60  ;;  %v2692_v9 = vsel %vm374_vm2, %v6283_v59, %v6292_v36  ;;  %v2701_v10 = vsel %vm374_vm2, %v6288_v17, %v6293_v60  ;;  %v2749_v29 = vmax.f32 %v2554_v46, %v6292_v36 }
 0x2f8   : > { %v7961_v31 = vmax.f32 %v2553_v26, %v2692_v9  ;;  %v7965_v58 = vmax.f32 %v2563_v1, %v2701_v10  ;;  %6325 = vrot.lane.b32.xlu0 %v6324_v37, %s6513_s19  ;;  %v6329_v39 = vpack.i.bf16 %v7949_v22, %v7945_v3  ;;  %vm3025_vm2 = vcmask 998400  }
 0x2f9   : > { %v6334_v41 = vpack.i.bf16 %v2759_v57, %v2749_v29 }
 0x2fa   : > { %6330 = vrot.lane.b32.xlu1 %v6329_v39, %s6513_s19  ;;  %v6339_v47 = vpack.i.bf16 %v7965_v58, %v7961_v31 }
 0x2fc   : > { %6335 = vrot.lane.b32.xlu0 %v6334_v41, %s6513_s19 }
 0x2fe   : > { %6340 = vrot.lane.b32.xlu1 %v6339_v47, %s6513_s19  ;;  %s6531_s19 = smov 58  }
 0x30b   : > { %v6296_v40 = vpop.permute.xlu1 %6295 }
 0x30c   : > { %v6298_v26 = vunpack.i.h.bf16 %v6296_v40  ;;  %v6297_v52 = vunpack.i.l.bf16 %v6296_v40 }
 0x30e   : > { %v2822_v8 = vsel %vm578_vm6, %v6297_v52, %v6298_v26 }
 0x30f   : > { %v2858_v13 = vmax.f32 %v7856_v45, %v2822_v8 }
 0x312   : > { %v6301_v44 = vpop.permute.xlu0 %6300  ;;  %v6311_v1 = vpop.permute.xlu1 %6310 }
 0x313   : > { %v6302_v46 = vunpack.i.l.bf16 %v6301_v44  ;;  %v6312_v49 = vunpack.i.l.bf16 %v6311_v1  ;;  %v6303_v6 = vunpack.i.h.bf16 %v6301_v44  ;;  %v6313_v12 = vunpack.i.h.bf16 %v6311_v1 }
 0x315   : > { %v2821_v54 = vsel %vm578_vm6, %v6302_v46, %v6297_v52  ;;  %v2832_v48 = vsel %vm578_vm6, %v6312_v49, %v6313_v12 }
 0x316   : > { %v6306_v51 = vpop.permute.xlu0 %6305  ;;  %v2857_v25 = vmax.f32 %v7873_v7, %v2821_v54 }
 0x317   : > { %v6308_v34 = vunpack.i.h.bf16 %v6306_v51  ;;  %v6307_v28 = vunpack.i.l.bf16 %v6306_v51 }
 0x319   : > { %v2831_v16 = vsel %vm578_vm6, %v6308_v34, %v6312_v49  ;;  %v2830_v61 = vsel %vm578_vm6, %v6303_v6, %v6308_v34  ;;  %v2823_v42 = vsel %vm578_vm6, %v6298_v26, %v6307_v28 }
 0x31a   : > { %v2867_v4 = vmax.f32 %v7890_v27, %v2831_v16  ;;  %v2866_v24 = vmax.f32 %v7885_v14, %v2830_v61  ;;  %v6316_v38 = vpop.permute.xlu0 %6315  ;;  %v2859_v59 = vmax.f32 %v7861_v20, %v2823_v42  ;;  %v2868_v14 = vmax.f32 %v7881_v5, %v2832_v48 }
 0x31b   : > { %v6318_v50 = vunpack.i.h.bf16 %v6316_v38  ;;  %v6317_v56 = vunpack.i.l.bf16 %v6316_v38 }
 0x31c   : > { %v7985_v55 = vpack.c.bf16 %v2867_v4, %v2858_v13  ;;  %v2875_v45 = vpack.c.bf16 %v2866_v24, %v2857_v25  ;;  %v8000_v20 = vpack.c.bf16 %v2868_v14, %v2859_v59 }
 0x31d   : > { %v2833_v21 = vsel %vm578_vm6, %v6313_v12, %v6318_v50  ;;  %v2824_v7 = vsel %vm578_vm6, %v6307_v28, %v6317_v56 }
 0x31e   : > { %v2869_v27 = vmax.f32 %v7877_v33, %v2833_v21  ;;  %v2860_v23 = vmax.f32 %v7900_v15, %v2824_v7  ;;  %2967 = vrot.lane.b32.xlu0 %v7985_v55, %s6512_s18  ;;  %2921 = vrot.lane.b32.xlu1 %v7985_v55, %s6509_s15 }
 0x31f   : > { %4158 = vmatprep.subr.bf16.mxu1 %v7985_v55 }
 0x320   : > { %v7998_v30 = vpack.c.bf16 %v2869_v27, %v2860_v23  ;;  %4159 = vmatpush1.bf16.msra.mxu1 %v2875_v45 }
 0x322   : > { %4260 = vmatprep.subr.bf16.mxu0 %v7998_v30  ;;  %2965 = vrot.lane.b32.xlu0 %v2875_v45, %s6512_s18 }
 0x323   : > { %2919 = vrot.lane.b32.xlu1 %v2875_v45, %s6509_s15  ;;  %4261 = vmatpush1.bf16.msra.mxu0 %v8000_v20 }
 0x326   : > { %3011 = vrot.lane.b32.xlu0 %v2875_v45, %s6529_s14 }
 0x327   : > { %3013 = vrot.lane.b32.xlu1 %v7985_v55, %s6529_s14 }
 0x32a   : > { %3153 = vrot.lane.b32.xlu0 %v7985_v55, %s9415_s21 }
 0x32b   : > { %3060 = vrot.lane.b32.xlu1 %v7985_v55, %s6530_s16 }
 0x32e   : > { %3151 = vrot.lane.b32.xlu0 %v2875_v45, %s9415_s21 }
 0x32f   : > { %3058 = vrot.lane.b32.xlu1 %v2875_v45, %s6530_s16 }
 0x332   : > { %3245 = vrot.lane.b32.xlu0 %v7985_v55, %s6531_s19 }
 0x333   : > { %3107 = vrot.lane.b32.xlu1 %v7985_v55, %s6518_s24 }
 0x336   : > { %3243 = vrot.lane.b32.xlu0 %v2875_v45, %s6531_s19 }
 0x337   : > { %3105 = vrot.lane.b32.xlu1 %v2875_v45, %s6518_s24 }
 0x33a   : > { %3349 = vrot.lane.b32.xlu0 %v7985_v55, %s6509_s15 }
 0x33b   : > { %3199 = vrot.lane.b32.xlu1 %v7985_v55, %s9410_s11 }
 0x33e   : > { %3441 = vrot.lane.b32.xlu0 %v7985_v55, %s6529_s14 }
 0x33f   : > { %3197 = vrot.lane.b32.xlu1 %v2875_v45, %s9410_s11 }
 0x342   : > { %3533 = vrot.lane.b32.xlu0 %v7985_v55, %s6518_s24 }
 0x343   : > { %3292 = vrot.lane.b32.xlu1 %v7985_v55, %s6532_s13 }
 0x346   : > { %3625 = vrot.lane.b32.xlu0 %v7985_v55, %s9410_s11 }
 0x347   : > { %3290 = vrot.lane.b32.xlu1 %v2875_v45, %s6532_s13 }
 0x34a   : > { %3717 = vrot.lane.b32.xlu0 %v7985_v55, %s6532_s13 }
 0x34b   : > { %3395 = vrot.lane.b32.xlu1 %v7985_v55, %s6512_s18 }
 0x34e   : > { %2923 = vrot.lane.b32.xlu0 %v8000_v20, %s6509_s15 }
 0x34f   : > { %3487 = vrot.lane.b32.xlu1 %v7985_v55, %s6530_s16 }
 0x350   : > { %v8043_v33 = vpop.permute.xlu1 %6320 }
 0x351   : > { %v6323_v5 = vunpack.i.h.bf16 %v8043_v33  ;;  %v6322_v15 = vunpack.i.l.bf16 %v8043_v33 }
 0x352   : > { %3015 = vrot.lane.b32.xlu0 %v8000_v20, %s6529_s14 }
 0x353   : > { %v2825_v35 = vsel %vm578_vm6, %v6317_v56, %v6322_v15  ;;  %v2834_v17 = vsel %vm578_vm6, %v6318_v50, %v6323_v5  ;;  %3579 = vrot.lane.b32.xlu1 %v7985_v55, %s9415_s21 }
 0x354   : > { %v2861_v53 = vmax.f32 %v7906_v19, %v2825_v35  ;;  %v2870_v62 = vmax.f32 %v7910_v43, %v2834_v17  ;;  %v8112_v19 = vld [vmem:[%s9381_s3 + $0x4] ss:$16 sps:$4 sm:$0xff]  }
 0x355   : > { %4190 = vmatprep.mubr.bf16.mxu1 %v8112_v19  ;;  %4292 = vmatprep.mubr.bf16.mxu0 %v8112_v19 }
 0x356   : > { %v8059_v18 = vpack.c.bf16 %v2870_v62, %v2861_v53  ;;  %3062 = vrot.lane.b32.xlu0 %v8000_v20, %s6530_s16 }
 0x357   : > { %3671 = vrot.lane.b32.xlu1 %v7985_v55, %s6531_s19 }
 0x35a   : > { %3109 = vrot.lane.b32.xlu0 %v8000_v20, %s6518_s24 }
 0x35b   : > { %2969 = vrot.lane.b32.xlu1 %v8000_v20, %s6512_s18 }
 0x35e   : > { %3201 = vrot.lane.b32.xlu0 %v8000_v20, %s9410_s11 }
 0x35f   : > { %3155 = vrot.lane.b32.xlu1 %v8000_v20, %s9415_s21 }
 0x362   : > { %3294 = vrot.lane.b32.xlu0 %v8000_v20, %s6532_s13 }
 0x363   : > { %3247 = vrot.lane.b32.xlu1 %v8000_v20, %s6531_s19 }
 0x366   : > { %3351 = vrot.lane.b32.xlu0 %v8000_v20, %s6509_s15 }
 0x367   : > { %3397 = vrot.lane.b32.xlu1 %v8000_v20, %s6512_s18 }
 0x36a   : > { %3443 = vrot.lane.b32.xlu0 %v8000_v20, %s6529_s14  ;;  %v8114_v43 = vpop.permute.xlu0 %6325 }
 0x36b   : > { %3489 = vrot.lane.b32.xlu1 %v8000_v20, %s6530_s16  ;;  %v6327_v34 = vunpack.i.l.bf16 %v8114_v43 }
 0x36c   : > { %v8116_v32 = vpop.permute.xlu1 %6330 }
 0x36d   : > { %v6332_v6 = vunpack.i.l.bf16 %v8116_v32  ;;  %v2826_v16 = vsel %vm578_vm6, %v6322_v15, %v6327_v34 }
 0x36e   : > { %3535 = vrot.lane.b32.xlu0 %v8000_v20, %s6518_s24  ;;  %v8128_v60 = vpop.permute.xlu0 %6335  ;;  %v2862_v42 = vmax.f32 %v7926_v2, %v2826_v16 }
 0x36f   : > { %3581 = vrot.lane.b32.xlu1 %v8000_v20, %s9415_s21  ;;  %v2835_v12 = vsel %vm578_vm6, %v6323_v5, %v6332_v6 }
 0x370   : > { %v8130_v36 = vpop.permute.xlu1 %6340  ;;  %v2871_v61 = vmax.f32 %v7922_v63, %v2835_v12 }
 0x372   : > { %3627 = vrot.lane.b32.xlu0 %v8000_v20, %s9410_s11  ;;  %v8234_v24 = vpack.c.bf16 %v2871_v61, %v2862_v42 }
 0x373   : > { %3673 = vrot.lane.b32.xlu1 %v8000_v20, %s6531_s19 }
 0x376   : > { %3719 = vrot.lane.b32.xlu0 %v8000_v20, %s6532_s13 }
 0x377   : > { %3821 = vrot.lane.b32.xlu1 %v8000_v20, %s6512_s18 }
 0x37a   : > { %3775 = vrot.lane.b32.xlu0 %v8000_v20, %s6509_s15 }
 0x37b   : > { %3913 = vrot.lane.b32.xlu1 %v8000_v20, %s6530_s16 }
 0x37e   : > { %3867 = vrot.lane.b32.xlu0 %v8000_v20, %s6529_s14 }
 0x37f   : > { %3353 = vrot.lane.b32.xlu1 %v7998_v30, %s6509_s15 }
 0x382   : > { %3399 = vrot.lane.b32.xlu0 %v7998_v30, %s6512_s18 }
 0x383   : > { %3445 = vrot.lane.b32.xlu1 %v7998_v30, %s6529_s14 }
 0x386   : > { %3491 = vrot.lane.b32.xlu0 %v7998_v30, %s6530_s16 }
 0x387   : > { %3537 = vrot.lane.b32.xlu1 %v7998_v30, %s6518_s24 }
 0x38a   : > { %3583 = vrot.lane.b32.xlu0 %v7998_v30, %s9415_s21 }
 0x38b   : > { %3629 = vrot.lane.b32.xlu1 %v7998_v30, %s9410_s11 }
 0x38e   : > { %3675 = vrot.lane.b32.xlu0 %v7998_v30, %s6531_s19 }
 0x38f   : > { %2927 = vrot.lane.b32.xlu1 %v8059_v18, %s6509_s15 }
 0x390   : > { %v8136_v37 = vpop.permute.xlu0 %2967  ;;  %v2922_v57 = vpop.permute.xlu1 %2921 }
 0x392   : > { %2925 = vrot.lane.b32.xlu0 %v7998_v30, %s6509_s15 }
 0x393   : > { %3721 = vrot.lane.b32.xlu1 %v7998_v30, %s6532_s13 }
 0x394   : > { %v8142_v9 = vpop.permute.xlu0 %2965 }
 0x395   : > { %v2920_v10 = vpop.permute.xlu1 %2919  ;;  %v2979_v33 = vsel %vm527_vm5, %v8142_v9, %v8136_v37 }
 0x396   : > { %2973 = vrot.lane.b32.xlu0 %v8059_v18, %s6512_s18  ;;  %v2933_v48 = vsel %vm425_vm4, %v2920_v10, %v2922_v57 }
 0x397   : > { %2971 = vrot.lane.b32.xlu1 %v7998_v30, %s6512_s18 }
 0x398   : > { %v8148_v29 = vpop.permute.xlu0 %3011 }
 0x399   : > { %v8150_v39 = vpop.permute.xlu1 %3013 }
 0x39a   : > { %3017 = vrot.lane.b32.xlu0 %v7998_v30, %s6529_s14  ;;  %v3026_v17 = vsel %vm3025_vm2, %v8148_v29, %v8150_v39 }
 0x39b   : > { %3019 = vrot.lane.b32.xlu1 %v8059_v18, %s6529_s14 }
 0x39c   : > { %v8156_v41 = vpop.permute.xlu0 %3153 }
 0x39d   : > { %v8158_v47 = vpop.permute.xlu1 %3060 }
 0x39e   : > { %3777 = vrot.lane.b32.xlu0 %v7998_v30, %s6509_s15 }
 0x39f   : > { %3779 = vrot.lane.b32.xlu1 %v8059_v18, %s6509_s15 }
 0x3a0   : > { %v8164_v40 = vpop.permute.xlu0 %3151 }
 0x3a1   : > { %v8166_v26 = vpop.permute.xlu1 %3058 }
 0x3a2   : > { %3066 = vrot.lane.b32.xlu0 %v8059_v18, %s6530_s16 }
 0x3a3   : > { %3064 = vrot.lane.b32.xlu1 %v7998_v30, %s6530_s16 }
 0x3a4   : > { %v8172_v52 = vpop.permute.xlu0 %3245 }
 0x3a5   : > { %v8174_v44 = vpop.permute.xlu1 %3107 }
 0x3a6   : > { %3825 = vrot.lane.b32.xlu0 %v8059_v18, %s6512_s18 }
 0x3a7   : > { %3823 = vrot.lane.b32.xlu1 %v7998_v30, %s6512_s18 }
 0x3a8   : > { %v8180_v1 = vpop.permute.xlu0 %3243 }
 0x3a9   : > { %v8182_v46 = vpop.permute.xlu1 %3105 }
 0x3aa   : > { %3111 = vrot.lane.b32.xlu0 %v7998_v30, %s6518_s24 }
 0x3ab   : > { %3113 = vrot.lane.b32.xlu1 %v8059_v18, %s6518_s24 }
 0x3ac   : > { %v8188_v8 = vpop.permute.xlu0 %3349 }
 0x3ad   : > { %v8190_v49 = vpop.permute.xlu1 %3199 }
 0x3ae   : > { %3869 = vrot.lane.b32.xlu0 %v7998_v30, %s6529_s14 }
 0x3af   : > { %3871 = vrot.lane.b32.xlu1 %v8059_v18, %s6529_s14 }
 0x3b0   : > { %v8196_v51 = vpop.permute.xlu0 %3441 }
 0x3b1   : > { %v8199_v54 = vpop.permute.xlu1 %3197 }
 0x3b2   : > { %3159 = vrot.lane.b32.xlu0 %v8059_v18, %s9415_s21 }
 0x3b3   : > { %3157 = vrot.lane.b32.xlu1 %v7998_v30, %s9415_s21 }
 0x3b4   : > { %v8206_v28 = vpop.permute.xlu0 %3533 }
 0x3b5   : > { %v8213_v13 = vpop.permute.xlu1 %3292 }
 0x3b6   : > { %3917 = vrot.lane.b32.xlu0 %v8059_v18, %s6530_s16 }
 0x3b7   : > { %3915 = vrot.lane.b32.xlu1 %v7998_v30, %s6530_s16 }
 0x3b8   : > { %v8225_v25 = vpop.permute.xlu0 %3625 }
 0x3b9   : > { %v8227_v4 = vpop.permute.xlu1 %3290 }
 0x3ba   : > { %3203 = vrot.lane.b32.xlu0 %v7998_v30, %s9410_s11 }
 0x3bb   : > { %3205 = vrot.lane.b32.xlu1 %v8059_v18, %s9410_s11 }
 0x3bc   : > { %v8236_v38 = vpop.permute.xlu0 %3717 }
 0x3bd   : > { %v8238_v50 = vpop.permute.xlu1 %3395 }
 0x3be   : > { %2929 = vrot.lane.b32.xlu0 %v8234_v24, %s6509_s15 }
 0x3bf   : > { %3251 = vrot.lane.b32.xlu1 %v8059_v18, %s6531_s19 }
 0x3c0   : > { %v8244_v63 = vpop.permute.xlu0 %2923 }
 0x3c1   : > { %v8246_v2 = vpop.permute.xlu1 %3487  ;;  %v2934_v56 = vsel %vm425_vm4, %v2922_v57, %v8244_v63  ;;  %v3073_v57 = vsel %vm3072_vm3, %v8166_v26, %v8158_v47 }
 0x3c2   : > { %3249 = vrot.lane.b32.xlu0 %v7998_v30, %s6531_s19  ;;  %4160 = vmatprep.subr.bf16.mxu1 %v2934_v56 }
 0x3c3   : > { %3298 = vrot.lane.b32.xlu1 %v8059_v18, %s6532_s13  ;;  %4161 = vmatpush1.bf16.msra.mxu1 %v2933_v48 }
 0x3c4   : > { %v8255_v45 = vpop.permute.xlu0 %3015 }
 0x3c5   : > { %v8257_v59 = vpop.permute.xlu1 %3579  ;;  %v3027_v15 = vsel %vm3025_vm2, %v8150_v39, %v8255_v45  ;;  %v3119_v39 = vsel %vm9440_vm14, %v8182_v46, %v8174_v44  ;;  %vm9448_vm14 = vmmov %vm9442_vm7 }
 0x3c6   : > { %2975 = vrot.lane.b32.xlu0 %v8234_v24, %s6512_s18 }
 0x3c7   : > { %3357 = vrot.lane.b32.xlu1 %v8234_v24, %s6509_s15 }
 0x3c8   : > { %v8263_v21 = vpop.permute.xlu0 %3062 }
 0x3c9   : > { %v8265_v7 = vpop.permute.xlu1 %3671  ;;  %v3074_v62 = vsel %vm3072_vm3, %v8158_v47, %v8263_v21 }
 0x3ca   : > { %3296 = vrot.lane.b32.xlu0 %v7998_v30, %s6532_s13 }
 0x3cb   : > { %3403 = vrot.lane.b32.xlu1 %v8234_v24, %s6512_s18 }
 0x3cc   : > { %v8271_v27 = vpop.permute.xlu0 %3109 }
 0x3cd   : > { %v8273_v23 = vpop.permute.xlu1 %2969  ;;  %v3120_v10 = vsel %vm9439_vm13, %v8174_v44, %v8271_v27  ;;  %v3165_v44 = vsel %vm9442_vm7, %v8164_v40, %v8156_v41  ;;  %vm9447_vm13 = vmmov %vm9442_vm7 }
 0x3ce   : > { %3021 = vrot.lane.b32.xlu0 %v8234_v24, %s6529_s14  ;;  %v2980_v14 = vsel %vm527_vm5, %v8136_v37, %v8273_v23  ;;  %vm9450_vm7 = vmmov %vm9443_vm8 }
 0x3cf   : > { %3161 = vrot.lane.b32.xlu1 %v8234_v24, %s9415_s21  ;;  %4162 = vmatprep.subr.bf16.mxu1 %v2980_v14 }
 0x3d0   : > { %4163 = vmatpush1.bf16.msra.mxu1 %v2979_v33  ;;  %v8285_v5 = vpop.permute.xlu0 %3201  ;;  %v6333_v33 = vunpack.i.h.bf16 %v8116_v32 }
 0x3d1   : > { %v8290_v35 = vpop.permute.xlu1 %3155  ;;  %4164 = vmatprep.subr.bf16.mxu1 %v3027_v15  ;;  %v3212_v16 = vsel %vm9443_vm8, %v8190_v49, %v8285_v5 }
 0x3d2   : > { %3068 = vrot.lane.b32.xlu0 %v8234_v24, %s6530_s16  ;;  %v3166_v26 = vsel %vm9441_vm15, %v8156_v41, %v8290_v35  ;;  %v3211_v41 = vsel %vm9444_vm10, %v8199_v54, %v8190_v49  ;;  %v3258_v49 = vsel %vm3257_vm9, %v8180_v1, %v8172_v52  ;;  %v6328_v1 = vunpack.i.h.bf16 %v8114_v43  ;;  %vm9449_vm15 = vmmov %vm9443_vm8 }
 0x3d3   : > { %3447 = vrot.lane.b32.xlu1 %v8059_v18, %s6529_s14  ;;  %vm4151_vm8 = vcmask 130048   ;;  %vm9451_vm10 = vmmov %vm9446_vm0 }
 0x3d4   : > { %4165 = vmatpush1.bf16.msra.mxu1 %v3026_v17  ;;  %v8299_v53 = vpop.permute.xlu0 %3294 }
 0x3d5   : > { %v8304_v37 = vpop.permute.xlu1 %3247  ;;  %4166 = vmatprep.subr.bf16.mxu1 %v3074_v62  ;;  %v3306_v48 = vsel %vm3304_vm11, %v8213_v13, %v8299_v53  ;;  %v2836_v62 = vsel %vm578_vm6, %v6332_v6, %v6333_v33 }
 0x3d6   : > { %3355 = vrot.lane.b32.xlu0 %v8059_v18, %s6509_s15  ;;  %v3259_v42 = vsel %vm3257_vm9, %v8172_v52, %v8304_v37  ;;  %v3305_v52 = vsel %vm3304_vm11, %v8227_v4, %v8213_v13  ;;  %v2827_v13 = vsel %vm578_vm6, %v6327_v34, %v6328_v1 }
 0x3d7   : > { %3207 = vrot.lane.b32.xlu1 %v8234_v24, %s9410_s11 }
 0x3d8   : > { %4167 = vmatpush1.bf16.msra.mxu1 %v3073_v57  ;;  %v3352_v9 = vpop.permute.xlu0 %3351  ;;  %v2872_v57 = vmax.f32 %v7945_v3, %v2836_v62 }
 0x3d9   : > { %v8316_v29 = vpop.permute.xlu1 %3397  ;;  %4168 = vmatprep.subr.bf16.mxu1 %v3120_v10 }
 0x3da   : > { %3115 = vrot.lane.b32.xlu0 %v8234_v24, %s6518_s24 }
 0x3db   : > { %3493 = vrot.lane.b32.xlu1 %v8059_v18, %s6530_s16 }
 0x3dc   : > { %4169 = vmatpush1.bf16.msra.mxu1 %v3119_v39  ;;  %v8325_v47 = vpop.permute.xlu0 %3443  ;;  %v2863_v39 = vmax.f32 %v7935_v0, %v2827_v13  ;;  %v3409_v0 = vsel %vm527_vm5, %v8238_v50, %v8316_v29 }
 0x3dd   : > { %v8330_v12 = vpop.permute.xlu1 %3489  ;;  %4170 = vmatprep.subr.bf16.mxu1 %v3166_v26  ;;  %v3455_v50 = vsel %vm3025_vm2, %v8196_v51, %v8325_v47 }
 0x3de   : > { %3401 = vrot.lane.b32.xlu0 %v8059_v18, %s6512_s18  ;;  %v8419_v3 = vpack.c.bf16 %v2872_v57, %v2863_v39  ;;  %v3501_v51 = vsel %vm3072_vm3, %v8246_v2, %v8330_v12 }
 0x3df   : > { %3253 = vrot.lane.b32.xlu1 %v8234_v24, %s6531_s19 }
 0x3e0   : > { %4171 = vmatpush1.bf16.msra.mxu1 %v3165_v44  ;;  %v8339_v46 = vpop.permute.xlu0 %3535 }
 0x3e1   : > { %v8344_v61 = vpop.permute.xlu1 %3581  ;;  %4172 = vmatprep.subr.bf16.mxu1 %v3212_v16  ;;  %v3547_v2 = vsel %vm9446_vm0, %v8206_v28, %v8339_v46 }
 0x3e2   : > { %3449 = vrot.lane.b32.xlu0 %v8234_v24, %s6529_s14  ;;  %v3593_v39 = vsel %vm9448_vm14, %v8257_v59, %v8344_v61  ;;  %vm9455_vm14 = vmmov %vm9450_vm7 }
 0x3e3   : > { %3539 = vrot.lane.b32.xlu1 %v8059_v18, %s6518_s24 }
 0x3e4   : > { %4173 = vmatpush1.bf16.msra.mxu1 %v3211_v41  ;;  %v8353_v40 = vpop.permute.xlu0 %3627 }
 0x3e5   : > { %v8358_v56 = vpop.permute.xlu1 %3673  ;;  %4174 = vmatprep.subr.bf16.mxu1 %v3259_v42 }
 0x3e6   : > { %3495 = vrot.lane.b32.xlu0 %v8234_v24, %s6530_s16 }
 0x3e7   : > { %3300 = vrot.lane.b32.xlu1 %v8234_v24, %s6532_s13 }
 0x3e8   : > { %4175 = vmatpush1.bf16.msra.mxu1 %v3258_v49  ;;  %v8367_v54 = vpop.permute.xlu0 %3719 }
 0x3e9   : > { %v8372_v14 = vpop.permute.xlu1 %3821  ;;  %4176 = vmatprep.subr.bf16.mxu1 %v3306_v48 }
 0x3ea   : > { %3541 = vrot.lane.b32.xlu0 %v8234_v24, %s6518_s24 }
 0x3eb   : > { %3585 = vrot.lane.b32.xlu1 %v8059_v18, %s9415_s21 }
 0x3ec   : > { %4177 = vmatpush1.bf16.msra.mxu1 %v3305_v52  ;;  %v8383_v15 = vpop.permute.xlu0 %3775  ;;  %v3949_v52 = vld [vmem:[%s9381_s3 + $0x20] sm:$0xff] }
 0x3ed   : > { %v8385_v17 = vpop.permute.xlu1 %3913  ;;  %4178 = vmatprep.subr.bf16.mxu1 %v8000_v20 }
 0x3ee   : > { %3587 = vrot.lane.b32.xlu0 %v8234_v24, %s9415_s21 }
 0x3ef   : > { %3631 = vrot.lane.b32.xlu1 %v8059_v18, %s9410_s11 }
 0x3f0   : > { %4179 = vmatpush1.bf16.msra.mxu1 %v7985_v55  ;;  %v8403_v4 = vpop.permute.xlu0 %3867  ;;  %v3363_v55 = vsel %vm425_vm4, %v8188_v8, %v3352_v9 }
 0x3f1   : > { %v8406_v10 = vpop.permute.xlu1 %3353 }
 0x3f2   : > { %3633 = vrot.lane.b32.xlu0 %v8234_v24, %s9410_s11  ;;  %v3364_v6 = vsel %vm425_vm4, %v3352_v9, %v8406_v10 }
 0x3f3   : > { %3677 = vrot.lane.b32.xlu1 %v8059_v18, %s6531_s19  ;;  %4180 = vmatprep.subr.bf16.mxu1 %v3364_v6 }
 0x3f4   : > { %4181 = vmatpush1.bf16.msra.mxu1 %v3363_v55  ;;  %v8417_v34 = vpop.permute.xlu0 %3399 }
 0x3f5   : > { %v8421_v26 = vpop.permute.xlu1 %3445  ;;  %v3410_v44 = vsel %vm527_vm5, %v8316_v29, %v8417_v34 }
 0x3f6   : > { %3679 = vrot.lane.b32.xlu0 %v8234_v24, %s6531_s19  ;;  %4182 = vmatprep.subr.bf16.mxu1 %v3410_v44  ;;  %v3456_v9 = vsel %vm3025_vm2, %v8325_v47, %v8421_v26 }
 0x3f7   : > { %2931 = vrot.lane.b32.xlu1 %v8419_v3, %s6509_s15 }
 0x3f8   : > { %4183 = vmatpush1.bf16.msra.mxu1 %v3409_v0  ;;  %v8433_v8 = vpop.permute.xlu0 %3491 }
 0x3f9   : > { %v8438_v16 = vpop.permute.xlu1 %3537  ;;  %4184 = vmatprep.subr.bf16.mxu1 %v3456_v9  ;;  %v3502_v41 = vsel %vm3072_vm3, %v8330_v12, %v8433_v8  ;;  %v8481_v12 = vld [vmem:[%s9381_s3] ss:$16 sps:$4 sm:$0xff]  }
 0x3fa   : > { %3725 = vrot.lane.b32.xlu0 %v8234_v24, %s6532_s13  ;;  %v3548_v49 = vsel %vm9445_vm12, %v8339_v46, %v8438_v16  ;;  %v8492_v46 = vcombine.high %v3949_v52, %v3949_v52  ;;  %vm9452_vm12 = vmmov %vm9446_vm0 }
 0x3fb   : > { %2977 = vrot.lane.b32.xlu1 %v8419_v3, %s6512_s18  ;;  %vm9453_vm0 = vmmov %vm9447_vm13 }
 0x3fc   : > { %4185 = vmatpush1.bf16.msra.mxu1 %v3455_v50  ;;  %v8447_v29 = vpop.permute.xlu0 %3583 }
 0x3fd   : > { %v8452_v42 = vpop.permute.xlu1 %3629  ;;  %4186 = vmatprep.subr.bf16.mxu1 %v3502_v41  ;;  %v3594_v13 = vsel %vm9447_vm13, %v8344_v61, %v8447_v29  ;;  %v3639_v61 = vsel %vm9450_vm7, %v8225_v25, %v8353_v40  ;;  %vm9454_vm13 = vmmov %vm9453_vm0 }
 0x3fe   : > { %3163 = vrot.lane.b32.xlu0 %v8419_v3, %s9415_s21 }
 0x3ff   : > { %3023 = vrot.lane.b32.xlu1 %v8419_v3, %s6529_s14 }
 0x400   : > { %4187 = vmatpush1.bf16.msra.mxu1 %v3501_v51  ;;  %v8461_v47 = vpop.permute.xlu0 %3675  ;;  %v8526_v51 = vcombine.low %v3949_v52, %v3949_v52 }
 0x401   : > { %v8466_v48 = vpop.permute.xlu1 %2927  ;;  %4188 = vmatprep.subr.bf16.mxu1 %v3548_v49  ;;  %v3686_v50 = vsel %vm3257_vm9, %v8358_v56, %v8461_v47 }
 0x402   : > { %3209 = vrot.lane.b32.xlu0 %v8419_v3, %s9410_s11 }
 0x403   : > { %3070 = vrot.lane.b32.xlu1 %v8419_v3, %s6530_s16 }
 0x404   : > { %4189 = vmatpush1.bf16.msra.mxu1 %v3547_v2  ;;  %v2926_v62 = vpop.permute.xlu0 %2925  ;;  %v6343_v2 = vunpack.i.h.bf16 %v8130_v36 }
 0x405   : > { %v8486_v57 = vpop.permute.xlu1 %3721  ;;  %4209 = vmatprep.subr.bf16.mxu1 %v3594_v13  ;;  %v2936_v6 = vsel %vm425_vm4, %v2926_v62, %v8466_v48  ;;  %v2935_v28 = vsel %vm425_vm4, %v8244_v63, %v2926_v62  ;;  %v3640_v63 = vsel %vm9449_vm15, %v8353_v40, %v8452_v42  ;;  %v8535_v40 = vld [vmem:[%s9381_s3 + $0xc] ss:$16 sps:$4 sm:$0xff]   ;;  %v6342_v62 = vunpack.i.l.bf16 %v8130_v36  ;;  %vm9456_vm15 = vmmov %vm9450_vm7 }
 0x406   : > { %3255 = vrot.lane.b32.xlu0 %v8419_v3, %s6531_s19  ;;  %4262 = vmatprep.subr.bf16.mxu0 %v2936_v6  ;;  %v3732_v52 = vsel %vm3304_vm11, %v8367_v54, %v8486_v57 }
 0x407   : > { %3117 = vrot.lane.b32.xlu1 %v8419_v3, %s6518_s24  ;;  %4191 = vmatmul.mubr.bf16.vlgmr.msra.gmra.mrb[8].mxu1 %v8481_v12  ;;  %v2828_v6 = vsel %vm578_vm6, %v6328_v1, %v6342_v62 }
 0x408   : > { %4210 = vmatpush1.bf16.msra.mxu1 %v3593_v39  ;;  %4263 = vmatpush1.bf16.msra.mxu0 %v2935_v28  ;;  %v8502_v55 = vpop.permute.xlu0 %2973  ;;  %v2837_v28 = vsel %vm578_vm6, %v6333_v33, %v6343_v2  ;;  %v2864_v32 = vmax.f32 %v7939_v11, %v2828_v6  ;;  %v8645_v6 = vld [vmem:[%s9381_s3 + $0x8] ss:$16 sps:$4 sm:$0xff]  }
 0x409   : > { %v2972_v44 = vpop.permute.xlu1 %2971  ;;  %4211 = vmatprep.subr.bf16.mxu1 %v3640_v63  ;;  %4200 = vmatprep.mubr.bf16.mxu1 %v8492_v46 }
 0x40a   : > { %3302 = vrot.lane.b32.xlu0 %v8419_v3, %s6532_s13  ;;  %v2982_v0 = vsel %vm527_vm5, %v2972_v44, %v8502_v55  ;;  %v2981_v59 = vsel %vm527_vm5, %v8273_v23, %v2972_v44 }
 0x40b   : > { %3723 = vrot.lane.b32.xlu1 %v8059_v18, %s6532_s13  ;;  %4264 = vmatprep.subr.bf16.mxu0 %v2982_v0 }
 0x40c   : > { %4212 = vmatpush1.bf16.msra.mxu1 %v3639_v61  ;;  %4265 = vmatpush1.bf16.msra.mxu0 %v2981_v59  ;;  %v3018_v9 = vpop.permute.xlu0 %3017 }
 0x40d   : > { %v8522_v41 = vpop.permute.xlu1 %3019  ;;  %4213 = vmatprep.subr.bf16.mxu1 %v3686_v50  ;;  %v3028_v23 = vsel %vm3025_vm2, %v8255_v45, %v3018_v9  ;;  %v3685_v45 = vsel %vm3257_vm9, %v8265_v7, %v8358_v56  ;;  %v3731_v7 = vsel %vm3304_vm11, %v8236_v38, %v8367_v54  ;;  %v2873_v54 = vmax.f32 %v7949_v22, %v2837_v28 }
 0x40e   : > { %3783 = vrot.lane.b32.xlu0 %v8419_v3, %s6509_s15  ;;  %v3029_v25 = vsel %vm3025_vm2, %v3018_v9, %v8522_v41 }
 0x40f   : > { %3781 = vrot.lane.b32.xlu1 %v8234_v24, %s6509_s15  ;;  %4266 = vmatprep.subr.bf16.mxu0 %v3029_v25  ;;  %v8593_v22 = vpack.c.bf16 %v2873_v54, %v2864_v32 }
 0x410   : > { %4214 = vmatpush1.bf16.msra.mxu1 %v3685_v45  ;;  %4267 = vmatpush1.bf16.msra.mxu0 %v3028_v23  ;;  %v3778_v49 = vpop.permute.xlu0 %3777 }
 0x411   : > { %v8547_v13 = vpop.permute.xlu1 %3779  ;;  %4215 = vmatprep.subr.bf16.mxu1 %v3732_v52  ;;  %4201 = vmatmul.mubr.bf16.gmra.mrb[12].mxu1 %v8526_v51  ;;  %v3789_v11 = vsel %vm425_vm4, %v8383_v15, %v3778_v49 }
 0x412   : > { %3829 = vrot.lane.b32.xlu0 %v8419_v3, %s6512_s18  ;;  %5994 = vmatprep.mubr.msk.bf16.mxu1 %vm4151_vm8, %v8535_v40  ;;  %v3790_v1 = vsel %vm425_vm4, %v3778_v49, %v8547_v13 }
 0x413   : > { %3827 = vrot.lane.b32.xlu1 %v8234_v24, %s6512_s18 }
 0x414   : > { %4216 = vmatpush1.bf16.msra.mxu1 %v3731_v7  ;;  %v8559_v56 = vpop.permute.xlu0 %3066 }
 0x415   : > { %v3065_v39 = vpop.permute.xlu1 %3064  ;;  %4217 = vmatprep.subr.bf16.mxu1 %v7998_v30 }
 0x416   : > { %3875 = vrot.lane.b32.xlu0 %v8419_v3, %s6529_s14  ;;  %v3076_v38 = vsel %vm3072_vm3, %v3065_v39, %v8559_v56  ;;  %v3075_v43 = vsel %vm3072_vm3, %v8263_v21, %v3065_v39 }
 0x417   : > { %3873 = vrot.lane.b32.xlu1 %v8234_v24, %s6529_s14  ;;  %4268 = vmatprep.subr.bf16.mxu0 %v3076_v38 }
 0x418   : > { %4218 = vmatpush1.bf16.msra.mxu1 %v8000_v20  ;;  %4269 = vmatpush1.bf16.msra.mxu0 %v3075_v43  ;;  %v8583_v33 = vpop.permute.xlu0 %3825 }
 0x419   : > { %v3824_v63 = vpop.permute.xlu1 %3823  ;;  %4219 = vmatprep.subr.bf16.mxu1 %v3790_v1 }
 0x41a   : > { %3921 = vrot.lane.b32.xlu0 %v8419_v3, %s6530_s16  ;;  %v3836_v21 = vsel %vm527_vm5, %v3824_v63, %v8583_v33  ;;  %v3835_v15 = vsel %vm527_vm5, %v8372_v14, %v3824_v63 }
 0x41b   : > { %3919 = vrot.lane.b32.xlu1 %v8234_v24, %s6530_s16 }
 0x41c   : > { %4220 = vmatpush1.bf16.msra.mxu1 %v3789_v11  ;;  %v3112_v20 = vpop.permute.xlu0 %3111 }
 0x41d   : > { %v8597_v44 = vpop.permute.xlu1 %3113  ;;  %4221 = vmatprep.subr.bf16.mxu1 %v3836_v21  ;;  %v3121_v0 = vsel %vm9451_vm10, %v8271_v27, %v3112_v20  ;;  %v6338_v21 = vunpack.i.h.bf16 %v8128_v60 }
 0x41e   : > { %3361 = vrot.lane.b32.xlu0 %v8593_v22, %s6509_s15  ;;  %v3122_v59 = vsel %vm9452_vm12, %v3112_v20, %v8597_v44  ;;  %vm9460_vm12 = vmmov %vm9453_vm0 }
 0x41f   : > { %3359 = vrot.lane.b32.xlu1 %v8419_v3, %s6509_s15  ;;  %4270 = vmatprep.subr.bf16.mxu0 %v3122_v59 }
 0x420   : > { %4222 = vmatpush1.bf16.msra.mxu1 %v3835_v15  ;;  %4271 = vmatpush1.bf16.msra.mxu0 %v3121_v0  ;;  %v3870_v61 = vpop.permute.xlu0 %3869  ;;  %v6337_v0 = vunpack.i.l.bf16 %v8128_v60  ;;  %v2838_v15 = vsel %vm578_vm6, %v6343_v2, %v6338_v21 }
 0x421   : > { %v8609_v9 = vpop.permute.xlu1 %3871  ;;  %v3881_v27 = vsel %vm3025_vm2, %v8403_v4, %v3870_v61 }
 0x422   : > { %3407 = vrot.lane.b32.xlu0 %v8593_v22, %s6512_s18  ;;  %v3882_v50 = vsel %vm3025_vm2, %v3870_v61, %v8609_v9 }
 0x423   : > { %3405 = vrot.lane.b32.xlu1 %v8419_v3, %s6512_s18  ;;  %4223 = vmatprep.subr.bf16.mxu1 %v3882_v50 }
 0x424   : > { %4224 = vmatpush1.bf16.msra.mxu1 %v3881_v27  ;;  %v8619_v14 = vpop.permute.xlu0 %3159 }
 0x425   : > { %v3158_v23 = vpop.permute.xlu1 %3157 }
 0x426   : > { %3453 = vrot.lane.b32.xlu0 %v8593_v22, %s6529_s14  ;;  %v3168_v4 = vsel %vm9453_vm0, %v3158_v23, %v8619_v14  ;;  %v3167_v25 = vsel %vm9454_vm13, %v8290_v35, %v3158_v23  ;;  %v3950_v35 = vld [vmem:[%s9381_s3 + $0x28] sm:$0xff] }
 0x427   : > { %3451 = vrot.lane.b32.xlu1 %v8419_v3, %s6529_s14  ;;  %4272 = vmatprep.subr.bf16.mxu0 %v3168_v4 }
 0x428   : > { %4273 = vmatpush1.bf16.msra.mxu0 %v3167_v25  ;;  %v8629_v45 = vpop.permute.xlu0 %3917 }
 0x429   : > { %v3916_v49 = vpop.permute.xlu1 %3915 }
 0x42a   : > { %3499 = vrot.lane.b32.xlu0 %v8593_v22, %s6530_s16  ;;  %v3928_v52 = vsel %vm3072_vm3, %v3916_v49, %v8629_v45  ;;  %v3927_v7 = vsel %vm3072_vm3, %v8385_v17, %v3916_v49  ;;  %v8650_v17 = vcombine.high %v3950_v35, %v3950_v35 }
 0x42b   : > { %3497 = vrot.lane.b32.xlu1 %v8419_v3, %s6530_s16  ;;  %4225 = vmatprep.subr.bf16.mxu1 %v3928_v52 }
 0x42c   : > { %4226 = vmatpush1.bf16.msra.mxu1 %v3927_v7  ;;  %v3204_v28 = vpop.permute.xlu0 %3203 }
 0x42d   : > { %v8647_v39 = vpop.permute.xlu1 %3205  ;;  %4362 = vmatprep.subr.bf16.mxu1 %v8234_v24  ;;  %v3213_v43 = vsel %vm9456_vm15, %v8285_v5, %v3204_v28  ;;  %v8672_v5 = vcombine.low %v3950_v35, %v3950_v35  ;;  %v4102_v35 = vld [vmem:[%s9382_s4 + $0x8] sm:$0xff] }
 0x42e   : > { %3545 = vrot.lane.b32.xlu0 %v8593_v22, %s6518_s24  ;;  %v3214_v38 = vsel %vm9455_vm14, %v3204_v28, %v8647_v39  ;;  %v4101_v28 = vld [vmem:[%s9382_s4] sm:$0xff] }
 0x42f   : > { %3543 = vrot.lane.b32.xlu1 %v8419_v3, %s6518_s24  ;;  %4242 = vmatmul.mubr.bf16.vlgmr.msra.gmra.mrb[8].mxu1 %v8645_v6 }
 0x430   : > { %4274 = vmatprep.subr.bf16.mxu0 %v3214_v38  ;;  %4363 = vmatpush1.bf16.msra.mxu1 %v8059_v18  ;;  %v8662_v32 = vpop.permute.xlu0 %2929 }
 0x431   : > { %4275 = vmatpush1.bf16.msra.mxu0 %v3213_v43  ;;  %v8664_v54 = vpop.permute.xlu1 %3251  ;;  %5995 = vmatprep.mubr.msk.bf16.mxu1 %vm4151_vm8, %v8650_v17 }
 0x432   : > { %3591 = vrot.lane.b32.xlu0 %v8593_v22, %s9415_s21 }
 0x433   : > { %3589 = vrot.lane.b32.xlu1 %v8419_v3, %s9415_s21 }
 0x434   : > { %v3250_v1 = vpop.permute.xlu0 %3249 }
 0x435   : > { %v8674_v63 = vpop.permute.xlu1 %3298  ;;  %v3261_v11 = vsel %vm3257_vm9, %v3250_v1, %v8664_v54  ;;  %v3260_v20 = vsel %vm3257_vm9, %v8304_v37, %v3250_v1  ;;  %v2829_v37 = vsel %vm578_vm6, %v6342_v62, %v6337_v0  ;;  %vm9457_vm6 = vmmov %vm9451_vm10 }
 0x436   : > { %3637 = vrot.lane.b32.xlu0 %v8593_v22, %s9410_s11  ;;  %4276 = vmatprep.subr.bf16.mxu0 %v3261_v11  ;;  %v2865_v60 = vmax.f32 %v7961_v31, %v2829_v37  ;;  %vm9458_vm7 = vmmov %vm9457_vm6 }
 0x437   : > { %3635 = vrot.lane.b32.xlu1 %v8419_v3, %s9410_s11  ;;  %4252 = vmatmul.mubr.bf16.gmra.mrb[12].mxu1 %v8672_v5  ;;  %vm9459_vm10 = vmmov %vm9453_vm0  ;;  %s5843_s11 = sshll.u32 %s9491_s10, 1 }
 0x438   : > { %4277 = vmatpush1.bf16.msra.mxu0 %v3260_v20  ;;  %v8687_v59 = vpop.permute.xlu0 %2975  ;;  %4394 = vmatprep.mubr.bf16.mxu1 %v8112_v19  ;;  %v2874_v19 = vmax.f32 %v7965_v58, %v2838_v15  ;;  %v4103_v20 = vld [vmem:[%s9382_s4 + $0x10] sm:$0xff]  ;;  %vm9461_vm0 = vmmov %vm9455_vm14  ;;  %s330_s22 = scalar_lea.vmem %s9387_s9, %s5843_s11 }
 0x439   : > { %v8696_v61 = vpop.permute.xlu1 %3357  ;;  %vm9462_vm13 = vmmov %vm9461_vm0 }
 0x43a   : > { %3683 = vrot.lane.b32.xlu0 %v8593_v22, %s6531_s19  ;;  %v2883_v58 = vpack.c.bf16 %v2874_v19, %v2865_v60  ;;  %vm9463_vm14 = vmmov %vm9457_vm6 }
 0x43b   : > { %3681 = vrot.lane.b32.xlu1 %v8419_v3, %s6531_s19  ;;  %vm9464_vm15 = vmmov %vm9457_vm6 }
 0x43c   : > { %v3297_v27 = vpop.permute.xlu0 %3296 }
 0x43d   : > { %v8704_v50 = vpop.permute.xlu1 %3403  ;;  %v3308_v36 = vsel %vm3304_vm11, %v3297_v27, %v8674_v63  ;;  %v3307_v2 = vsel %vm3304_vm11, %v8299_v53, %v3297_v27 }
 0x43e   : > { %3729 = vrot.lane.b32.xlu0 %v8593_v22, %s6532_s13  ;;  %4278 = vmatprep.subr.bf16.mxu0 %v3308_v36 }
 0x43f   : > { %3727 = vrot.lane.b32.xlu1 %v8419_v3, %s6532_s13  ;;  %4279 = vmatpush1.bf16.msra.mxu0 %v3307_v2 }
 0x440   : > { %v8714_v31 = vpop.permute.xlu0 %3021  ;;  %4280 = vmatprep.subr.bf16.mxu0 %v8059_v18 }
 0x441   : > { %v8717_v62 = vpop.permute.xlu1 %3161 }
 0x442   : > { %3787 = vrot.lane.b32.xlu0 %v2883_v58, %s6509_s15 }
 0x443   : > { %3785 = vrot.lane.b32.xlu1 %v8593_v22, %s6509_s15  ;;  %4281 = vmatpush1.bf16.msra.mxu0 %v7998_v30 }
 0x444   : > { %v8723_v53 = vpop.permute.xlu0 %3068 }
 0x445   : > { %v3448_v23 = vpop.permute.xlu1 %3447 }
 0x446   : > { %3833 = vrot.lane.b32.xlu0 %v2883_v58, %s6512_s18  ;;  %v3457_v37 = vsel %vm3025_vm2, %v8421_v26, %v3448_v23 }
 0x447   : > { %3831 = vrot.lane.b32.xlu1 %v8593_v22, %s6512_s18 }
 0x448   : > { %v3356_v4 = vpop.permute.xlu0 %3355 }
 0x449   : > { %v8728_v25 = vpop.permute.xlu1 %3207  ;;  %v3366_v49 = vsel %vm425_vm4, %v3356_v4, %v8696_v61  ;;  %v3365_v52 = vsel %vm425_vm4, %v8406_v10, %v3356_v4 }
 0x44a   : > { %3879 = vrot.lane.b32.xlu0 %v2883_v58, %s6529_s14  ;;  %4282 = vmatprep.subr.bf16.mxu0 %v3366_v49 }
 0x44b   : > { %3877 = vrot.lane.b32.xlu1 %v8593_v22, %s6529_s14  ;;  %4283 = vmatpush1.bf16.msra.mxu0 %v3365_v52 }
 0x44c   : > { %v8737_v30 = vpop.permute.xlu0 %3115 }
 0x44d   : > { %v3494_v7 = vpop.permute.xlu1 %3493 }
 0x44e   : > { %3925 = vrot.lane.b32.xlu0 %v2883_v58, %s6530_s16  ;;  %v3503_v19 = vsel %vm3072_vm3, %v8433_v8, %v3494_v7 }
 0x44f   : > { %3923 = vrot.lane.b32.xlu1 %v8593_v22, %s6530_s16 }
 0x450   : > { %v3402_v10 = vpop.permute.xlu0 %3401 }
 0x451   : > { %v8748_v38 = vpop.permute.xlu1 %3253  ;;  %v3412_v43 = vsel %vm527_vm5, %v3402_v10, %v8704_v50  ;;  %v3411_v1 = vsel %vm527_vm5, %v8417_v34, %v3402_v10 }
 0x452   : > { %4111 = vperm.xlu0 %6242, %v4102_v35   ;;  %4284 = vmatprep.subr.bf16.mxu0 %v3412_v43 }
 0x453   : > { %4106 = vperm.xlu1 %6243, %v4101_v28   ;;  %4285 = vmatpush1.bf16.msra.mxu0 %v3411_v1 }
 0x454   : > { %v8754_v11 = vpop.permute.xlu0 %3449 }
 0x455   : > { %v3540_v21 = vpop.permute.xlu1 %3539  ;;  %v3458_v0 = vsel %vm3025_vm2, %v3448_v23, %v8754_v11 }
 0x456   : > { %4286 = vmatprep.subr.bf16.mxu0 %v3458_v0  ;;  %v3549_v2 = vsel %vm9458_vm7, %v8438_v16, %v3540_v21 }
 0x457   : > { %4116 = vperm.xlu1 %6243, %v4103_v20   ;;  %4287 = vmatpush1.bf16.msra.mxu0 %v3457_v37 }
 0x458   : > { %v8763_v34 = vpop.permute.xlu0 %3495 }
 0x459   : > { %v8765_v15 = vpop.permute.xlu1 %3300  ;;  %v3504_v60 = vsel %vm3072_vm3, %v3494_v7, %v8763_v34 }
 0x45a   : > { %4288 = vmatprep.subr.bf16.mxu0 %v3504_v60 }
 0x45b   : > { %4289 = vmatpush1.bf16.msra.mxu0 %v3503_v19 }
 0x45c   : > { %v8771_v27 = vpop.permute.xlu0 %3541 }
 0x45d   : > { %v3586_v36 = vpop.permute.xlu1 %3585  ;;  %v3550_v26 = vsel %vm9457_vm6, %v3540_v21, %v8771_v27  ;;  %vm9465_vm6 = vmmov %vm9459_vm10 }
 0x45e   : > { %4290 = vmatprep.subr.bf16.mxu0 %v3550_v26  ;;  %v3595_v8 = vsel %vm9460_vm12, %v8447_v29, %v3586_v36  ;;  %vm9466_vm7 = vmmov %vm9465_vm6 }
 0x45f   : > { %4291 = vmatpush1.bf16.msra.mxu0 %v3549_v2  ;;  %vm9468_vm12 = vmmov %vm9461_vm0 }
 0x460   : > { %v8777_v58 = vpop.permute.xlu0 %3587 }
 0x461   : > { %v3632_v23 = vpop.permute.xlu1 %3631  ;;  %v3596_v4 = vsel %vm9459_vm10, %v3586_v36, %v8777_v58  ;;  %vm9467_vm10 = vmmov %vm9461_vm0 }
 0x462   : > { %4311 = vmatprep.subr.bf16.mxu0 %v3596_v4  ;;  %4293 = vmatmul.mubr.bf16.vlgmr.msra.gmra.mrb[12].mxu0 %v8481_v12  ;;  %v3641_v7 = vsel %vm9462_vm13, %v8452_v42, %v3632_v23  ;;  %v2937_v42 = vsel %vm425_vm4, %v8466_v48, %v8662_v32 }
 0x463   : > { %4312 = vmatpush1.bf16.msra.mxu0 %v3595_v8  ;;  %4302 = vmatprep.mubr.bf16.mxu0 %v8492_v46  ;;  %v3169_v8 = vsel %vm9466_vm7, %v8619_v14, %v8717_v62 }
 0x464   : > { %v8785_v49 = vpop.permute.xlu0 %3633 }
 0x465   : > { %v3678_v52 = vpop.permute.xlu1 %3677  ;;  %v3642_v16 = vsel %vm9461_vm0, %v3632_v23, %v8785_v49  ;;  %vm9469_vm0 = vmmov %vm9463_vm14 }
 0x466   : > { %4313 = vmatprep.subr.bf16.mxu0 %v3642_v16  ;;  %v3687_v43 = vsel %vm3257_vm9, %v8461_v47, %v3678_v52  ;;  %v2983_v47 = vsel %vm527_vm5, %v8502_v55, %v8687_v59  ;;  %v3077_v55 = vsel %vm3072_vm3, %v8559_v56, %v8723_v53  ;;  %vm9470_vm13 = vmmov %vm9469_vm0 }
 0x467   : > { %4314 = vmatpush1.bf16.msra.mxu0 %v3641_v7 }
 0x468   : > { %v8791_v35 = vpop.permute.xlu0 %3679 }
 0x469   : > { %v2932_v10 = vpop.permute.xlu1 %2931  ;;  %v3688_v29 = vsel %vm3257_vm9, %v3678_v52, %v8791_v35 }
 0x46a   : > { %4315 = vmatprep.subr.bf16.mxu0 %v3688_v29  ;;  %v2938_v28 = vsel %vm425_vm4, %v8662_v32, %v2932_v10  ;;  %4303 = vmatmul.mubr.bf16.gmra.mrb[16].mxu0 %v8526_v51  ;;  %v3030_v32 = vsel %vm3025_vm2, %v8522_v41, %v8714_v31  ;;  %v3123_v41 = vsel %vm9464_vm15, %v8597_v44, %v8737_v30  ;;  %vm9472_vm15 = vmmov %vm9465_vm6 }
 0x46b   : > { %4364 = vmatprep.subr.bf16.mxu1 %v2938_v28  ;;  %4316 = vmatpush1.bf16.msra.mxu0 %v3687_v43 }
 0x46c   : > { %4365 = vmatpush1.bf16.msra.mxu1 %v2937_v42  ;;  %v8803_v1 = vpop.permute.xlu0 %3725  ;;  %5996 = vmatprep.mubr.msk.bf16.mxu0 %vm4151_vm8, %v8535_v40 }
 0x46d   : > { %v2978_v20 = vpop.permute.xlu1 %2977 }
 0x46e   : > { %v2984_v21 = vsel %vm527_vm5, %v8687_v59, %v2978_v20 }
 0x46f   : > { %4366 = vmatprep.subr.bf16.mxu1 %v2984_v21 }
 0x470   : > { %4367 = vmatpush1.bf16.msra.mxu1 %v2983_v47  ;;  %v3164_v0 = vpop.permute.xlu0 %3163 }
 0x471   : > { %v3024_v37 = vpop.permute.xlu1 %3023  ;;  %v3170_v23 = vsel %vm9465_vm6, %v8717_v62, %v3164_v0 }
 0x472   : > { %v3031_v48 = vsel %vm3025_vm2, %v8714_v31, %v3024_v37 }
 0x473   : > { %4368 = vmatprep.subr.bf16.mxu1 %v3031_v48 }
 0x474   : > { %4369 = vmatpush1.bf16.msra.mxu1 %v3030_v32  ;;  %v3210_v60 = vpop.permute.xlu0 %3209 }
 0x475   : > { %v3071_v19 = vpop.permute.xlu1 %3070 }
 0x476   : > { %v3078_v36 = vsel %vm3072_vm3, %v8723_v53, %v3071_v19 }
 0x477   : > { %4370 = vmatprep.subr.bf16.mxu1 %v3078_v36 }
 0x478   : > { %4371 = vmatpush1.bf16.msra.mxu1 %v3077_v55  ;;  %v3256_v59 = vpop.permute.xlu0 %3255 }
 0x479   : > { %v3118_v26 = vpop.permute.xlu1 %3117  ;;  %v3263_v62 = vsel %vm3257_vm9, %v8748_v38, %v3256_v59 }
 0x47a   : > { %v3124_v2 = vsel %vm9463_vm14, %v8737_v30, %v3118_v26  ;;  %v3216_v30 = vsel %vm9467_vm10, %v8728_v25, %v3210_v60  ;;  %vm9471_vm14 = vmmov %vm9465_vm6 }
 0x47b   : > { %4372 = vmatprep.subr.bf16.mxu1 %v3124_v2  ;;  %vm9473_vm6 = vmmov %vm9467_vm10 }
 0x47c   : > { %4373 = vmatpush1.bf16.msra.mxu1 %v3123_v41  ;;  %v3303_v31 = vpop.permute.xlu0 %3302  ;;  %vm9474_vm7 = vmmov %vm9473_vm6 }
 0x47d   : > { %v3724_v4 = vpop.permute.xlu1 %3723  ;;  %4374 = vmatprep.subr.bf16.mxu1 %v3170_v23  ;;  %v3310_v29 = vsel %vm3304_vm11, %v8765_v15, %v3303_v31  ;;  %vm9481_vm10 = vmmov %vm9469_vm0 }
 0x47e   : > { %v3734_v56 = vsel %vm3304_vm11, %v3724_v4, %v8803_v1  ;;  %v3733_v53 = vsel %vm3304_vm11, %v8486_v57, %v3724_v4  ;;  %v3215_v57 = vsel %vm9468_vm12, %v8647_v39, %v8728_v25  ;;  %v3262_v39 = vsel %vm3257_vm9, %v8664_v54, %v8748_v38  ;;  %vm9482_vm12 = vmmov %vm9469_vm0 }
 0x47f   : > { %4317 = vmatprep.subr.bf16.mxu0 %v3734_v56  ;;  %v3309_v54 = vsel %vm3304_vm11, %v8674_v63, %v8765_v15 }
 0x480   : > { %4318 = vmatpush1.bf16.msra.mxu0 %v3733_v53  ;;  %4375 = vmatpush1.bf16.msra.mxu1 %v3169_v8  ;;  %v8836_v44 = vpop.permute.xlu0 %3783 }
 0x481   : > { %4319 = vmatprep.subr.bf16.mxu0 %v8234_v24  ;;  %v3782_v52 = vpop.permute.xlu1 %3781  ;;  %4376 = vmatprep.subr.bf16.mxu1 %v3216_v30 }
 0x482   : > { %v3792_v14 = vsel %vm425_vm4, %v3782_v52, %v8836_v44  ;;  %v3791_v10 = vsel %vm425_vm4, %v8547_v13, %v3782_v52 }
 0x484   : > { %4320 = vmatpush1.bf16.msra.mxu0 %v8059_v18  ;;  %4377 = vmatpush1.bf16.msra.mxu1 %v3215_v57  ;;  %v8845_v16 = vpop.permute.xlu0 %3829 }
 0x485   : > { %4321 = vmatprep.subr.bf16.mxu0 %v3792_v14  ;;  %v3828_v7 = vpop.permute.xlu1 %3827  ;;  %4378 = vmatprep.subr.bf16.mxu1 %v3263_v62 }
 0x486   : > { %v3838_v25 = vsel %vm527_vm5, %v3828_v7, %v8845_v16  ;;  %v3837_v13 = vsel %vm527_vm5, %v8583_v33, %v3828_v7 }
 0x488   : > { %4322 = vmatpush1.bf16.msra.mxu0 %v3791_v10  ;;  %4379 = vmatpush1.bf16.msra.mxu1 %v3262_v39  ;;  %v8856_v18 = vpop.permute.xlu0 %3875 }
 0x489   : > { %4323 = vmatprep.subr.bf16.mxu0 %v3838_v25  ;;  %v3874_v28 = vpop.permute.xlu1 %3873  ;;  %4380 = vmatprep.subr.bf16.mxu1 %v3310_v29 }
 0x48a   : > { %v3884_v43 = vsel %vm3025_vm2, %v3874_v28, %v8856_v18  ;;  %v3883_v20 = vsel %vm3025_vm2, %v8609_v9, %v3874_v28 }
 0x48c   : > { %4324 = vmatpush1.bf16.msra.mxu0 %v3837_v13  ;;  %4381 = vmatpush1.bf16.msra.mxu1 %v3309_v54  ;;  %v8867_v38 = vpop.permute.xlu0 %3921 }
 0x48d   : > { %4325 = vmatprep.subr.bf16.mxu0 %v3884_v43  ;;  %v3920_v42 = vpop.permute.xlu1 %3919  ;;  %4382 = vmatprep.subr.bf16.mxu1 %v8419_v3 }
 0x48e   : > { %v3930_v63 = vsel %vm3072_vm3, %v3920_v42, %v8867_v38  ;;  %v3929_v0 = vsel %vm3072_vm3, %v8629_v45, %v3920_v42 }
 0x490   : > { %4326 = vmatpush1.bf16.msra.mxu0 %v3883_v20  ;;  %4383 = vmatpush1.bf16.msra.mxu1 %v8234_v24  ;;  %v3362_v33 = vpop.permute.xlu0 %3361 }
 0x491   : > { %4327 = vmatprep.subr.bf16.mxu0 %v3930_v63  ;;  %v3360_v15 = vpop.permute.xlu1 %3359 }
 0x492   : > { %v3368_v21 = vsel %vm425_vm4, %v3360_v15, %v3362_v33  ;;  %v3367_v47 = vsel %vm425_vm4, %v8696_v61, %v3360_v15 }
 0x493   : > { %4384 = vmatprep.subr.bf16.mxu1 %v3368_v21 }
 0x494   : > { %4328 = vmatpush1.bf16.msra.mxu0 %v3929_v0  ;;  %4385 = vmatpush1.bf16.msra.mxu1 %v3367_v47  ;;  %v3408_v9 = vpop.permute.xlu0 %3407 }
 0x495   : > { %v3406_v37 = vpop.permute.xlu1 %3405 }
 0x496   : > { %v3414_v24 = vsel %vm527_vm5, %v3406_v37, %v3408_v9  ;;  %v3413_v48 = vsel %vm527_vm5, %v8704_v50, %v3406_v37 }
 0x497   : > { %4344 = vmatmul.mubr.bf16.vlgmr.msra.gmra.mrb[12].mxu0 %v8645_v6  ;;  %4386 = vmatprep.subr.bf16.mxu1 %v3414_v24 }
 0x498   : > { %4387 = vmatpush1.bf16.msra.mxu1 %v3413_v48  ;;  %v3454_v32 = vpop.permute.xlu0 %3453  ;;  %5997 = vmatprep.mubr.msk.bf16.mxu0 %vm4151_vm8, %v8650_v17 }
 0x499   : > { %v3452_v61 = vpop.permute.xlu1 %3451 }
 0x49a   : > { %v3460_v45 = vsel %vm3025_vm2, %v3452_v61, %v3454_v32  ;;  %v3459_v60 = vsel %vm3025_vm2, %v8754_v11, %v3452_v61 }
 0x49b   : > { %4388 = vmatprep.subr.bf16.mxu1 %v3460_v45 }
 0x49c   : > { %4389 = vmatpush1.bf16.msra.mxu1 %v3459_v60  ;;  %v3500_v19 = vpop.permute.xlu0 %3499 }
 0x49d   : > { %v3498_v36 = vpop.permute.xlu1 %3497 }
 0x49e   : > { %v3506_v50 = vsel %vm3072_vm3, %v3498_v36, %v3500_v19  ;;  %v3505_v55 = vsel %vm3072_vm3, %v8763_v34, %v3498_v36 }
 0x49f   : > { %4354 = vmatmul.mubr.bf16.gmra.mrb[16].mxu0 %v8672_v5  ;;  %4390 = vmatprep.subr.bf16.mxu1 %v3506_v50 }
 0x4a0   : > { %4391 = vmatpush1.bf16.msra.mxu1 %v3505_v55  ;;  %v3546_v59 = vpop.permute.xlu0 %3545 }
 0x4a1   : > { %v3544_v26 = vpop.permute.xlu1 %3543 }
 0x4a2   : > { %v3552_v2 = vsel %vm9469_vm0, %v3544_v26, %v3546_v59  ;;  %v3551_v11 = vsel %vm9470_vm13, %v8771_v27, %v3544_v26  ;;  %vm9483_vm13 = vmmov %vm9469_vm0 }
 0x4a3   : > { %4392 = vmatprep.subr.bf16.mxu1 %v3552_v2 }
 0x4a4   : > { %4393 = vmatpush1.bf16.msra.mxu1 %v3551_v11  ;;  %v3592_v41 = vpop.permute.xlu0 %3591 }
 0x4a5   : > { %v3590_v31 = vpop.permute.xlu1 %3589 }
 0x4a6   : > { %v3597_v23 = vsel %vm9471_vm14, %v8777_v58, %v3590_v31  ;;  %v3598_v34 = vsel %vm9472_vm15, %v3590_v31, %v3592_v41  ;;  %vm9484_vm14 = vmmov %vm9469_vm0 }
 0x4a7   : > { %4413 = vmatprep.subr.bf16.mxu1 %v3598_v34  ;;  %4395 = vmatmul.mubr.bf16.vlgmr.msra.gmra.mrb[16].mxu1 %v8481_v12  ;;  %vm9485_vm15 = vmmov %vm9469_vm0 }
 0x4a8   : > { %4414 = vmatpush1.bf16.msra.mxu1 %v3597_v23  ;;  %v3638_v4 = vpop.permute.xlu0 %3637  ;;  %4404 = vmatprep.mubr.bf16.mxu1 %v8492_v46 }
 0x4a9   : > { %v3636_v56 = vpop.permute.xlu1 %3635 }
 0x4aa   : > { %v3643_v27 = vsel %vm9473_vm6, %v8785_v49, %v3636_v56  ;;  %v3644_v53 = vsel %vm9474_vm7, %v3636_v56, %v3638_v4  ;;  %vm9486_vm6 = vmmov %vm9469_vm0 }
 0x4ab   : > { %4415 = vmatprep.subr.bf16.mxu1 %v3644_v53  ;;  %vm9487_vm7 = vmmov %vm9469_vm0 }
 0x4ac   : > { %4416 = vmatpush1.bf16.msra.mxu1 %v3643_v27  ;;  %v3684_v8 = vpop.permute.xlu0 %3683 }
 0x4ad   : > { %v3682_v30 = vpop.permute.xlu1 %3681 }
 0x4ae   : > { %v3689_v58 = vsel %vm3257_vm9, %v8791_v35, %v3682_v30  ;;  %v3690_v52 = vsel %vm3257_vm9, %v3682_v30, %v3684_v8  ;;  %vm4819_vm9 = vcmask 3072  }
 0x4af   : > { %4417 = vmatprep.subr.bf16.mxu1 %v3690_v52  ;;  %4405 = vmatmul.mubr.bf16.gmra.mrb[20].mxu1 %v8526_v51 }
 0x4b0   : > { %4418 = vmatpush1.bf16.msra.mxu1 %v3689_v58  ;;  %v3730_v12 = vpop.permute.xlu0 %3729  ;;  %5998 = vmatprep.mubr.msk.bf16.mxu1 %vm4151_vm8, %v8535_v40 }
 0x4b1   : > { %v3728_v46 = vpop.permute.xlu1 %3727 }
 0x4b2   : > { %v3735_v49 = vsel %vm3304_vm11, %v8803_v1, %v3728_v46  ;;  %v3736_v57 = vsel %vm3304_vm11, %v3728_v46, %v3730_v12  ;;  %vm9479_vm11 = vmmov %vm9469_vm0 }
 0x4b3   : > { %4419 = vmatprep.subr.bf16.mxu1 %v3736_v57 }
 0x4b4   : > { %4420 = vmatpush1.bf16.msra.mxu1 %v3735_v49  ;;  %v3788_v14 = vpop.permute.xlu0 %3787 }
 0x4b5   : > { %v3786_v35 = vpop.permute.xlu1 %3785  ;;  %4421 = vmatprep.subr.bf16.mxu1 %v8593_v22 }
 0x4b6   : > { %v3794_v62 = vsel %vm425_vm4, %v3786_v35, %v3788_v14  ;;  %v3793_v40 = vsel %vm425_vm4, %v8836_v44, %v3786_v35 }
 0x4b8   : > { %4422 = vmatpush1.bf16.msra.mxu1 %v8419_v3  ;;  %v3834_v51 = vpop.permute.xlu0 %3833 }
 0x4b9   : > { %v3832_v7 = vpop.permute.xlu1 %3831  ;;  %4423 = vmatprep.subr.bf16.mxu1 %v3794_v62 }
 0x4ba   : > { %v3840_v10 = vsel %vm527_vm5, %v3832_v7, %v3834_v51  ;;  %v3839_v25 = vsel %vm527_vm5, %v8845_v16, %v3832_v7  ;;  %vm9476_vm5 = vmmov %vm9469_vm0 }
 0x4bc   : > { %4424 = vmatpush1.bf16.msra.mxu1 %v3793_v40  ;;  %v3880_v1 = vpop.permute.xlu0 %3879 }
 0x4bd   : > { %v3878_v39 = vpop.permute.xlu1 %3877  ;;  %4425 = vmatprep.subr.bf16.mxu1 %v3840_v10 }
 0x4be   : > { %v3886_v3 = vsel %vm3025_vm2, %v3878_v39, %v3880_v1  ;;  %v3885_v28 = vsel %vm3025_vm2, %v8856_v18, %v3878_v39  ;;  %vm9477_vm2 = vmmov %vm9469_vm0 }
 0x4c0   : > { %4426 = vmatpush1.bf16.msra.mxu1 %v3839_v25  ;;  %v3926_v22 = vpop.permute.xlu0 %3925 }
 0x4c1   : > { %v3924_v29 = vpop.permute.xlu1 %3923  ;;  %4427 = vmatprep.subr.bf16.mxu1 %v3886_v3 }
 0x4c2   : > { %v3932_v44 = vsel %vm3072_vm3, %v3924_v29, %v3926_v22  ;;  %v3931_v13 = vsel %vm3072_vm3, %v8867_v38, %v3924_v29  ;;  %vm9478_vm3 = vmmov %vm9469_vm0 }
 0x4c4   : > { %4428 = vmatpush1.bf16.msra.mxu1 %v3885_v28 }
 0x4c5   : > { %4429 = vmatprep.subr.bf16.mxu1 %v3932_v44 }
 0x4c8   : > { %4430 = vmatpush1.bf16.msra.mxu1 %v3931_v13 }
 0x4cb   : > { %4446 = vmatmul.mubr.bf16.vlgmr.msra.gmra.mrb[16].mxu1 %v8645_v6 }
 0x4cc   : > { %5999 = vmatprep.mubr.msk.bf16.mxu1 %vm4151_vm8, %v8650_v17  ;;  %vm9480_vm8 = vmmov %vm9469_vm0 }
 0x4d1   : > { %v4112_v42 = vpop.permute.xlu0 %4111 }
 0x4d2   : > { %v4107_v16 = vpop.permute.xlu1 %4106 }
 0x4d3   : > { %4456 = vmatmul.mubr.bf16.gmra.mrb[20].mxu1 %v8672_v5 }
 0x4d6   : > { %v4117_v0 = vpop.permute.xlu1 %4116 }
 0x502   : > { %v4243_v54 = vpop.f32.mrb[8].mxu1 }
 0x503   : > { %v8933_v43 = vadd.f32 %v4243_v54, %v4107_v16  ;;  %v4245_v18 = vpop.f32.mrb[9].mxu1 }
 0x504   : > { %v8935_v20 = vadd.f32 %v4245_v18, %v4107_v16  ;;  %v4247_v33 = vpop.f32.mrb[10].mxu1 }
 0x505   : > { %v4464_v63 = vmax.f32 %v8933_v43, 0.0  ;;  %v8938_v38 = vadd.f32 %v4247_v33, %v4112_v42  ;;  %v4249_v15 = vpop.f32.mrb[11].mxu1 }
 0x506   : > { %v4465_v6 = vmax.f32 %v8935_v20, 0.0  ;;  %v8941_v21 = vadd.f32 %v4249_v15, %v4112_v42 }
 0x507   : > { %v4470_v5 = vmax.f32 %v8938_v38, 0.0 }
 0x508   : > { %v6344_v17 = vpack.i.bf16 %v4465_v6, %v4464_v63  ;;  %v4471_v47 = vmax.f32 %v8941_v21, 0.0 }
 0x50a   : > { %v4253_v9 = vpop.f32.mrb[12].mxu1  ;;  %6345 = vrot.lane.b32.xlu0 %v6344_v17, %s6509_s15  ;;  %v6354_v48 = vpack.i.bf16 %v4471_v47, %v4470_v5 }
 0x50b   : > { %v8950_v37 = vadd.f32 %v4253_v9, %v4117_v0  ;;  %v4255_v24 = vpop.f32.mrb[13].mxu1 }
 0x50c   : > { %v8956_v32 = vadd.f32 %v4255_v24, %v4117_v0  ;;  %v4257_v61 = vpop.f32.mrb[14].mxu1 }
 0x50d   : > { %v4476_v45 = vmax.f32 %v8950_v37, 0.0  ;;  %v4258_v60 = vpop.f32.mrb[15].mxu1 }
 0x50e   : > { %v4477_v19 = vmax.f32 %v8956_v32, 0.0  ;;  %6355 = vrot.lane.b32.xlu0 %v6354_v48, %s6509_s15 }
 0x510   : > { %v6364_v36 = vpack.i.bf16 %v4477_v19, %v4476_v45 }
 0x512   : > { %6365 = vrot.lane.b32.xlu0 %v6364_v36, %s6509_s15 }
 0x56a   : > { %v4345_v50 = vpop.f32.mrb[12].mxu0 }
 0x56b   : > { %v8966_v55 = vadd.f32 %v4345_v50, %v4107_v16  ;;  %v4347_v59 = vpop.f32.mrb[13].mxu0 }
 0x56c   : > { %v8968_v26 = vadd.f32 %v4347_v59, %v4107_v16  ;;  %v4349_v2 = vpop.f32.mrb[14].mxu0 }
 0x56d   : > { %v4466_v11 = vmax.f32 %v8966_v55, 0.0  ;;  %v8971_v41 = vadd.f32 %v4349_v2, %v4112_v42  ;;  %v4351_v31 = vpop.f32.mrb[15].mxu0 }
 0x56e   : > { %v4467_v23 = vmax.f32 %v8968_v26, 0.0  ;;  %v8974_v34 = vadd.f32 %v4351_v31, %v4112_v42 }
 0x56f   : > { %v4472_v56 = vmax.f32 %v8971_v41, 0.0 }
 0x570   : > { %v6349_v4 = vpack.i.bf16 %v4467_v23, %v4466_v11  ;;  %v4473_v27 = vmax.f32 %v8974_v34, 0.0 }
 0x572   : > { %v4355_v53 = vpop.f32.mrb[16].mxu0  ;;  %6350 = vrot.lane.b32.xlu1 %v6349_v4, %s6509_s15  ;;  %v6359_v58 = vpack.i.bf16 %v4473_v27, %v4472_v56 }
 0x573   : > { %v8983_v8 = vadd.f32 %v4355_v53, %v4117_v0  ;;  %v4357_v30 = vpop.f32.mrb[17].mxu0 }
 0x574   : > { %v8989_v52 = vadd.f32 %v4357_v30, %v4117_v0  ;;  %v4359_v12 = vpop.f32.mrb[18].mxu0 }
 0x575   : > { %v4478_v46 = vmax.f32 %v8983_v8, 0.0  ;;  %v4360_v49 = vpop.f32.mrb[19].mxu0 }
 0x576   : > { %v4479_v57 = vmax.f32 %v8989_v52, 0.0  ;;  %6360 = vrot.lane.b32.xlu1 %v6359_v58, %s6509_s15 }
 0x578   : > { %v6369_v14 = vpack.i.bf16 %v4479_v57, %v4478_v46 }
 0x57a   : > { %6370 = vrot.lane.b32.xlu1 %v6369_v14, %s6509_s15 }
 0x57c   : > { %v6346_v24 = vpop.permute.xlu0 %6345 }
 0x57d   : > { %v6348_v61 = vunpack.i.h.bf16 %v6346_v24 }
 0x580   : > { %v6356_v48 = vpop.permute.xlu0 %6355 }
 0x581   : > { %v6358_v60 = vunpack.i.h.bf16 %v6356_v48  ;;  %v6357_v36 = vunpack.i.l.bf16 %v6356_v48 }
 0x583   : > { %v4593_v2 = vsel %vm425_vm4, %v6357_v36, %v6358_v60 }
 0x584   : > { %v6366_v53 = vpop.permute.xlu0 %6365  ;;  %v9042_v49 = vmax.f32 %v4470_v5, %v4593_v2 }
 0x59e   : > { %v4447_v35 = vpop.f32.mrb[16].mxu1 }
 0x59f   : > { %v8999_v51 = vadd.f32 %v4447_v35, %v4107_v16  ;;  %v4449_v62 = vpop.f32.mrb[17].mxu1 }
 0x5a0   : > { %v9001_v7 = vadd.f32 %v4449_v62, %v4107_v16  ;;  %v4451_v40 = vpop.f32.mrb[18].mxu1 }
 0x5a1   : > { %v4468_v1 = vmax.f32 %v8999_v51, 0.0  ;;  %v9004_v10 = vadd.f32 %v4451_v40, %v4112_v42  ;;  %v4453_v39 = vpop.f32.mrb[19].mxu1  ;;  %v6368_v40 = vunpack.i.h.bf16 %v6366_v53 }
 0x5a2   : > { %v4469_v25 = vmax.f32 %v9001_v7, 0.0  ;;  %v9007_v3 = vadd.f32 %v4453_v39, %v4112_v42  ;;  %v6367_v39 = vunpack.i.l.bf16 %v6366_v53 }
 0x5a3   : > { %v4474_v22 = vmax.f32 %v9004_v10, 0.0 }
 0x5a4   : > { %v6374_v29 = vpack.i.bf16 %v4469_v25, %v4468_v1  ;;  %v4475_v28 = vmax.f32 %v9007_v3, 0.0 }
 0x5a6   : > { %v6379_v44 = vpack.i.bf16 %v4475_v28, %v4474_v22  ;;  %v4457_v13 = vpop.f32.mrb[20].mxu1  ;;  %6375 = vrot.lane.b32.xlu0 %v6374_v29, %s6509_s15 }
 0x5a7   : > { %v9020_v16 = vadd.f32 %v4457_v13, %v4117_v0  ;;  %v4459_v54 = vpop.f32.mrb[21].mxu1 }
 0x5a8   : > { %v9022_v18 = vadd.f32 %v4459_v54, %v4117_v0  ;;  %v4461_v42 = vpop.f32.mrb[22].mxu1  ;;  %6380 = vrot.lane.b32.xlu1 %v6379_v44, %s6509_s15  ;;  %v6347_v0 = vunpack.i.l.bf16 %v6346_v24 }
 0x5a9   : > { %v4480_v33 = vmax.f32 %v9020_v16, 0.0  ;;  %v4462_v15 = vpop.f32.mrb[23].mxu1 }
 0x5aa   : > { %v4481_v17 = vmax.f32 %v9022_v18, 0.0  ;;  %v4588_v59 = vsel %vm425_vm4, %v6347_v0, %v6348_v61 }
 0x5ab   : > { %v9038_v12 = vmax.f32 %v4464_v63, %v4588_v59 }
 0x5ac   : > { %v6384_v9 = vpack.i.bf16 %v4481_v17, %v4480_v33 }
 0x5ae   : > { %6385 = vrot.lane.b32.xlu0 %v6384_v9, %s6509_s15  ;;  %s6533_s15 = smov 116  }
 0x5e4   : > { %v6351_v50 = vpop.permute.xlu1 %6350 }
 0x5e5   : > { %v6353_v31 = vunpack.i.h.bf16 %v6351_v50  ;;  %v6352_v4 = vunpack.i.l.bf16 %v6351_v50 }
 0x5e7   : > { %v4589_v30 = vsel %vm425_vm4, %v6348_v61, %v6352_v4  ;;  %v4590_v58 = vsel %vm425_vm4, %v6352_v4, %v6353_v31 }
 0x5e8   : > { %v9046_v14 = vmax.f32 %v4465_v6, %v4589_v30  ;;  %v9050_v35 = vmax.f32 %v4466_v11, %v4590_v58  ;;  %v6361_v62 = vpop.permute.xlu1 %6360  ;;  %v4598_v11 = vsel %vm425_vm4, %v6367_v39, %v6368_v40 }
 0x5e9   : > { %v6363_v29 = vunpack.i.h.bf16 %v6361_v62  ;;  %v6362_v44 = vunpack.i.l.bf16 %v6361_v62  ;;  %v9074_v21 = vmax.f32 %v4476_v45, %v4598_v11 }
 0x5ea   : > { %v6394_v43 = vpack.i.bf16 %v9042_v49, %v9050_v35  ;;  %v6389_v63 = vpack.i.bf16 %v9046_v14, %v9038_v12 }
 0x5eb   : > { %v4594_v38 = vsel %vm425_vm4, %v6358_v60, %v6362_v44  ;;  %v4595_v20 = vsel %vm425_vm4, %v6362_v44, %v6363_v29 }
 0x5ec   : > { %v9060_v6 = vmax.f32 %v4471_v47, %v4594_v38  ;;  %v9064_v5 = vmax.f32 %v4472_v56, %v4595_v20  ;;  %v6371_v55 = vpop.permute.xlu1 %6370  ;;  %6395 = vrot.lane.b32.xlu0 %v6394_v43, %s6518_s24  ;;  %6390 = vrot.lane.b32.xlu1 %v6389_v63, %s6518_s24 }
 0x5ed   : > { %v6372_v13 = vunpack.i.l.bf16 %v6371_v55  ;;  %v6373_v56 = vunpack.i.h.bf16 %v6371_v55 }
 0x5ee   : > { %v6399_v54 = vpack.i.bf16 %v9064_v5, %v9060_v6 }
 0x5ef   : > { %v4599_v42 = vsel %vm425_vm4, %v6368_v40, %v6372_v13  ;;  %v4600_v9 = vsel %vm425_vm4, %v6372_v13, %v6373_v56 }
 0x5f0   : > { %v9078_v47 = vmax.f32 %v4477_v19, %v4599_v42  ;;  %6400 = vrot.lane.b32.xlu1 %v6399_v54, %s6518_s24  ;;  %v9088_v32 = vmax.f32 %v4478_v46, %v4600_v9 }
 0x5f2   : > { %v6404_v41 = vpack.i.bf16 %v9078_v47, %v9074_v21 }
 0x5f4   : > { %6405 = vrot.lane.b32.xlu0 %v6404_v41, %s6518_s24 }
 0x618   : > { %v6376_v15 = vpop.permute.xlu0 %6375 }
 0x619   : > { %v6378_v24 = vunpack.i.h.bf16 %v6376_v15  ;;  %v6377_v48 = vunpack.i.l.bf16 %v6376_v15 }
 0x61a   : > { %v6381_v37 = vpop.permute.xlu1 %6380 }
 0x61b   : > { %v4591_v45 = vsel %vm425_vm4, %v6353_v31, %v6377_v48  ;;  %v4592_v19 = vsel %vm425_vm4, %v6377_v48, %v6378_v24  ;;  %v6382_v0 = vunpack.i.l.bf16 %v6381_v37  ;;  %v6383_v60 = vunpack.i.h.bf16 %v6381_v37 }
 0x61c   : > { %v9093_v61 = vmax.f32 %v4467_v23, %v4591_v45  ;;  %v9100_v59 = vmax.f32 %v4468_v1, %v4592_v19  ;;  %v4641_v10 = vmax.f32 %v4469_v25, %v6378_v24 }
 0x61d   : > { %v4596_v36 = vsel %vm425_vm4, %v6363_v29, %v6382_v0  ;;  %v4597_v26 = vsel %vm425_vm4, %v6382_v0, %v6383_v60  ;;  %v4647_v34 = vmax.f32 %v4475_v28, %v6383_v60 }
 0x61e   : > { %v6409_v50 = vpack.i.bf16 %v9093_v61, %v9088_v32  ;;  %v9104_v8 = vmax.f32 %v4473_v27, %v4596_v36  ;;  %v9117_v27 = vmax.f32 %v4474_v22, %v4597_v26 }
 0x620   : > { %v6386_v46 = vpop.permute.xlu0 %6385  ;;  %6410 = vrot.lane.b32.xlu1 %v6409_v50, %s6518_s24  ;;  %v6414_v31 = vpack.i.bf16 %v9104_v8, %v9100_v59 }
 0x621   : > { %v6388_v23 = vunpack.i.h.bf16 %v6386_v46  ;;  %v6387_v2 = vunpack.i.l.bf16 %v6386_v46 }
 0x622   : > { %6415 = vrot.lane.b32.xlu0 %v6414_v31, %s6518_s24 }
 0x623   : > { %v4601_v4 = vsel %vm425_vm4, %v6373_v56, %v6387_v2  ;;  %v4602_v51 = vsel %vm425_vm4, %v6387_v2, %v6388_v23  ;;  %v4653_v30 = vmax.f32 %v4481_v17, %v6388_v23  ;;  %vm9475_vm4 = vmmov %vm9469_vm0 }
 0x624   : > { %v9121_v1 = vmax.f32 %v4479_v57, %v4601_v4  ;;  %v9125_v53 = vmax.f32 %v4480_v33, %v4602_v51 }
 0x625   : > { %v6424_v52 = vpack.i.bf16 %v4641_v10, %v4653_v30 }
 0x626   : > { %v6429_v58 = vpack.i.bf16 %v4647_v34, %v9125_v53  ;;  %v6419_v3 = vpack.i.bf16 %v9121_v1, %v9117_v27 }
 0x628   : > { %6430 = vrot.lane.b32.xlu0 %v6429_v58, %s6518_s24  ;;  %6420 = vrot.lane.b32.xlu1 %v6419_v3, %s6518_s24 }
 0x62c   : > { %6425 = vrot.lane.b32.xlu1 %v6424_v52, %s6518_s24  ;;  %s6534_s24 = smov 112  }
 0x65e   : > { %v9137_v57 = vpop.permute.xlu0 %6395  ;;  %v6391_v22 = vpop.permute.xlu1 %6390 }
 0x65f   : > { %v6397_v28 = vunpack.i.l.bf16 %v9137_v57  ;;  %v6393_v16 = vunpack.i.h.bf16 %v6391_v22  ;;  %v6392_v18 = vunpack.i.l.bf16 %v6391_v22  ;;  %v6398_v40 = vunpack.i.h.bf16 %v9137_v57 }
 0x661   : > { %v4710_v33 = vsel %vm9475_vm4, %v6393_v16, %v6397_v28  ;;  %v4709_v7 = vsel %vm9476_vm5, %v6392_v18, %v6393_v16  ;;  %vm9488_vm4 = vmmov %vm9469_vm0  ;;  %vm5573_vm5 = vcmask 719872  }
 0x662   : > { %v4740_v25 = vmax.f32 %v9046_v14, %v4710_v33  ;;  %v4739_v17 = vmax.f32 %v9038_v12, %v4709_v7  ;;  %v9146_v62 = vpop.permute.xlu1 %6400 }
 0x663   : > { %v6403_v39 = vunpack.i.h.bf16 %v9146_v62  ;;  %v6402_v29 = vunpack.i.l.bf16 %v9146_v62 }
 0x664   : > { %v6062_v44 = vpack.c.bf16 %v4740_v25, %v4739_v17 }
 0x665   : > { %v4714_v43 = vsel %vm9477_vm2, %v6398_v40, %v6402_v29  ;;  %v4715_v63 = vsel %vm9478_vm3, %v6402_v29, %v6403_v39  ;;  %vm6536_vm2 = vmmov 0   ;;  %vm5782_vm3 = vcmask 1024  }
 0x666   : > { %4807 = vst [vmem:[#allocation7] sm:$0xff] %v6062_v44  ;;  %v4744_v14 = vmax.f32 %v9042_v49, %v4714_v43  ;;  %v4745_v12 = vmax.f32 %v9060_v6, %v4715_v63  ;;  %v6406_v50 = vpop.permute.xlu0 %6405 }
 0x667   : > { %v6408_v46 = vunpack.i.h.bf16 %v6406_v50  ;;  %v6407_v26 = vunpack.i.l.bf16 %v6406_v50 }
 0x668   : > { %v6065_v38 = vpack.c.bf16 %v4745_v12, %v4744_v14 }
 0x669   : > { %v4719_v23 = vsel %vm9479_vm11, %v6407_v26, %v6408_v46 }
 0x66a   : > { %4810 = vst [vmem:[#allocation7 + $0x14] sm:$0xff] %v6065_v38  ;;  %v4749_v51 = vmax.f32 %v9074_v21, %v4719_v23 }
 0x66d   : > { %v4901_v20 = vld [vmem:[#allocation7 + $0x4] sm:$0xf]  ;;  %v4841_v55 = vld [vmem:[#allocation7] sm:$0xf] }
 0x66e   : > { %4907 = vrot.lane.b32.xlu0 %v4901_v20, %s6512_s18  ;;  %4847 = vrot.lane.b32.xlu1 %v4841_v55, %s6530_s16  ;;  %v4816_v11 = vld [vmem:[#allocation7] sm:$0xf]  ;;  %v4895_v13 = vld [vmem:[#allocation7 + $0x4] sm:$0xf] }
 0x66f   : > { %4820 = vst.msk [vmem:[#allocation8] sm:$0xf] %vm4819_vm9, %v4816_v11  ;;  %v4937_v54 = vld [vmem:[#allocation7 + $0x4] sm:$0xf]  ;;  %v4823_v42 = vld [vmem:[#allocation7] sm:$0xf] }
 0x670   : > { %4898 = vst.msk [vmem:[#allocation8 + $0x3c] sm:$0xf] %vm4819_vm9, %v4895_v13  ;;  %v4877_v41 = vld [vmem:[#allocation7] sm:$0xf]  ;;  %v4919_v56 = vld [vmem:[#allocation7 + $0x4] sm:$0xf] }
 0x671   : > { %v4896_v49 = vld [vmem:[#allocation7 + $0x18] sm:$0xf]  ;;  %v4817_v6 = vld [vmem:[#allocation7 + $0x14] sm:$0xf]  ;;  %v4859_v9 = vld [vmem:[#allocation7] sm:$0xf] }
 0x672   : > { %4943 = vrot.lane.b32.xlu1 %v4937_v54, %s6533_s15  ;;  %4829 = vrot.lane.b32.xlu0 %v4823_v42, %s6512_s18  ;;  %4899 = vst.msk [vmem:[#allocation8 + $0x40] sm:$0xf] %vm4819_vm9, %v4896_v49  ;;  %4821 = vst.msk [vmem:[#allocation8 + $0x4] sm:$0xf] %vm4819_vm9, %v4817_v6  ;;  %v4902_v15 = vld [vmem:[#allocation7 + $0x18] sm:$0xf] }
 0x673   : > { %v4824_v24 = vld [vmem:[#allocation7 + $0x14] sm:$0xf]  ;;  %v4955_v48 = vld [vmem:[#allocation7 + $0x4] sm:$0xf]  ;;  %v4920_v37 = vld [vmem:[#allocation7 + $0x18] sm:$0xf] }
 0x674   : > { %v4842_v45 = vld [vmem:[#allocation7 + $0x14] sm:$0xf]  ;;  %v4938_v0 = vld [vmem:[#allocation7 + $0x18] sm:$0xf] }
 0x675   : > { %v4860_v19 = vld [vmem:[#allocation7 + $0x14] sm:$0xf]  ;;  %v4956_v60 = vld [vmem:[#allocation7 + $0x18] sm:$0xf] }
 0x676   : > { %4883 = vrot.lane.b32.xlu1 %v4877_v41, %s6534_s24  ;;  %4925 = vrot.lane.b32.xlu0 %v4919_v56, %s6530_s16  ;;  %v4878_v36 = vld [vmem:[#allocation7 + $0x14] sm:$0xf] }
 0x67a   : > { %4909 = vrot.lane.b32.xlu1 %v4902_v15, %s6512_s18  ;;  %4865 = vrot.lane.b32.xlu0 %v4859_v9, %s6533_s15 }
 0x67e   : > { %4831 = vrot.lane.b32.xlu1 %v4824_v24, %s6512_s18  ;;  %4961 = vrot.lane.b32.xlu0 %v4955_v48, %s6534_s24 }
 0x682   : > { %4927 = vrot.lane.b32.xlu1 %v4920_v37, %s6530_s16  ;;  %4849 = vrot.lane.b32.xlu0 %v4842_v45, %s6530_s16  ;;  %v6448_v37 = vld [vmem:[#allocation8] sm:$0xff]  }
 0x686   : > { %4867 = vrot.lane.b32.xlu1 %v4860_v19, %s6533_s15  ;;  %4945 = vrot.lane.b32.xlu0 %v4938_v0, %s6533_s15 }
 0x68a   : > { %4963 = vrot.lane.b32.xlu1 %v4956_v60, %s6534_s24  ;;  %4885 = vrot.lane.b32.xlu0 %v4878_v36, %s6534_s24 }
 0x692   : > { %v6411_v2 = vpop.permute.xlu1 %6410 }
 0x693   : > { %v6413_v31 = vunpack.i.h.bf16 %v6411_v2  ;;  %v6412_v4 = vunpack.i.l.bf16 %v6411_v2 }
 0x694   : > { %v6416_v30 = vpop.permute.xlu0 %6415 }
 0x695   : > { %v4720_v34 = vsel %vm9480_vm8, %v6408_v46, %v6412_v4  ;;  %v4711_v58 = vsel %vm9481_vm10, %v6397_v28, %v6413_v31  ;;  %v6418_v10 = vunpack.i.h.bf16 %v6416_v30  ;;  %v6417_v52 = vunpack.i.l.bf16 %v6416_v30 }
 0x696   : > { %v4750_v3 = vmax.f32 %v9078_v47, %v4720_v34  ;;  %v4741_v18 = vmax.f32 %v9050_v35, %v4711_v58  ;;  %v6465_v58 = vld [vmem:[%s9383_s5 + $0x4] ss:$20 sps:$4 sm:$0xff]  }
 0x697   : > { %v4712_v16 = vsel %vm9482_vm12, %v6413_v31, %v6417_v52  ;;  %v4716_v21 = vsel %vm9469_vm0, %v6403_v39, %v6418_v10  ;;  %5615 = vmatprep.mubr.bf16.mxu0 %v6465_v58 }
 0x698   : > { %v6068_v22 = vpack.c.bf16 %v4750_v3, %v4749_v51  ;;  %v4742_v33 = vmax.f32 %v9093_v61, %v4712_v16  ;;  %v4746_v29 = vmax.f32 %v9064_v5, %v4716_v21 }
 0x69a   : > { %4813 = vst [vmem:[#allocation7 + $0x28] sm:$0xff] %v6068_v22  ;;  %v6431_v7 = vpop.permute.xlu0 %6430  ;;  %v6421_v57 = vpop.permute.xlu1 %6420  ;;  %v6063_v25 = vpack.c.bf16 %v4742_v33, %v4741_v18 }
 0x69b   : > { %v6433_v28 = vunpack.i.h.bf16 %v6431_v7  ;;  %v6432_v17 = vunpack.i.l.bf16 %v6431_v7  ;;  %v6423_v47 = vunpack.i.h.bf16 %v6421_v57  ;;  %v6422_v40 = vunpack.i.l.bf16 %v6421_v57 }
 0x69c   : > { %4808 = vst [vmem:[#allocation7 + $0x8] sm:$0xff] %v6063_v25 }
 0x69d   : > { %v4722_v44 = vsel %vm9483_vm13, %v6423_v47, %v6432_v17  ;;  %v4721_v35 = vsel %vm9484_vm14, %v6412_v4, %v6423_v47  ;;  %v4717_v62 = vsel %vm9485_vm15, %v6418_v10, %v6422_v40  ;;  %v4718_v39 = vsel %vm9486_vm6, %v6422_v40, %v6433_v28 }
 0x69e   : > { %v4752_v61 = vmax.f32 %v9121_v1, %v4722_v44  ;;  %v4751_v43 = vmax.f32 %v9088_v32, %v4721_v35  ;;  %v6426_v63 = vpop.permute.xlu1 %6425  ;;  %v4747_v14 = vmax.f32 %v9104_v8, %v4717_v62  ;;  %v4748_v12 = vmax.f32 %v9117_v27, %v4718_v39 }
 0x69f   : > { %v6428_v38 = vunpack.i.h.bf16 %v6426_v63  ;;  %v6427_v5 = vunpack.i.l.bf16 %v6426_v63 }
 0x6a0   : > { %v6069_v20 = vpack.c.bf16 %v4752_v61, %v4751_v43  ;;  %v6066_v55 = vpack.c.bf16 %v4747_v14, %v4746_v29  ;;  %v6067_v11 = vpack.c.bf16 %v4748_v12, %v4748_v12 }
 0x6a1   : > { %v4713_v13 = vsel %vm9487_vm7, %v6417_v52, %v6428_v38  ;;  %v4723_v1 = vsel %vm9488_vm4, %v6432_v17, %v6427_v5  ;;  %v4903_v54 = vld [vmem:[#allocation7 + $0x2c] sm:$0xf]  ;;  %v4825_v42 = vld [vmem:[#allocation7 + $0x28] sm:$0xf] }
 0x6a2   : > { %4814 = vst [vmem:[#allocation7 + $0x30] sm:$0xff] %v6069_v20  ;;  %v4743_v49 = vmax.f32 %v9100_v59, %v4713_v13  ;;  %v4753_v32 = vmax.f32 %v9125_v53, %v4723_v1  ;;  %4911 = vrot.lane.b32.xlu1 %v4903_v54, %s6512_s18  ;;  %4833 = vrot.lane.b32.xlu0 %v4825_v42, %s6512_s18  ;;  %4811 = vst [vmem:[#allocation7 + $0x1c] sm:$0xff] %v6066_v55  ;;  %v4897_v8 = vld [vmem:[#allocation7 + $0x2c] sm:$0xf]  ;;  %v4843_v41 = vld [vmem:[#allocation7 + $0x28] sm:$0xf] }
 0x6a3   : > { %4812 = vst [vmem:[#allocation7 + $0x24] sm:$0xf] %v6067_v11  ;;  %4900 = vst.msk [vmem:[#allocation8 + $0x44] sm:$0xf] %vm4819_vm9, %v4897_v8  ;;  %v4921_v56 = vld [vmem:[#allocation7 + $0x2c] sm:$0xf] }
 0x6a4   : > { %v6064_v27 = vpack.c.bf16 %v4743_v49, %v4743_v49  ;;  %v6070_v6 = vpack.c.bf16 %v4753_v32, %v4753_v32  ;;  %v4818_v59 = vld [vmem:[#allocation7 + $0x28] sm:$0xf]  ;;  %v5051_v15 = vld [vmem:[#allocation7 + $0xc] sm:$0xf] }
 0x6a5   : > { %4822 = vst.msk [vmem:[#allocation8 + $0x8] sm:$0xf] %vm4819_vm9, %v4818_v59  ;;  %v4973_v53 = vld [vmem:[#allocation7 + $0x8] sm:$0xf]  ;;  %5054 = vst.msk [vmem:[#allocation8 + $0xb4] sm:$0xf] %vm4819_vm9, %v5051_v15 }
 0x6a6   : > { %4809 = vst [vmem:[#allocation7 + $0x10] sm:$0xf] %v6064_v27  ;;  %4815 = vst [vmem:[#allocation7 + $0x38] sm:$0xf] %v6070_v6  ;;  %4851 = vrot.lane.b32.xlu1 %v4843_v41, %s6530_s16  ;;  %4929 = vrot.lane.b32.xlu0 %v4921_v56, %s6530_s16  ;;  %v4939_v9 = vld [vmem:[#allocation7 + $0x2c] sm:$0xf] }
 0x6a7   : > { %4976 = vst.msk [vmem:[#allocation8 + $0x78] sm:$0xf] %vm4819_vm9, %v4973_v53  ;;  %v4861_v24 = vld [vmem:[#allocation7 + $0x28] sm:$0xf]  ;;  %v4957_v19 = vld [vmem:[#allocation7 + $0x2c] sm:$0xf] }
 0x6a8   : > { %v4879_v45 = vld [vmem:[#allocation7 + $0x28] sm:$0xf]  ;;  %v5057_v60 = vld [vmem:[#allocation7 + $0xc] sm:$0xf] }
 0x6a9   : > { %v4997_v0 = vld [vmem:[#allocation7 + $0x8] sm:$0xf]  ;;  %v5093_v36 = vld [vmem:[#allocation7 + $0xc] sm:$0xf]  ;;  %v4974_v50 = vld [vmem:[#allocation7 + $0x1c] sm:$0xf] }
 0x6aa   : > { %4947 = vrot.lane.b32.xlu1 %v4939_v9, %s6533_s15  ;;  %4869 = vrot.lane.b32.xlu0 %v4861_v24, %s6533_s15  ;;  %v6447_v48 = vld [vmem:[#allocation8 + $0x40] sm:$0xff]   ;;  %4977 = vst.msk [vmem:[#allocation8 + $0x7c] sm:$0xf] %vm4819_vm9, %v4974_v50  ;;  %v4975_v46 = vld [vmem:[#allocation7 + $0x30] sm:$0xf] }
 0x6ab   : > { %6071 = vmatprep.subr.bf16.mxu0 %v6447_v48  ;;  %v5130_v23 = vld [vmem:[#allocation7 + $0x24] sm:$0xf]  ;;  %4978 = vst.msk [vmem:[#allocation8 + $0x80] sm:$0xf] %vm4819_vm9, %v4975_v46  ;;  %v5052_v31 = vld [vmem:[#allocation7 + $0x20] sm:$0xf] }
 0x6ac   : > { %6072 = vmatpush3.bf16.msra.mxu0 %v6448_v37  ;;  %5133 = vst.msk [vmem:[#allocation8 + $0xf4] sm:$0xf] %vm4819_vm9, %v5130_v23  ;;  %v4979_v4 = vld [vmem:[#allocation7 + $0x8] sm:$0xf]  ;;  %v5053_v51 = vld [vmem:[#allocation7 + $0x34] sm:$0xf] }
 0x6ad   : > { %v5129_v26 = vld [vmem:[#allocation7 + $0x10] sm:$0xf]  ;;  %v5131_v2 = vld [vmem:[#allocation7 + $0x38] sm:$0xf]  ;;  %5055 = vst.msk [vmem:[#allocation8 + $0xb8] sm:$0xf] %vm4819_vm9, %v5052_v31 }
 0x6ae   : > { %4887 = vrot.lane.b32.xlu1 %v4879_v45, %s6534_s24  ;;  %4965 = vrot.lane.b32.xlu0 %v4957_v19, %s6534_s24  ;;  %5132 = vst.msk [vmem:[#allocation8 + $0xf0] sm:$0xf] %vm4819_vm9, %v5129_v26  ;;  %5134 = vst.msk [vmem:[#allocation8 + $0xf8] sm:$0xf] %vm4819_vm9, %v5131_v2  ;;  %v5153_v34 = vld [vmem:[#allocation7 + $0x10] sm:$0xf] }
 0x6af   : > { %5056 = vst.msk [vmem:[#allocation8 + $0xbc] sm:$0xf] %vm4819_vm9, %v5053_v51  ;;  %v5075_v30 = vld [vmem:[#allocation7 + $0xc] sm:$0xf]  ;;  %v5058_v3 = vld [vmem:[#allocation7 + $0x20] sm:$0xf] }
 0x6b0   : > { %v5015_v10 = vld [vmem:[#allocation7 + $0x8] sm:$0xf]  ;;  %v4980_v52 = vld [vmem:[#allocation7 + $0x1c] sm:$0xf]  ;;  %v5111_v22 = vld [vmem:[#allocation7 + $0xc] sm:$0xf] }
 0x6b1   : > { %v5076_v16 = vld [vmem:[#allocation7 + $0x20] sm:$0xf]  ;;  %v4998_v18 = vld [vmem:[#allocation7 + $0x1c] sm:$0xf]  ;;  %v5136_v33 = vld [vmem:[#allocation7 + $0x24] sm:$0xf] }
 0x6b2   : > { %5003 = vrot.lane.b32.xlu1 %v4997_v0, %s6530_s16  ;;  %5063 = vrot.lane.b32.xlu0 %v5057_v60, %s6512_s18  ;;  %v5094_v21 = vld [vmem:[#allocation7 + $0x20] sm:$0xf]  ;;  %v5016_v7 = vld [vmem:[#allocation7 + $0x1c] sm:$0xf]  ;;  %v5154_v57 = vld [vmem:[#allocation7 + $0x24] sm:$0xf] }
 0x6b3   : > { %v5112_v25 = vld [vmem:[#allocation7 + $0x20] sm:$0xf]  ;;  %v5034_v28 = vld [vmem:[#allocation7 + $0x1c] sm:$0xf]  ;;  %v5059_v17 = vld [vmem:[#allocation7 + $0x34] sm:$0xf] }
 0x6b4   : > { %v5171_v47 = vld [vmem:[#allocation7 + $0x10] sm:$0xf]  ;;  %v5033_v40 = vld [vmem:[#allocation7 + $0x8] sm:$0xf]  ;;  %v5077_v35 = vld [vmem:[#allocation7 + $0x34] sm:$0xf] }
 0x6b5   : > { %v4981_v29 = vld [vmem:[#allocation7 + $0x30] sm:$0xf]  ;;  %v5095_v39 = vld [vmem:[#allocation7 + $0x34] sm:$0xf]  ;;  %v5137_v43 = vld [vmem:[#allocation7 + $0x38] sm:$0xf] }
 0x6b6   : > { %5099 = vrot.lane.b32.xlu1 %v5093_v36, %s6533_s15  ;;  %4985 = vrot.lane.b32.xlu0 %v4979_v4, %s6512_s18  ;;  %v4999_v44 = vld [vmem:[#allocation7 + $0x30] sm:$0xf]  ;;  %v5155_v12 = vld [vmem:[#allocation7 + $0x38] sm:$0xf]  ;;  %v5113_v11 = vld [vmem:[#allocation7 + $0x34] sm:$0xf] }
 0x6b7   : > { %v5017_v38 = vld [vmem:[#allocation7 + $0x30] sm:$0xf]  ;;  %v5172_v54 = vld [vmem:[#allocation7 + $0x24] sm:$0xf]  ;;  %v5173_v27 = vld [vmem:[#allocation7 + $0x38] sm:$0xf] }
 0x6b8   : > { %v5035_v55 = vld [vmem:[#allocation7 + $0x30] sm:$0xf]  ;;  %v5191_v59 = vld [vmem:[#allocation7 + $0x38] sm:$0xf]  ;;  %v5190_v15 = vld [vmem:[#allocation7 + $0x24] sm:$0xf] }
 0x6b9   : > { %v5135_v42 = vld [vmem:[#allocation7 + $0x10] sm:$0xf] }
 0x6ba   : > { %5159 = vrot.lane.b32.xlu1 %v5153_v34, %s6530_s16  ;;  %5081 = vrot.lane.b32.xlu0 %v5075_v30, %s6530_s16  ;;  %v5189_v8 = vld [vmem:[#allocation7 + $0x10] sm:$0xf] }
 0x6bb   : > { %v6496_v48 = vld [vmem:[%s9383_s5 + $0x10] ss:$20 sps:$4 sm:$0xff]  }
 0x6bc   : > { %6150 = vmatprep.mubr.msk.bf16.mxu1 %vm5573_vm5, %v6496_v48 }
 0x6be   : > { %5065 = vrot.lane.b32.xlu1 %v5058_v3, %s6512_s18  ;;  %5021 = vrot.lane.b32.xlu0 %v5015_v10, %s6533_s15 }
 0x6c2   : > { %4987 = vrot.lane.b32.xlu1 %v4980_v52, %s6512_s18  ;;  %5117 = vrot.lane.b32.xlu0 %v5111_v22, %s6534_s24 }
 0x6c6   : > { %5083 = vrot.lane.b32.xlu1 %v5076_v16, %s6530_s16  ;;  %5005 = vrot.lane.b32.xlu0 %v4998_v18, %s6530_s16 }
 0x6ca   : > { %5143 = vrot.lane.b32.xlu1 %v5136_v33, %s6512_s18  ;;  %5101 = vrot.lane.b32.xlu0 %v5094_v21, %s6533_s15 }
 0x6ce   : > { %5023 = vrot.lane.b32.xlu1 %v5016_v7, %s6533_s15  ;;  %5161 = vrot.lane.b32.xlu0 %v5154_v57, %s6530_s16  ;;  %v6461_v57 = vld [vmem:[#allocation8 + $0x78] sm:$0xff]  }
 0x6d2   : > { %5119 = vrot.lane.b32.xlu1 %v5112_v25, %s6534_s24  ;;  %5041 = vrot.lane.b32.xlu0 %v5034_v28, %s6534_s24 }
 0x6d6   : > { %5067 = vrot.lane.b32.xlu1 %v5059_v17, %s6512_s18  ;;  %5177 = vrot.lane.b32.xlu0 %v5171_v47, %s6533_s15  ;;  %v6463_v47 = vld [vmem:[%s9383_s5] ss:$20 sps:$4 sm:$0xff]  }
 0x6da   : > { %5039 = vrot.lane.b32.xlu1 %v5033_v40, %s6534_s24  ;;  %4989 = vrot.lane.b32.xlu0 %v4981_v29, %s6512_s18  ;;  %v6482_v40 = vld [vmem:[%s9383_s5 + $0x2c] ss:$20 sps:$4 sm:$0xff]  }
 0x6de   : > { %5007 = vrot.lane.b32.xlu1 %v4999_v44, %s6530_s16  ;;  %5085 = vrot.lane.b32.xlu0 %v5077_v35, %s6530_s16 }
 0x6e0   : > { %v4908_v61 = vpop.permute.xlu0 %4907  ;;  %v4848_v62 = vpop.permute.xlu1 %4847 }
 0x6e1   : > { %4916 = vst.msk [vmem:[#allocation8 + $0x48] sm:$0xf] %vm4819_vm9, %v4908_v61  ;;  %4856 = vst.msk [vmem:[#allocation8 + $0x18] sm:$0xf] %vm4819_vm9, %v4848_v62 }
 0x6e2   : > { %5103 = vrot.lane.b32.xlu1 %v5095_v39, %s6533_s15  ;;  %5145 = vrot.lane.b32.xlu0 %v5137_v43, %s6512_s18  ;;  %v6484_v43 = vld [vmem:[%s9383_s5 + $0x28] ss:$20 sps:$4 sm:$0xff]  }
 0x6e4   : > { %v4944_v63 = vpop.permute.xlu1 %4943  ;;  %v4830_v14 = vpop.permute.xlu0 %4829 }
 0x6e5   : > { %4952 = vst.msk [vmem:[#allocation8 + $0x60] sm:$0xf] %vm4819_vm9, %v4944_v63  ;;  %4838 = vst.msk [vmem:[#allocation8 + $0xc] sm:$0xf] %vm4819_vm9, %v4830_v14  ;;  %v6491_v63 = vld [vmem:[%s9383_s5 + $0xc] ss:$20 sps:$4 sm:$0xff]  }
 0x6e6   : > { %5163 = vrot.lane.b32.xlu1 %v5155_v12, %s6530_s16  ;;  %5025 = vrot.lane.b32.xlu0 %v5017_v38, %s6533_s15 }
 0x6e8   : > { %v4884_v5 = vpop.permute.xlu1 %4883  ;;  %v4926_v20 = vpop.permute.xlu0 %4925 }
 0x6e9   : > { %4892 = vst.msk [vmem:[#allocation8 + $0x30] sm:$0xf] %vm4819_vm9, %v4884_v5  ;;  %4934 = vst.msk [vmem:[#allocation8 + $0x54] sm:$0xf] %vm4819_vm9, %v4926_v20 }
 0x6ea   : > { %5043 = vrot.lane.b32.xlu1 %v5035_v55, %s6534_s24  ;;  %5121 = vrot.lane.b32.xlu0 %v5113_v11, %s6534_s24 }
 0x6ec   : > { %v4910_v13 = vpop.permute.xlu1 %4909  ;;  %v4866_v1 = vpop.permute.xlu0 %4865  ;;  %v6450_v53 = vld [vmem:[#allocation8 + $0x8] sm:$0xff]  }
 0x6ed   : > { %4917 = vst.msk [vmem:[#allocation8 + $0x4c] sm:$0xf] %vm4819_vm9, %v4910_v13  ;;  %4874 = vst.msk [vmem:[#allocation8 + $0x24] sm:$0xf] %vm4819_vm9, %v4866_v1 }
 0x6ee   : > { %5179 = vrot.lane.b32.xlu1 %v5172_v54, %s6533_s15  ;;  %5141 = vrot.lane.b32.xlu0 %v5135_v42, %s6512_s18 }
 0x6f0   : > { %v4832_v49 = vpop.permute.xlu1 %4831  ;;  %v4962_v32 = vpop.permute.xlu0 %4961 }
 0x6f1   : > { %4839 = vst.msk [vmem:[#allocation8 + $0x10] sm:$0xf] %vm4819_vm9, %v4832_v49  ;;  %4970 = vst.msk [vmem:[#allocation8 + $0x6c] sm:$0xf] %vm4819_vm9, %v4962_v32 }
 0x6f2   : > { %5195 = vrot.lane.b32.xlu1 %v5189_v8, %s6534_s24  ;;  %5181 = vrot.lane.b32.xlu0 %v5173_v27, %s6533_s15 }
 0x6f4   : > { %v4928_v6 = vpop.permute.xlu1 %4927  ;;  %v4850_v41 = vpop.permute.xlu0 %4849  ;;  %v6449_v56 = vld [vmem:[#allocation8 + $0x48] sm:$0xff]  }
 0x6f5   : > { %4935 = vst.msk [vmem:[#allocation8 + $0x58] sm:$0xf] %vm4819_vm9, %v4928_v6  ;;  %4857 = vst.msk [vmem:[#allocation8 + $0x1c] sm:$0xf] %vm4819_vm9, %v4850_v41  ;;  %6073 = vmatprep.subr.bf16.mxu0 %v6449_v56 }
 0x6f6   : > { %5199 = vrot.lane.b32.xlu1 %v5191_v59, %s6534_s24  ;;  %5197 = vrot.lane.b32.xlu0 %v5190_v15, %s6534_s24 }
 0x6f7   : > { %6074 = vmatpush3.bf16.msra.mxu0 %v6450_v53 }
 0x6f8   : > { %v4868_v9 = vpop.permute.xlu1 %4867  ;;  %v4946_v24 = vpop.permute.xlu0 %4945 }
 0x6f9   : > { %4875 = vst.msk [vmem:[#allocation8 + $0x28] sm:$0xf] %vm4819_vm9, %v4868_v9  ;;  %4953 = vst.msk [vmem:[#allocation8 + $0x64] sm:$0xf] %vm4819_vm9, %v4946_v24 }
 0x6fc   : > { %v4964_v37 = vpop.permute.xlu1 %4963  ;;  %v4886_v45 = vpop.permute.xlu0 %4885  ;;  %v6454_v51 = vld [vmem:[#allocation8 + $0x18] sm:$0xff]  }
 0x6fd   : > { %4971 = vst.msk [vmem:[#allocation8 + $0x70] sm:$0xf] %vm4819_vm9, %v4964_v37  ;;  %4893 = vst.msk [vmem:[#allocation8 + $0x34] sm:$0xf] %vm4819_vm9, %v4886_v45 }
 0x700   : > { %v6455_v34 = vld [vmem:[#allocation8 + $0x60] sm:$0xff]  }
 0x704   : > { %v6460_v7 = vld [vmem:[#allocation8 + $0x30] sm:$0xff]  }
 0x714   : > { %v4912_v19 = vpop.permute.xlu1 %4911  ;;  %v4834_v0 = vpop.permute.xlu0 %4833 }
 0x715   : > { %4918 = vst.msk [vmem:[#allocation8 + $0x50] sm:$0xf] %vm4819_vm9, %v4912_v19  ;;  %4840 = vst.msk [vmem:[#allocation8 + $0x14] sm:$0xf] %vm4819_vm9, %v4834_v0 }
 0x718   : > { %v4852_v60 = vpop.permute.xlu1 %4851  ;;  %v4930_v36 = vpop.permute.xlu0 %4929 }
 0x719   : > { %4858 = vst.msk [vmem:[#allocation8 + $0x20] sm:$0xf] %vm4819_vm9, %v4852_v60  ;;  %4936 = vst.msk [vmem:[#allocation8 + $0x5c] sm:$0xf] %vm4819_vm9, %v4930_v36 }
 0x71c   : > { %v4948_v50 = vpop.permute.xlu1 %4947  ;;  %v4870_v46 = vpop.permute.xlu0 %4869  ;;  %v6451_v26 = vld [vmem:[#allocation8 + $0x50] sm:$0xff]  }
 0x71d   : > { %4954 = vst.msk [vmem:[#allocation8 + $0x68] sm:$0xf] %vm4819_vm9, %v4948_v50  ;;  %4876 = vst.msk [vmem:[#allocation8 + $0x2c] sm:$0xf] %vm4819_vm9, %v4870_v46  ;;  %v6452_v23 = vld [vmem:[#allocation8 + $0x10] sm:$0xff]   ;;  %6075 = vmatprep.subr.bf16.mxu0 %v6451_v26 }
 0x71e   : > { %6076 = vmatpush3.bf16.msra.mxu0 %v6452_v23 }
 0x720   : > { %v4888_v2 = vpop.permute.xlu1 %4887  ;;  %v6453_v31 = vld [vmem:[#allocation8 + $0x58] sm:$0xff]   ;;  %v4966_v4 = vpop.permute.xlu0 %4965  ;;  %v6456_v3 = vld [vmem:[#allocation8 + $0x20] sm:$0xff]  }
 0x721   : > { %4894 = vst.msk [vmem:[#allocation8 + $0x38] sm:$0xf] %vm4819_vm9, %v4888_v2  ;;  %4972 = vst.msk [vmem:[#allocation8 + $0x74] sm:$0xf] %vm4819_vm9, %v4966_v4  ;;  %6077 = vmatprep.subr.bf16.mxu0 %v6453_v31  ;;  %v6481_v31 = vld [vmem:[#allocation8 + $0xf0] sm:$0xff]  }
 0x722   : > { %6078 = vmatpush3.bf16.msra.mxu0 %v6454_v51 }
 0x723   : > { %6079 = vmatprep.subr.bf16.mxu0 %v6455_v34 }
 0x724   : > { %v5004_v30 = vpop.permute.xlu1 %5003  ;;  %v5064_v58 = vpop.permute.xlu0 %5063  ;;  %v6457_v10 = vld [vmem:[#allocation8 + $0x68] sm:$0xff]  }
 0x725   : > { %5012 = vst.msk [vmem:[#allocation8 + $0x90] sm:$0xf] %vm4819_vm9, %v5004_v30  ;;  %5072 = vst.msk [vmem:[#allocation8 + $0xc0] sm:$0xf] %vm4819_vm9, %v5064_v58  ;;  %v6458_v16 = vld [vmem:[#allocation8 + $0x28] sm:$0xff]  }
 0x726   : > { %6080 = vmatpush3.bf16.msra.mxu0 %v6456_v3  ;;  %v6488_v3 = vld [vmem:[#allocation8 + $0xb8] sm:$0xff]  }
 0x727   : > { %6081 = vmatprep.subr.bf16.mxu0 %v6457_v10  ;;  %v6489_v10 = vld [vmem:[%s9383_s5 + $0x8] ss:$20 sps:$4 sm:$0xff]  }
 0x728   : > { %v5100_v52 = vpop.permute.xlu1 %5099  ;;  %v4986_v22 = vpop.permute.xlu0 %4985  ;;  %v6459_v18 = vld [vmem:[#allocation8 + $0x70] sm:$0xff]   ;;  %v6462_v17 = vld [vmem:[#allocation8 + $0x38] sm:$0xff]  }
 0x729   : > { %5108 = vst.msk [vmem:[#allocation8 + $0xd8] sm:$0xf] %vm4819_vm9, %v5100_v52  ;;  %4994 = vst.msk [vmem:[#allocation8 + $0x84] sm:$0xf] %vm4819_vm9, %v4986_v22  ;;  %v6494_v52 = vld [vmem:[%s9383_s5 + $0x34] ss:$20 sps:$4 sm:$0xff]  }
 0x72a   : > { %6082 = vmatpush3.bf16.msra.mxu0 %v6458_v16 }
 0x72b   : > { %6083 = vmatprep.subr.bf16.mxu0 %v6459_v18 }
 0x72c   : > { %v5160_v33 = vpop.permute.xlu1 %5159  ;;  %v5082_v21 = vpop.permute.xlu0 %5081 }
 0x72d   : > { %5168 = vst.msk [vmem:[#allocation8 + $0x108] sm:$0xf] %vm4819_vm9, %v5160_v33  ;;  %5090 = vst.msk [vmem:[#allocation8 + $0xcc] sm:$0xf] %vm4819_vm9, %v5082_v21  ;;  %v6497_v33 = vld [vmem:[%s9383_s5 + $0x30] ss:$20 sps:$4 sm:$0xff]  }
 0x72e   : > { %6084 = vmatpush3.bf16.msra.mxu0 %v6460_v7  ;;  %v6498_v21 = vld [vmem:[%s9383_s5 + $0x38] ss:$20 sps:$4 sm:$0xff]   ;;  %v6535_v7 = vmov 0.0  }
 0x72f   : > { %6085 = vmatprep.subr.bf16.mxu0 %v6461_v57 }
 0x730   : > { %v5066_v25 = vpop.permute.xlu1 %5065  ;;  %v5022_v28 = vpop.permute.xlu0 %5021  ;;  %v6467_v39 = vld [vmem:[#allocation8 + $0x80] sm:$0xff]  }
 0x731   : > { %5073 = vst.msk [vmem:[#allocation8 + $0xc4] sm:$0xf] %vm4819_vm9, %v5066_v25  ;;  %5030 = vst.msk [vmem:[#allocation8 + $0x9c] sm:$0xf] %vm4819_vm9, %v5022_v28 }
 0x732   : > { %6086 = vmatpush3.bf16.msra.mxu0 %v6462_v17 }
 0x734   : > { %v4988_v29 = vpop.permute.xlu1 %4987  ;;  %v5118_v44 = vpop.permute.xlu0 %5117 }
 0x735   : > { %4995 = vst.msk [vmem:[#allocation8 + $0x88] sm:$0xf] %vm4819_vm9, %v4988_v29  ;;  %5126 = vst.msk [vmem:[#allocation8 + $0xe4] sm:$0xf] %vm4819_vm9, %v5118_v44  ;;  %5616 = vmatmul.mubr.bf16.vlgmr.msra.gmra.mrb[20].mxu0 %v6463_v47 }
 0x736   : > { %5623 = vmatprep.mubr.bf16.mxu0 %v6482_v40 }
 0x738   : > { %v5084_v35 = vpop.permute.xlu1 %5083  ;;  %v6466_v61 = vld [vmem:[#allocation8 + $0xc0] sm:$0xff]   ;;  %v5006_v62 = vpop.permute.xlu0 %5005 }
 0x739   : > { %5091 = vst.msk [vmem:[#allocation8 + $0xd0] sm:$0xf] %vm4819_vm9, %v5084_v35  ;;  %5013 = vst.msk [vmem:[#allocation8 + $0x94] sm:$0xf] %vm4819_vm9, %v5006_v62  ;;  %6099 = vmatprep.subr.bf16.mxu0 %v6466_v61 }
 0x73a   : > { %6100 = vmatpush3.bf16.msra.mxu0 %v6467_v39 }
 0x73c   : > { %v5144_v14 = vpop.permute.xlu1 %5143  ;;  %v5102_v12 = vpop.permute.xlu0 %5101 }
 0x73d   : > { %5151 = vst.msk [vmem:[#allocation8 + $0x100] sm:$0xf] %vm4819_vm9, %v5144_v14  ;;  %5109 = vst.msk [vmem:[#allocation8 + $0xdc] sm:$0xf] %vm4819_vm9, %v5102_v12  ;;  %5624 = vmatmul.mubr.bf16.gmra.mrb[24].mxu0 %v6484_v43  ;;  %v5294_v43 = vld [vmem:[%s9384_s6] sm:$0xff]  ;;  %v5295_v14 = vld [vmem:[%s9384_s6 + $0x8] sm:$0xff] }
 0x73e   : > { %5664 = vmatprep.mubr.bf16.mxu0 %v6491_v63 }
 0x740   : > { %v5024_v38 = vpop.permute.xlu1 %5023  ;;  %v5162_v5 = vpop.permute.xlu0 %5161  ;;  %v6471_v53 = vld [vmem:[#allocation8 + $0x90] sm:$0xff]  }
 0x741   : > { %5031 = vst.msk [vmem:[#allocation8 + $0xa0] sm:$0xf] %vm4819_vm9, %v5024_v38  ;;  %5169 = vst.msk [vmem:[#allocation8 + $0x10c] sm:$0xf] %vm4819_vm9, %v5162_v5 }
 0x744   : > { %v5120_v20 = vpop.permute.xlu1 %5119  ;;  %v5042_v55 = vpop.permute.xlu0 %5041  ;;  %v6472_v15 = vld [vmem:[#allocation8 + $0xd8] sm:$0xff]  }
 0x745   : > { %5127 = vst.msk [vmem:[#allocation8 + $0xe8] sm:$0xf] %vm4819_vm9, %v5120_v20  ;;  %5049 = vst.msk [vmem:[#allocation8 + $0xac] sm:$0xf] %vm4819_vm9, %v5042_v55 }
 0x748   : > { %v5068_v11 = vpop.permute.xlu1 %5067  ;;  %v5178_v13 = vpop.permute.xlu0 %5177  ;;  %v6476_v19 = vld [vmem:[#allocation8 + $0x108] sm:$0xff]  }
 0x749   : > { %5074 = vst.msk [vmem:[#allocation8 + $0xc8] sm:$0xf] %vm4819_vm9, %v5068_v11  ;;  %5186 = vst.msk [vmem:[#allocation8 + $0x114] sm:$0xf] %vm4819_vm9, %v5178_v13 }
 0x74c   : > { %v5040_v1 = vpop.permute.xlu1 %5039  ;;  %v4990_v54 = vpop.permute.xlu0 %4989 }
 0x74d   : > { %5048 = vst.msk [vmem:[#allocation8 + $0xa8] sm:$0xf] %vm4819_vm9, %v5040_v1  ;;  %4996 = vst.msk [vmem:[#allocation8 + $0x8c] sm:$0xf] %vm4819_vm9, %v4990_v54 }
 0x750   : > { %v5008_v42 = vpop.permute.xlu1 %5007  ;;  %v6468_v49 = vld [vmem:[#allocation8 + $0xc8] sm:$0xff]   ;;  %v5086_v32 = vpop.permute.xlu0 %5085 }
 0x751   : > { %5014 = vst.msk [vmem:[#allocation8 + $0x98] sm:$0xf] %vm4819_vm9, %v5008_v42  ;;  %5092 = vst.msk [vmem:[#allocation8 + $0xd4] sm:$0xf] %vm4819_vm9, %v5086_v32  ;;  %6101 = vmatprep.subr.bf16.mxu0 %v6468_v49  ;;  %v5296_v42 = vld [vmem:[%s9384_s6 + $0x10] sm:$0xff] }
 0x754   : > { %v5104_v8 = vpop.permute.xlu1 %5103  ;;  %v5146_v27 = vpop.permute.xlu0 %5145  ;;  %v6469_v6 = vld [vmem:[#allocation8 + $0x88] sm:$0xff]  }
 0x755   : > { %5110 = vst.msk [vmem:[#allocation8 + $0xe0] sm:$0xf] %vm4819_vm9, %v5104_v8  ;;  %5152 = vst.msk [vmem:[#allocation8 + $0x104] sm:$0xf] %vm4819_vm9, %v5146_v27  ;;  %6102 = vmatpush3.bf16.msra.mxu0 %v6469_v6  ;;  %v6480_v2 = vld [vmem:[#allocation8 + $0xa8] sm:$0xff]   ;;  %v5297_v8 = vld [vmem:[%s9384_s6 + $0x18] sm:$0xff] }
 0x758   : > { %v5164_v41 = vpop.permute.xlu1 %5163  ;;  %v5026_v56 = vpop.permute.xlu0 %5025  ;;  %v6470_v59 = vld [vmem:[#allocation8 + $0xd0] sm:$0xff]   ;;  %v6474_v37 = vld [vmem:[#allocation8 + $0x98] sm:$0xff]  }
 0x759   : > { %5170 = vst.msk [vmem:[#allocation8 + $0x110] sm:$0xf] %vm4819_vm9, %v5164_v41  ;;  %5032 = vst.msk [vmem:[#allocation8 + $0xa4] sm:$0xf] %vm4819_vm9, %v5026_v56  ;;  %6103 = vmatprep.subr.bf16.mxu0 %v6470_v59 }
 0x75a   : > { %6104 = vmatpush3.bf16.msra.mxu0 %v6471_v53 }
 0x75b   : > { %6105 = vmatprep.subr.bf16.mxu0 %v6472_v15 }
 0x75c   : > { %v5044_v9 = vpop.permute.xlu1 %5043  ;;  %v5122_v24 = vpop.permute.xlu0 %5121  ;;  %v6473_v48 = vld [vmem:[#allocation8 + $0x100] sm:$0xff]  }
 0x75d   : > { %5050 = vst.msk [vmem:[#allocation8 + $0xb0] sm:$0xf] %vm4819_vm9, %v5044_v9  ;;  %5128 = vst.msk [vmem:[#allocation8 + $0xec] sm:$0xf] %vm4819_vm9, %v5122_v24  ;;  %6138 = vmatprep.subr.bf16.mxu1 %v6473_v48  ;;  %v6475_v45 = vld [vmem:[#allocation8 + $0xe0] sm:$0xff]  }
 0x75e   : > { %6139 = vmatpush3.bf16.msra.mxu1 %v6473_v48  ;;  %6106 = vmatpush3.bf16.msra.mxu0 %v6474_v37 }
 0x75f   : > { %6107 = vmatprep.subr.bf16.mxu0 %v6475_v45  ;;  %6140 = vmatprep.subr.bf16.mxu1 %v6476_v19 }
 0x760   : > { %v5180_v0 = vpop.permute.xlu1 %5179  ;;  %v5142_v60 = vpop.permute.xlu0 %5141  ;;  %v6477_v36 = vld [vmem:[#allocation8 + $0xa0] sm:$0xff]   ;;  %v6478_v50 = vld [vmem:[#allocation8 + $0x110] sm:$0xff]  }
 0x761   : > { %5187 = vst.msk [vmem:[#allocation8 + $0x118] sm:$0xf] %vm4819_vm9, %v5180_v0  ;;  %5150 = vst.msk [vmem:[#allocation8 + $0xfc] sm:$0xf] %vm4819_vm9, %v5142_v60 }
 0x762   : > { %6141 = vmatpush3.bf16.msra.mxu1 %v6476_v19  ;;  %6108 = vmatpush3.bf16.msra.mxu0 %v6477_v36 }
 0x763   : > { %6142 = vmatprep.subr.bf16.mxu1 %v6478_v50 }
 0x764   : > { %v5196_v46 = vpop.permute.xlu1 %5195  ;;  %v5182_v26 = vpop.permute.xlu0 %5181  ;;  %v6479_v23 = vld [vmem:[#allocation8 + $0xe8] sm:$0xff]   ;;  %v6485_v34 = vld [vmem:[#allocation8 + $0xb0] sm:$0xff]  }
 0x765   : > { %5204 = vst.msk [vmem:[#allocation8 + $0x120] sm:$0xf] %vm4819_vm9, %v5196_v46  ;;  %5188 = vst.msk [vmem:[#allocation8 + $0x11c] sm:$0xf] %vm4819_vm9, %v5182_v26  ;;  %6109 = vmatprep.subr.bf16.mxu0 %v6479_v23 }
 0x766   : > { %6143 = vmatpush3.bf16.msra.mxu1 %v6478_v50  ;;  %6110 = vmatpush3.bf16.msra.mxu0 %v6480_v2 }
 0x767   : > { %6111 = vmatprep.subr.bf16.mxu0 %v6481_v31 }
 0x768   : > { %v5200_v4 = vpop.permute.xlu1 %5199  ;;  %v5198_v51 = vpop.permute.xlu0 %5197  ;;  %v6486_v30 = vld [vmem:[#allocation8 + $0xf8] sm:$0xff]  }
 0x769   : > { %5206 = vst.msk [vmem:[#allocation8 + $0x128] sm:$0xf] %vm4819_vm9, %v5200_v4  ;;  %5205 = vst.msk [vmem:[#allocation8 + $0x124] sm:$0xf] %vm4819_vm9, %v5198_v51  ;;  %v5734_v4 = vld [vmem:[%s9385_s7] sm:$0x1] }
 0x76a   : > { %6112 = vmatpush3.bf16.msra.mxu0 %v6485_v34  ;;  %v5737_v51 = vld [vmem:[%s9386_s8] sm:$0x3] }
 0x76b   : > { %6113 = vmatprep.subr.bf16.mxu0 %v6486_v30 }
 0x76c   : > { %v6487_v58 = vld [vmem:[#allocation8 + $0x118] sm:$0xff]  }
 0x76d   : > { %6144 = vmatprep.subr.bf16.mxu1 %v6487_v58 }
 0x76e   : > { %6114 = vmatpush3.bf16.msra.mxu0 %v6488_v3  ;;  %6145 = vmatpush3.bf16.msra.mxu1 %v6487_v58 }
 0x76f   : > { %6154 = vmatprep.subr.bf16.mxu0 %v6535_v7 }
 0x770   : > { %v6492_v22 = vld [vmem:[#allocation8 + $0x120] sm:$0xff]   ;;  %v6493_v16 = vld [vmem:[#allocation8 + $0x128] ss:$0 sps:$4 sm:$0xff]  }
 0x771   : > { %5665 = vmatmul.mubr.bf16.vlgmr.msra.gmra.mrb[28].mxu0 %v6489_v10  ;;  %6146 = vmatprep.subr.bf16.mxu1 %v6492_v22  ;;  %v5581_v18 = vsel %vm372_vm1, %v6493_v16, 0 }
 0x772   : > { %6147 = vmatpush3.bf16.msra.mxu1 %v6492_v22  ;;  %5672 = vmatprep.mubr.bf16.mxu0 %v6494_v52 }
 0x773   : > { %6204 = vmatprep.subr.msk.bf16.mxu1 %vm372_vm1, %v6493_v16  ;;  %vm9489_vm1 = vcmask 261120  }
 0x776   : > { %6149 = vmatpush3.bf16.msra.mxu1 %v5581_v18 }
 0x779   : > { %5673 = vmatmul.mubr.bf16.gmra.mrb[32].mxu0 %v6497_v33  ;;  %6151 = vmatmul.mubr.msk.bf16.vlgmr.msra.gmra.mrb[24].mxu1 %vm5573_vm5, %v6498_v21 }
 0x77a   : > { %6158 = vmatprep.mubr.msk.bf16.mxu0 %vm6536_vm2, %v6535_v7 }
 0x808   : > { %v6087_v57 = vpop.f32.mrb[20].mxu0 }
 0x809   : > { %v6088_v25 = vpop.f32.mrb[21].mxu0 }
 0x80a   : > { %v6089_v28 = vadd.f32 %v6088_v25, %v6087_v57  ;;  %v6090_v17 = vpop.f32.mrb[22].mxu0 }
 0x80b   : > { %v6091_v47 = vpop.f32.mrb[23].mxu0 }
 0x80c   : > { %v6092_v40 = vadd.f32 %v6091_v47, %v6090_v17  ;;  %v5618_v38 = vadd.f32 %v6089_v28, %v5294_v43 }
 0x80e   : > { %v5621_v11 = vadd.f32 %v6092_v40, %v5295_v14 }
 0x810   : > { %v6093_v29 = vpop.f32.mrb[24].mxu0 }
 0x811   : > { %v6094_v44 = vpop.f32.mrb[25].mxu0 }
 0x812   : > { %v6095_v35 = vadd.f32 %v6094_v44, %v6093_v29  ;;  %v6096_v61 = vpop.f32.mrb[26].mxu0 }
 0x813   : > { %v6097_v62 = vpop.f32.mrb[27].mxu0 }
 0x814   : > { %v6098_v39 = vadd.f32 %v6097_v62, %v6096_v61  ;;  %v5626_v41 = vadd.f32 %v6095_v35, %v5296_v42 }
 0x816   : > { %v5629_v48 = vadd.f32 %v6098_v39, %v5297_v8 }
 0x844   : > { %v6115_v63 = vpop.f32.mrb[28].mxu0 }
 0x845   : > { %v6116_v12 = vpop.f32.mrb[29].mxu0 }
 0x846   : > { %v6117_v5 = vadd.f32 %v6116_v12, %v6115_v63  ;;  %v6118_v20 = vpop.f32.mrb[30].mxu0 }
 0x847   : > { %v6119_v55 = vpop.f32.mrb[31].mxu0 }
 0x848   : > { %v6120_v13 = vadd.f32 %v6119_v55, %v6118_v20  ;;  %v5667_v1 = vadd.f32 %v6117_v5, %v5618_v38 }
 0x84a   : > { %v5670_v54 = vadd.f32 %v6120_v13, %v5621_v11 }
 0x84c   : > { %v6121_v49 = vpop.f32.mrb[32].mxu0  ;;  %v6152_v32 = vpop.f32.mrb[24].mxu1 }
 0x84d   : > { %v6122_v27 = vpop.f32.mrb[33].mxu0  ;;  %v5715_v6 = vpop.f32.mrb[25].mxu1 }
 0x84e   : > { %v6123_v56 = vadd.f32 %v6122_v27, %v6121_v49  ;;  %v5716_v59 = vadd.f32 %v5715_v6, %v5667_v1  ;;  %v6124_v53 = vpop.f32.mrb[34].mxu0  ;;  %v6153_v15 = vpop.f32.mrb[26].mxu1 }
 0x84f   : > { %v6125_v9 = vpop.f32.mrb[35].mxu0  ;;  %v5718_v24 = vpop.f32.mrb[27].mxu1 }
 0x850   : > { %v5675_v37 = vadd.f32 %v6123_v56, %v5626_v41  ;;  %v6126_v45 = vadd.f32 %v6125_v9, %v6124_v53  ;;  %v5719_v19 = vadd.f32 %v5718_v24, %v5670_v54  ;;  %v5730_v60 = vmax.f32 %v5716_v59, 0.0 }
 0x852   : > { %v5724_v0 = vadd.f32 %v6152_v32, %v5675_v37  ;;  %v5678_v36 = vadd.f32 %v6126_v45, %v5629_v48  ;;  %v5731_v50 = vmax.f32 %v5719_v19, 0.0 }
 0x854   : > { %v5727_v46 = vadd.f32 %v6153_v15, %v5678_v36  ;;  %v5735_v26 = vpack.c.bf16 %v5731_v50, %v5730_v60  ;;  %v5732_v23 = vmax.f32 %v5724_v0, 0.0 }
 0x856   : > { %v5733_v2 = vmax.f32 %v5727_v46, 0.0  ;;  %6155 = vmatpush3.bf16.msra.mxu0 %v5735_v26 }
 0x857   : > { %6156 = vmatprep.subr.bf16.mxu0 %v6535_v7 }
 0x858   : > { %v5736_v31 = vpack.c.bf16 %v5733_v2, %v5732_v23 }
 0x85a   : > { %6157 = vmatpush3.bf16.msra.mxu0 %v5736_v31 }
 0x85d   : > { %6159 = vmatmul.mubr.msk.bf16.vlgmr.msra.gmra.mrb[36].mxu0 %vm9489_vm1, %v5734_v4 }
 0x930   : > { %v5776_v34 = vpop.f32.mrb[36].mxu0 }
 0x931   : > { %v5777_v30 = vadd.f32 %v5776_v34, %v5737_v51  ;;  %v6160_v58 = vpop.f32.mrb[37].mxu0 }
 0x932   : > { %v5779_v3 = vpop.f32.mrb[38].mxu0 }
 0x933   : > { %5783 = vst.msk [vmem:[%s330_s22] sm:$0x3] %vm5782_vm3, %v5777_v30  ;;  %v6161_v10 = vpop.f32.mrb[39].mxu0 }
 0x934 PF: > { %s19_s30 = sadd.s32 1, %s6507_s30  }
 0x935   : > { %p16_p4 = scmp.ge.s32.totalorder %s19_s30, 4  }
 0x937   :  { %18 = sbr.rel (!%p16_p4) target bundleno = 1 (0x1), region = 86 }

</bundles_post_ra>
